<compile_context>
chip_gen: v5e
topology: v5e:2x2
jax: 0.10.0
libtpu: 0.0.40
codegen_flags: <defaults>
</compile_context>

<pallas_src>
import functools

import jax
import jax.numpy as jnp
from jax.experimental import pallas as pl
from jax.experimental.pallas import tpu as pltpu

# Shapes consistent with TripleNet(descriptor_dim=128, parameter_dim=3,
# hidden_dim=128, num_layers=2, num_nets=3) at a small test batch.
B = 256          # batch
D = 128          # descriptor_dim
P = 3            # parameter_dim
H = 128          # hidden_dim
NUM_NETS = 3     # num_nets
PAD_P = 16       # p padded to 16 lanes for clean bf16 tiling


def _tpu_config():
    """Pick (fused_l2, num_batch_tiles) per TPU generation."""
    kind = ""
    try:
        kind = jax.devices()[0].device_kind.lower()
    except Exception:
        pass
    is_v5_like = "v5" in kind                    # 128x128 MXUs
    two_tensorcores = ("v7" in kind) or ("v4" in kind)
    fused_l2 = not is_v5_like                    # block-diag W2 fills 256-wide MXU
    num_batch_tiles = 2 if two_tensorcores else 1
    return fused_l2, num_batch_tiles


def _make_kernel(fused_l2, hidden, num_nets):
    def kernel(x_ref, p_ref, w1x_ref, w1p_ref, b1_ref, w2_ref, b2_ref,
               w3_ref, b3_ref, o_ref):
        x_f32 = x_ref[...]                                        # (tm, D) f32

        # Layer 1, all three nets fused; `combined` is never built in HBM:
        #   h1 = [p*p_scale | x]_bf16 @ W1  ==  x_bf16 @ W1x + p_pad @ W1p
        h1 = jnp.dot(x_f32.astype(jnp.bfloat16), w1x_ref[...],
                     preferred_element_type=jnp.float32)
        h1 = h1 + jnp.dot(p_ref[...], w1p_ref[...],
                          preferred_element_type=jnp.float32)
        h1 = jnp.maximum(h1 + b1_ref[...], 0.0).astype(jnp.bfloat16)  # (tm,3H)

        if fused_l2:
            # v6e/v7x: single block-diagonal (3H,3H) dot; the layer-3
            # K-reduction over 3H also performs the `x += mlp_n(...)` sum.
            h2 = jnp.dot(h1, w2_ref[...], preferred_element_type=jnp.float32)
            h2 = jnp.maximum(h2 + b2_ref[...], 0.0).astype(jnp.bfloat16)
            out = jnp.dot(h2, w3_ref[...], preferred_element_type=jnp.float32)
        else:
            # v5e: MXU-native 128x128 per-net dots; accumulate layer 3 per net
            # instead of building a (tm, 3H) f32 concat.
            b2 = b2_ref[...]
            out = None
            for n in range(num_nets):
                h2n = jnp.dot(h1[:, n * hidden:(n + 1) * hidden], w2_ref[n],
                              preferred_element_type=jnp.float32)
                h2n = jnp.maximum(h2n + b2[:, n * hidden:(n + 1) * hidden],
                                  0.0).astype(jnp.bfloat16)
                dn = jnp.dot(h2n, w3_ref[n],
                             preferred_element_type=jnp.float32)
                out = dn if out is None else out + dn

        # Residual + (pre-summed) layer-3 biases in full f32.
        # TODO(synk): torch mutates x in-place (`x += ...`); emulate with
        # input_output_aliases={0: 0} only if callers never reuse x afterwards.
        o_ref[...] = x_f32 + out + b3_ref[...]

    return kernel


def _run_kernel(x, p, packed, *, fused_l2, num_batch_tiles):
    B_, D_ = x.shape
    P_ = p.shape[1]
    threeh = NUM_NETS * H

    # Scale p in f32 (matches torch `p * p_scale`), then bf16-cast and pad to
    # PAD_P lanes. Tiny; fuses into the same jit executable as the kernel.
    p_pad = jnp.pad((p * packed["p_scale"]).astype(jnp.bfloat16),
                    ((0, 0), (0, PAD_P - P_)))

    if B_ % (8 * num_batch_tiles) != 0:   # keep (8,128) sublane tiling legal
        num_batch_tiles = 1
    tm = B_ // num_batch_tiles

    batch_spec = lambda shape: pl.BlockSpec(shape, lambda i: (i, 0))
    const2 = lambda shape: pl.BlockSpec(shape, lambda i: (0, 0))
    const3 = lambda shape: pl.BlockSpec(shape, lambda i: (0, 0, 0))

    if fused_l2:
        w2_spec = const2((threeh, threeh))
        w3_spec = const2((threeh, D_))
        l2_macs = threeh * threeh
    else:
        w2_spec = const3((NUM_NETS, H, H))
        w3_spec = const3((NUM_NETS, H, D_))
        l2_macs = NUM_NETS * H * H

    flops = 2 * B_ * ((D_ + PAD_P) * threeh + l2_macs + threeh * D_)
    weight_bytes = sum(int(v.size) * v.dtype.itemsize
                       for k, v in packed.items() if k != "p_scale")
    bytes_accessed = 2 * B_ * D_ * 4 + B_ * PAD_P * 2 + weight_bytes

    return pl.pallas_call(
        _make_kernel(fused_l2, H, NUM_NETS),
        out_shape=jax.ShapeDtypeStruct((B_, D_), x.dtype),
        grid=(num_batch_tiles,),
        in_specs=[
            batch_spec((tm, D_)),            # x (f32)
            batch_spec((tm, PAD_P)),         # scaled, padded p (bf16)
            const2((D_, threeh)),            # W1x
            const2((PAD_P, threeh)),         # W1p
            const2((1, threeh)),             # b1
            w2_spec,                         # W2 (block-diag or stacked)
            const2((1, threeh)),             # b2
            w3_spec,                         # W3 (stacked on K or per-net)
            const2((1, D_)),                 # b3 (summed over nets)
        ],
        out_specs=batch_spec((tm, D_)),
        compiler_params=pltpu.CompilerParams(
            dimension_semantics=("parallel",)),
        cost_estimate=pl.CostEstimate(
            flops=flops, transcendentals=0, bytes_accessed=bytes_accessed),
    )(x, p_pad, packed["w1x"], packed["w1p"], packed["b1"], packed["w2"],
      packed["b2"], packed["w3"], packed["b3"])


@functools.partial(jax.jit, static_argnames=("fused_l2", "num_batch_tiles"))
def triplenet_forward(x, p, packed, *, fused_l2, num_batch_tiles):
    # torch: `if torch.all(p == 0): return x` -> skip the kernel entirely.
    # The reduce + cond + wrapper math + pallas_call are all one jit program.
    return jax.lax.cond(
        jnp.all(p == 0.0),
        lambda x_, p_, pk_: x_,
        lambda x_, p_, pk_: _run_kernel(
            x_, p_, pk_, fused_l2=fused_l2, num_batch_tiles=num_batch_tiles),
        x, p, packed)


def init_params(key):
    """Per-net parameters; Linear weights stored transposed as (in, out)."""
    ks = jax.random.split(key, 6)
    s = 0.05
    return {
        "p_scale": jnp.ones((1,), jnp.float32),             # torch.ones(1)
        "w1": s * jax.random.normal(ks[0], (NUM_NETS, P + D, H), jnp.float32),
        "b1": s * jax.random.normal(ks[1], (NUM_NETS, H), jnp.float32),
        "w2": s * jax.random.normal(ks[2], (NUM_NETS, H, H), jnp.float32),
        "b2": s * jax.random.normal(ks[3], (NUM_NETS, H), jnp.float32),
        "w3": s * jax.random.normal(ks[4], (NUM_NETS, H, D), jnp.float32),
        "b3": s * jax.random.normal(ks[5], (NUM_NETS, D), jnp.float32),
    }


def pack_params(raw, *, fused_l2):
    """One-time wrapper-side fusion of per-net params into kernel tensors."""
    bf = jnp.bfloat16
    # combined = [p | x]: rows [0:P] of each W1 act on p, rows [P:] act on x.
    w1p = jnp.concatenate([raw["w1"][n][:P, :] for n in range(NUM_NETS)],
                          axis=1)                                   # (P, 3H)
    w1x = jnp.concatenate([raw["w1"][n][P:, :] for n in range(NUM_NETS)],
                          axis=1)                                   # (D, 3H)
    packed = {
        "p_scale": raw["p_scale"].astype(jnp.float32),
        "w1x": w1x.astype(bf),                                      # (D, 3H)
        "w1p": jnp.pad(w1p, ((0, PAD_P - P), (0, 0))).astype(bf),   # (PAD_P,3H)
        "b1": raw["b1"].reshape(1, NUM_NETS * H).astype(jnp.float32),
        "b2": raw["b2"].reshape(1, NUM_NETS * H).astype(jnp.float32),
        "b3": jnp.sum(raw["b3"], axis=0, keepdims=True).astype(jnp.float32),
    }
    if fused_l2:
        w2 = jnp.zeros((NUM_NETS * H, NUM_NETS * H), jnp.float32)
        for n in range(NUM_NETS):
            w2 = w2.at[n * H:(n + 1) * H, n * H:(n + 1) * H].set(raw["w2"][n])
        packed["w2"] = w2.astype(bf)                                # (3H, 3H)
        packed["w3"] = jnp.concatenate(
            [raw["w3"][n] for n in range(NUM_NETS)], axis=0).astype(bf)  # (3H,D)
    else:
        packed["w2"] = raw["w2"].astype(bf)                         # (3, H, H)
        packed["w3"] = raw["w3"].astype(bf)                         # (3, H, D)
    return packed


def triplenet_ref(x, p, raw):
    """Plain-JAX reference mirroring the torch forward (bf16 matmul inputs)."""
    if bool(jnp.all(p == 0.0)):
        return x
    bf = jnp.bfloat16
    scaled_p = p * raw["p_scale"]
    combined = jnp.concatenate([scaled_p, x], axis=1).astype(bf)
    out = x
    for n in range(NUM_NETS):
        h = jnp.dot(combined, raw["w1"][n].astype(bf),
                    preferred_element_type=jnp.float32)
        h = jnp.maximum(h + raw["b1"][n], 0.0).astype(bf)
        h = jnp.dot(h, raw["w2"][n].astype(bf),
                    preferred_element_type=jnp.float32)
        h = jnp.maximum(h + raw["b2"][n], 0.0).astype(bf)
        out = out + jnp.dot(h, raw["w3"][n].astype(bf),
                            preferred_element_type=jnp.float32) + raw["b3"][n]
    return out


if __name__ == "__main__":
    fused_l2, num_tiles = _tpu_config()

    key = jax.random.PRNGKey(0)
    kx, kp, kparam = jax.random.split(key, 3)
    x = jax.random.normal(kx, (B, D), jnp.float32)
    p = jax.random.normal(kp, (B, P), jnp.float32)

    raw = init_params(kparam)
    packed = pack_params(raw, fused_l2=fused_l2)

    out = jax.block_until_ready(
        triplenet_forward(x, p, packed,
                          fused_l2=fused_l2, num_batch_tiles=num_tiles))
    ref = triplenet_ref(x, p, raw)
    assert out.shape == (B, D)
    max_err = float(jnp.max(jnp.abs(out - ref)))
    assert jnp.allclose(out, ref, atol=2e-3, rtol=2e-3), max_err

    # all-zero-p early-return path (kernel skipped via lax.cond inside jit).
    out0 = jax.block_until_ready(
        triplenet_forward(x, jnp.zeros_like(p), packed,
                          fused_l2=fused_l2, num_batch_tiles=num_tiles))
    assert jnp.allclose(out0, x)

    print("KERNEL_OK")
</pallas_src>

<mosaic_0001>
module attributes {stable_mosaic.version = 11 : i64} {
  func.func @kernel(%arg0: i32, %arg1: memref<256x128xf32, #tpu.memory_space<vmem>>, %arg2: memref<256x16xbf16, #tpu.memory_space<vmem>>, %arg3: memref<128x384xbf16, #tpu.memory_space<vmem>>, %arg4: memref<16x384xbf16, #tpu.memory_space<vmem>>, %arg5: memref<1x384xf32, #tpu.memory_space<vmem>>, %arg6: memref<384x384xbf16, #tpu.memory_space<vmem>>, %arg7: memref<1x384xf32, #tpu.memory_space<vmem>>, %arg8: memref<384x128xbf16, #tpu.memory_space<vmem>>, %arg9: memref<1x128xf32, #tpu.memory_space<vmem>>, %arg10: memref<256x128xf32, #tpu.memory_space<vmem>>) attributes {dimension_semantics = [#tpu.dimension_semantics<parallel>], iteration_bounds = array<i64: 1>, scalar_prefetch = 0 : i64, scratch_operands = 0 : i64, tpu.core_type = #tpu.core_type<tc>, window_params = [{transform_indices = @transform_0, window_bounds = array<i64: 256, 128>}, {transform_indices = @transform_1, window_bounds = array<i64: 256, 16>}, {pipeline_mode = #tpu.pipeline_mode<synchronous>, transform_indices = @transform_2, window_bounds = array<i64: 128, 384>}, {pipeline_mode = #tpu.pipeline_mode<synchronous>, transform_indices = @transform_3, window_bounds = array<i64: 16, 384>}, {pipeline_mode = #tpu.pipeline_mode<synchronous>, transform_indices = @transform_4, window_bounds = array<i64: 1, 384>}, {pipeline_mode = #tpu.pipeline_mode<synchronous>, transform_indices = @transform_5, window_bounds = array<i64: 384, 384>}, {pipeline_mode = #tpu.pipeline_mode<synchronous>, transform_indices = @transform_6, window_bounds = array<i64: 1, 384>}, {pipeline_mode = #tpu.pipeline_mode<synchronous>, transform_indices = @transform_7, window_bounds = array<i64: 384, 128>}, {pipeline_mode = #tpu.pipeline_mode<synchronous>, transform_indices = @transform_8, window_bounds = array<i64: 1, 128>}, {transform_indices = @transform_9, window_bounds = array<i64: 256, 128>}]} {
    %c0 = arith.constant 0 : index
    %c0_0 = arith.constant 0 : index
    %0 = vector.load %arg1[%c0, %c0_0] : memref<256x128xf32, #tpu.memory_space<vmem>>, vector<256x128xf32>
    %1 = arith.truncf %0 : vector<256x128xf32> to vector<256x128xbf16>
    %c0_1 = arith.constant 0 : index
    %c0_2 = arith.constant 0 : index
    %2 = vector.load %arg3[%c0_1, %c0_2] : memref<128x384xbf16, #tpu.memory_space<vmem>>, vector<128x384xbf16>
    %cst = arith.constant dense<0.000000e+00> : vector<256x384xf32>
    %3 = tpu.matmul %1, %2, %cst {dimension_numbers = #tpu.dot_dimension_numbers<[1], [0], [0], [1], [0, 0, 1, 1], [], []>} : vector<256x128xbf16>, vector<128x384xbf16>, vector<256x384xf32> -> vector<256x384xf32>
    %c0_3 = arith.constant 0 : index
    %c0_4 = arith.constant 0 : index
    %4 = vector.load %arg2[%c0_3, %c0_4] : memref<256x16xbf16, #tpu.memory_space<vmem>>, vector<256x16xbf16>
    %c0_5 = arith.constant 0 : index
    %c0_6 = arith.constant 0 : index
    %5 = vector.load %arg4[%c0_5, %c0_6] : memref<16x384xbf16, #tpu.memory_space<vmem>>, vector<16x384xbf16>
    %cst_7 = arith.constant dense<0.000000e+00> : vector<256x384xf32>
    %6 = tpu.matmul %4, %5, %cst_7 {dimension_numbers = #tpu.dot_dimension_numbers<[1], [0], [0], [1], [0, 0, 1, 1], [], []>} : vector<256x16xbf16>, vector<16x384xbf16>, vector<256x384xf32> -> vector<256x384xf32>
    %7 = arith.addf %3, %6 : vector<256x384xf32>
    %c0_8 = arith.constant 0 : index
    %c0_9 = arith.constant 0 : index
    %8 = vector.load %arg5[%c0_8, %c0_9] : memref<1x384xf32, #tpu.memory_space<vmem>>, vector<1x384xf32>
    %9 = vector.broadcast %8 : vector<1x384xf32> to vector<256x384xf32>
    %10 = arith.addf %7, %9 : vector<256x384xf32>
    %cst_10 = arith.constant 0.000000e+00 : f32
    %11 = vector.broadcast %cst_10 : f32 to vector<256x384xf32>
    %12 = arith.maximumf %10, %11 : vector<256x384xf32>
    %13 = arith.truncf %12 : vector<256x384xf32> to vector<256x384xbf16>
    %c0_11 = arith.constant 0 : index
    %c0_12 = arith.constant 0 : index
    %14 = vector.load %arg6[%c0_11, %c0_12] : memref<384x384xbf16, #tpu.memory_space<vmem>>, vector<384x384xbf16>
    %cst_13 = arith.constant dense<0.000000e+00> : vector<256x384xf32>
    %15 = tpu.matmul %13, %14, %cst_13 {dimension_numbers = #tpu.dot_dimension_numbers<[1], [0], [0], [1], [0, 0, 1, 1], [], []>} : vector<256x384xbf16>, vector<384x384xbf16>, vector<256x384xf32> -> vector<256x384xf32>
    %c0_14 = arith.constant 0 : index
    %c0_15 = arith.constant 0 : index
    %16 = vector.load %arg7[%c0_14, %c0_15] : memref<1x384xf32, #tpu.memory_space<vmem>>, vector<1x384xf32>
    %17 = vector.broadcast %16 : vector<1x384xf32> to vector<256x384xf32>
    %18 = arith.addf %15, %17 : vector<256x384xf32>
    %cst_16 = arith.constant 0.000000e+00 : f32
    %19 = vector.broadcast %cst_16 : f32 to vector<256x384xf32>
    %20 = arith.maximumf %18, %19 : vector<256x384xf32>
    %21 = arith.truncf %20 : vector<256x384xf32> to vector<256x384xbf16>
    %c0_17 = arith.constant 0 : index
    %c0_18 = arith.constant 0 : index
    %22 = vector.load %arg8[%c0_17, %c0_18] : memref<384x128xbf16, #tpu.memory_space<vmem>>, vector<384x128xbf16>
    %cst_19 = arith.constant dense<0.000000e+00> : vector<256x128xf32>
    %23 = tpu.matmul %21, %22, %cst_19 {dimension_numbers = #tpu.dot_dimension_numbers<[1], [0], [0], [1], [0, 0, 1, 1], [], []>} : vector<256x384xbf16>, vector<384x128xbf16>, vector<256x128xf32> -> vector<256x128xf32>
    %24 = arith.addf %0, %23 : vector<256x128xf32>
    %c0_20 = arith.constant 0 : index
    %c0_21 = arith.constant 0 : index
    %25 = vector.load %arg9[%c0_20, %c0_21] : memref<1x128xf32, #tpu.memory_space<vmem>>, vector<1x128xf32>
    %26 = vector.broadcast %25 : vector<1x128xf32> to vector<256x128xf32>
    %27 = arith.addf %24, %26 : vector<256x128xf32>
    %c0_22 = arith.constant 0 : index
    %c0_23 = arith.constant 0 : index
    %28 = vector.load %arg10[%c0_22, %c0_23] : memref<256x128xf32, #tpu.memory_space<vmem>>, vector<256x128xf32>
    tpu.vector_store %arg10[%c0_22, %c0_23], %27 {strides = array<i32>} : memref<256x128xf32, #tpu.memory_space<vmem>>, vector<256x128xf32>,
    return
  }
  func.func @transform_0(%arg0: i32) -> (i32, i32) {
    %c0_i32 = arith.constant 0 : i32
    %c0_i32_0 = arith.constant 0 : i32
    return %arg0, %c0_i32 : i32, i32
  }
  func.func @transform_1(%arg0: i32) -> (i32, i32) {
    %c0_i32 = arith.constant 0 : i32
    %c0_i32_0 = arith.constant 0 : i32
    return %arg0, %c0_i32 : i32, i32
  }
  func.func @transform_2(%arg0: i32) -> (i32, i32) {
    %c0_i32 = arith.constant 0 : i32
    %c0_i32_0 = arith.constant 0 : i32
    %c0_i32_1 = arith.constant 0 : i32
    return %c0_i32, %c0_i32_0 : i32, i32
  }
  func.func @transform_3(%arg0: i32) -> (i32, i32) {
    %c0_i32 = arith.constant 0 : i32
    %c0_i32_0 = arith.constant 0 : i32
    %c0_i32_1 = arith.constant 0 : i32
    return %c0_i32, %c0_i32_0 : i32, i32
  }
  func.func @transform_4(%arg0: i32) -> (i32, i32) {
    %c0_i32 = arith.constant 0 : i32
    %c0_i32_0 = arith.constant 0 : i32
    %c0_i32_1 = arith.constant 0 : i32
    return %c0_i32, %c0_i32_0 : i32, i32
  }
  func.func @transform_5(%arg0: i32) -> (i32, i32) {
    %c0_i32 = arith.constant 0 : i32
    %c0_i32_0 = arith.constant 0 : i32
    %c0_i32_1 = arith.constant 0 : i32
    return %c0_i32, %c0_i32_0 : i32, i32
  }
  func.func @transform_6(%arg0: i32) -> (i32, i32) {
    %c0_i32 = arith.constant 0 : i32
    %c0_i32_0 = arith.constant 0 : i32
    %c0_i32_1 = arith.constant 0 : i32
    return %c0_i32, %c0_i32_0 : i32, i32
  }
  func.func @transform_7(%arg0: i32) -> (i32, i32) {
    %c0_i32 = arith.constant 0 : i32
    %c0_i32_0 = arith.constant 0 : i32
    %c0_i32_1 = arith.constant 0 : i32
    return %c0_i32, %c0_i32_0 : i32, i32
  }
  func.func @transform_8(%arg0: i32) -> (i32, i32) {
    %c0_i32 = arith.constant 0 : i32
    %c0_i32_0 = arith.constant 0 : i32
    %c0_i32_1 = arith.constant 0 : i32
    return %c0_i32, %c0_i32_0 : i32, i32
  }
  func.func @transform_9(%arg0: i32) -> (i32, i32) {
    %c0_i32 = arith.constant 0 : i32
    %c0_i32_0 = arith.constant 0 : i32
    return %arg0, %c0_i32 : i32, i32
  }
}

</mosaic_0001>

<bundles_post_ra>
// kernel: branch_0_fun.1
= control target key start
LH: loop header
LB: loop body
LE: loop exit
PB: predicated region body
PF: predicated region fallthrough
CT: control target
= control target key end

     0   :  { %vm246_vm0 = vcmask 130048   ;;  %s6376_s0 = inlined_call_operand.vmem [shape: f32[256,128], index: 0, kind: input, shape index: {}]   ;;  %s6377_s1 = inlined_call_operand.vmem [shape: bf16[256,16], index: 1, kind: input, shape index: {}]   ;;  %s6378_s2 = inlined_call_operand.vmem [shape: bf16[128,384], index: 2, kind: input, shape index: {}]   ;;  %s6379_s3 = inlined_call_operand.vmem [shape: bf16[16,384], index: 3, kind: input, shape index: {}]   ;;  %s6380_s4 = inlined_call_operand.vmem [shape: f32[1,384], index: 4, kind: input, shape index: {}]   ;;  %s6381_s5 = inlined_call_operand.vmem [shape: bf16[384,384], index: 5, kind: input, shape index: {}]   ;;  %s6382_s6 = inlined_call_operand.vmem [shape: f32[1,384], index: 6, kind: input, shape index: {}]   ;;  %s6383_s7 = inlined_call_operand.vmem [shape: bf16[384,128], index: 7, kind: input, shape index: {}]   ;;  %s6384_s8 = inlined_call_operand.vmem [shape: f32[1,128], index: 8, kind: input, shape index: {}]   ;;  %s6385_s9 = inlined_call_operand.hbm [shape: f32[256,128], index: 9, kind: output, shape index: {}]  }
   0x1   :  { %v3281_v0 = vld [vmem:[%s6379_s3] sm:$0xf]  ;;  %v3860_v1 = vld [vmem:[%s6379_s3 + $0x8] sm:$0xf0]  ;;  %v3859_v2 = vld [vmem:[%s6379_s3 + $0x4] sm:$0xf] }
   0x2   :  { %v3282_v3 = vor.u32 %v3860_v1, %v3281_v0  ;;  %v3283_v4 = vld [vmem:[%s6379_s3 + $0xc] sm:$0xf0]  ;;  %v4091_v5 = vld [vmem:[%s6377_s1] sm:$0xff]  ;;  %v3289_v8 = vld [vmem:[%s6379_s3 + $0x8] sm:$0xf] }
   0x3   :  { %v3286_v6 = vor.u32 %v3859_v2, %v3283_v4  ;;  %v4096_v7 = vld [vmem:[%s6377_s1 + $0x40] sm:$0xff]  ;;  %v3861_v9 = vld [vmem:[%s6379_s3 + $0x10] sm:$0xf0] }
   0x4   :  { %302 = vmatpush.bf16.msra.mxu0 %v3282_v3  ;;  %3958 = vmatpush.bf16.msra.mxu2 %v3282_v3  ;;  %v3290_v10 = vor.u32 %v3861_v9, %v3289_v8 }
   0x5   :  { %391 = vmatpush.bf16.msra.mxu1 %v3286_v6  ;;  %3959 = vmatpush.bf16.msra.mxu3 %v3286_v6 }
   0x6   :  { %14 = vsyncpa [#allocation3], 0  ;;  %v4115_v11 = vld [vmem:[%s6377_s1 + $0x8] sm:$0xff]  ;;  %v4133_v13 = vld [vmem:[%s6377_s1 + $0x10] sm:$0xff]  ;;  %s3203_s25 = sshll.u32 %s6385_s9, 4  ;;  %s4024_s28 = smov 128   ;;  %s3204_s25 = int_to_ptr.hbm [resolvable:$true] %s3203_s25 }
   0x7   :  { %3291 = vmatmul.msk.bf16.vlgmr.msra.gmra.mxu0 %vm246_vm0, %v4091_v5  ;;  %3299 = vmatmul.msk.bf16.vlgmr.msra.gmra.mxu2 %vm246_vm0, %v4096_v7  ;;  %v4120_v12 = vld [vmem:[%s6377_s1 + $0x48] sm:$0xff]  ;;  %v4138_v14 = vld [vmem:[%s6377_s1 + $0x50] sm:$0xff]  ;;  %v4151_v15 = vld [vmem:[%s6377_s1 + $0x18] sm:$0xff]  ;;  %s4025_s29 = smov 8  }
   0x8   :  { %480 = vmatpush.bf16.msrb.mxu2 %v3290_v10  ;;  %3307 = vmatmul.msk.bf16.vlgmr.msra.gmra.mxu1 %vm246_vm0, %v4091_v5  ;;  %v4156_v16 = vld [vmem:[%s6377_s1 + $0x58] sm:$0xff]  ;;  %v4169_v17 = vld [vmem:[%s6377_s1 + $0x20] sm:$0xff]  ;;  %v3425_v19 = vld [vmem:[%s6378_s2 + $0xa8] sm:$0xf] }
   0x9   :  { %3315 = vmatmul.msk.bf16.vlgmr.msra.gmra.mxu3 %vm246_vm0, %v4096_v7  ;;  %v4174_v18 = vld [vmem:[%s6377_s1 + $0x60] sm:$0xff]  ;;  %v3841_v20 = vld [vmem:[%s6378_s2 + $0xb0] sm:$0xf0]  ;;  %v3840_v22 = vld [vmem:[%s6378_s2 + $0xac] sm:$0xf] }
   0xa   :  { %v3426_v21 = vor.u32 %v3841_v20, %v3425_v19  ;;  %v3427_v23 = vld [vmem:[%s6378_s2 + $0xb4] sm:$0xf0]  ;;  %v3433_v24 = vld [vmem:[%s6378_s2 + $0xb0] sm:$0xf]  ;;  %v3842_v26 = vld [vmem:[%s6378_s2 + $0xb8] sm:$0xf0] }
   0xb   :  { %v3430_v25 = vor.u32 %v3840_v22, %v3427_v23  ;;  %v3413_v27 = vld [vmem:[%s6378_s2 + $0x90] sm:$0xf]  ;;  %v3838_v28 = vld [vmem:[%s6378_s2 + $0x98] sm:$0xf0]  ;;  %v3434_v29 = vor.u32 %v3842_v26, %v3433_v24  ;;  %v3837_v31 = vld [vmem:[%s6378_s2 + $0x94] sm:$0xf] }
   0xc   :  { %690 = vmatpush.bf16.msrb.mxu3 %v3426_v21  ;;  %v3414_v30 = vor.u32 %v3838_v28, %v3413_v27  ;;  %v3415_v32 = vld [vmem:[%s6378_s2 + $0x9c] sm:$0xf0]  ;;  %v3421_v33 = vld [vmem:[%s6378_s2 + $0x98] sm:$0xf]  ;;  %v3839_v35 = vld [vmem:[%s6378_s2 + $0xa0] sm:$0xf0] }
   0xd   :  { %779 = vmatpush.bf16.msrb.mxu0 %v3430_v25  ;;  %v3418_v34 = vor.u32 %v3837_v31, %v3415_v32  ;;  %v3401_v36 = vld [vmem:[%s6378_s2 + $0x78] sm:$0xf]  ;;  %v3835_v37 = vld [vmem:[%s6378_s2 + $0x80] sm:$0xf0]  ;;  %868 = vmatpush.bf16.msrb.mxu1 %v3434_v29  ;;  %v3422_v38 = vor.u32 %v3839_v35, %v3421_v33  ;;  %v3834_v39 = vld [vmem:[%s6378_s2 + $0x7c] sm:$0xf] }
   0xe   :  { %v3403_v40 = vld [vmem:[%s6378_s2 + $0x84] sm:$0xf0]  ;;  %v3409_v41 = vld [vmem:[%s6378_s2 + $0x80] sm:$0xf]  ;;  %v3836_v42 = vld [vmem:[%s6378_s2 + $0x88] sm:$0xf0]  ;;  %v3402_v43 = vor.u32 %v3835_v37, %v3401_v36 }
   0xf   :  { %v3406_v44 = vor.u32 %v3834_v39, %v3403_v40  ;;  %v3389_v45 = vld [vmem:[%s6378_s2 + $0x60] sm:$0xf]  ;;  %v3832_v46 = vld [vmem:[%s6378_s2 + $0x68] sm:$0xf0]  ;;  %v3410_v47 = vor.u32 %v3836_v42, %v3409_v41  ;;  %v3831_v48 = vld [vmem:[%s6378_s2 + $0x64] sm:$0xf] }
  0x10   :  { %691 = vmatpush.bf16.msrb.mxu3 %v3414_v30  ;;  %v3391_v49 = vld [vmem:[%s6378_s2 + $0x6c] sm:$0xf0]  ;;  %v3390_v50 = vor.u32 %v3832_v46, %v3389_v45  ;;  %v3397_v52 = vld [vmem:[%s6378_s2 + $0x68] sm:$0xf]  ;;  %v3833_v53 = vld [vmem:[%s6378_s2 + $0x70] sm:$0xf0] }
  0x11   :  { %780 = vmatpush.bf16.msrb.mxu0 %v3418_v34  ;;  %869 = vmatpush.bf16.msrb.mxu1 %v3422_v38  ;;  %v3394_v51 = vor.u32 %v3831_v48, %v3391_v49  ;;  %v4259_v54 = vld [vmem:[%s6377_s1 + $0x28] sm:$0xff]  ;;  %v3398_v56 = vor.u32 %v3833_v53, %v3397_v52  ;;  %v3829_v58 = vld [vmem:[%s6378_s2 + $0x50] sm:$0xf0]  ;;  %v3379_v61 = vld [vmem:[%s6378_s2 + $0x54] sm:$0xf0] }
  0x12   :  { %v4264_v55 = vld [vmem:[%s6377_s1 + $0x68] sm:$0xff]  ;;  %v3385_v62 = vld [vmem:[%s6378_s2 + $0x50] sm:$0xf]  ;;  %v3830_v0 = vld [vmem:[%s6378_s2 + $0x58] sm:$0xf0] }
  0x13   :  { %v3377_v57 = vld [vmem:[%s6378_s2 + $0x48] sm:$0xf]  ;;  %v3828_v60 = vld [vmem:[%s6378_s2 + $0x4c] sm:$0xf]  ;;  %v3365_v1 = vld [vmem:[%s6378_s2 + $0x30] sm:$0xf]  ;;  %v3386_v3 = vor.u32 %v3830_v0, %v3385_v62 }
  0x14   :  { %692 = vmatpush.bf16.msrb.mxu3 %v3402_v43  ;;  %v3378_v59 = vor.u32 %v3829_v58, %v3377_v57  ;;  %v3382_v63 = vor.u32 %v3828_v60, %v3379_v61  ;;  %v3826_v2 = vld [vmem:[%s6378_s2 + $0x38] sm:$0xf0]  ;;  %v3825_v6 = vld [vmem:[%s6378_s2 + $0x34] sm:$0xf]  ;;  %v3367_v8 = vld [vmem:[%s6378_s2 + $0x3c] sm:$0xf0] }
  0x15   :  { %781 = vmatpush.bf16.msrb.mxu0 %v3406_v44  ;;  %870 = vmatpush.bf16.msrb.mxu1 %v3410_v47  ;;  %v3366_v4 = vor.u32 %v3826_v2, %v3365_v1  ;;  %v3373_v9 = vld [vmem:[%s6378_s2 + $0x38] sm:$0xf]  ;;  %v3370_v10 = vor.u32 %v3825_v6, %v3367_v8  ;;  %v3827_v19 = vld [vmem:[%s6378_s2 + $0x40] sm:$0xf0]  ;;  %v3822_v22 = vld [vmem:[%s6378_s2 + $0x1c] sm:$0xf] }
  0x16   :  { %v3353_v20 = vld [vmem:[%s6378_s2 + $0x18] sm:$0xf]  ;;  %v3823_v21 = vld [vmem:[%s6378_s2 + $0x20] sm:$0xf0]  ;;  %v3355_v23 = vld [vmem:[%s6378_s2 + $0x24] sm:$0xf0]  ;;  %v3374_v24 = vor.u32 %v3827_v19, %v3373_v9 }
  0x17   :  { %3292 = vmatmul.msk.bf16.gmra.mxu0 %vm246_vm0, %v4115_v11  ;;  %3300 = vmatmul.msk.bf16.gmra.mxu2 %vm246_vm0, %v4120_v12  ;;  %v3354_v25 = vor.u32 %v3823_v21, %v3353_v20  ;;  %v3358_v26 = vor.u32 %v3822_v22, %v3355_v23  ;;  %v3361_v27 = vld [vmem:[%s6378_s2 + $0x20] sm:$0xf]  ;;  %v3824_v28 = vld [vmem:[%s6378_s2 + $0x28] sm:$0xf0]  ;;  %v4331_v29 = vld [vmem:[%s6377_s1 + $0x30] sm:$0xff] }
  0x18   :  { %3308 = vmatmul.msk.bf16.gmra.mxu1 %vm246_vm0, %v4115_v11  ;;  %693 = vmatpush.bf16.msrb.mxu3 %v3390_v50  ;;  %v4336_v30 = vld [vmem:[%s6377_s1 + $0x70] sm:$0xff]  ;;  %v3362_v31 = vor.u32 %v3824_v28, %v3361_v27  ;;  %v3341_v32 = vld [vmem:[%s6378_s2] sm:$0xf]  ;;  %v3820_v33 = vld [vmem:[%s6378_s2 + $0x8] sm:$0xf0] }
  0x19   :  { %3316 = vmatmul.msk.bf16.gmra.mxu3 %vm246_vm0, %v4120_v12  ;;  %782 = vmatpush.bf16.msrb.mxu0 %v3394_v51  ;;  %v3819_v34 = vld [vmem:[%s6378_s2 + $0x4] sm:$0xf]  ;;  %v3342_v35 = vor.u32 %v3820_v33, %v3341_v32  ;;  %v3343_v36 = vld [vmem:[%s6378_s2 + $0xc] sm:$0xf0]  ;;  %v3349_v37 = vld [vmem:[%s6378_s2 + $0x8] sm:$0xf] }
  0x1a   :  { %871 = vmatpush.bf16.msrb.mxu1 %v3398_v56  ;;  %v3821_v38 = vld [vmem:[%s6378_s2 + $0x10] sm:$0xf0]  ;;  %v3346_v39 = vor.u32 %v3819_v34, %v3343_v36  ;;  %v3521_v41 = vld [vmem:[%s6381_s5 + $0xa8] sm:$0xf]  ;;  %v4373_v44 = vld [vmem:[%s6377_s1 + $0x38] sm:$0xff] }
  0x1b   :  { %v3350_v40 = vor.u32 %v3821_v38, %v3349_v37  ;;  %v3884_v42 = vld [vmem:[%s6381_s5 + $0xb0] sm:$0xf0]  ;;  %v4378_v45 = vld [vmem:[%s6377_s1 + $0x78] sm:$0xff]  ;;  %v34_v46 = vld [vmem:[%s6376_s0] sm:$0xff] }
  0x1c   :  { %694 = vmatpush.bf16.msrb.mxu3 %v3378_v59  ;;  %v3522_v43 = vor.u32 %v3884_v42, %v3521_v41  ;;  %v35_v47 = vld [vmem:[%s6376_s0 + $0x8] sm:$0xff]  ;;  %v3509_v51 = vld [vmem:[%s6381_s5 + $0x90] sm:$0xf]  ;;  %v3881_v52 = vld [vmem:[%s6381_s5 + $0x98] sm:$0xf0] }
  0x1d   :  { %783 = vmatpush.bf16.msrb.mxu0 %v3382_v63  ;;  %v66_v48 = vpack.c.bf16 %v35_v47, %v34_v46  ;;  %v3510_v53 = vor.u32 %v3881_v52, %v3509_v51  ;;  %v36_v59 = vld [vmem:[%s6376_s0 + $0x10] sm:$0xff]  ;;  %v37_v60 = vld [vmem:[%s6376_s0 + $0x18] sm:$0xff]  ;;  %v38_v8 = vld [vmem:[%s6376_s0 + $0x20] sm:$0xff] }
  0x1e   :  { %872 = vmatpush.bf16.msrb.mxu1 %v3386_v3  ;;  %1693 = vmatpush.bf16.msra.mxu2 %v3522_v43  ;;  %v67_v63 = vpack.c.bf16 %v37_v60, %v36_v59  ;;  %v39_v9 = vld [vmem:[%s6376_s0 + $0x28] sm:$0xff]  ;;  %v3497_v22 = vld [vmem:[%s6381_s5 + $0x78] sm:$0xf]  ;;  %v3878_v23 = vld [vmem:[%s6381_s5 + $0x80] sm:$0xf0] }
  0x1f   :  { %v68_v19 = vpack.c.bf16 %v39_v9, %v38_v8  ;;  %v40_v28 = vld [vmem:[%s6376_s0 + $0x30] sm:$0xff]  ;;  %v42_v41 = vld [vmem:[%s6376_s0 + $0x40] sm:$0xff]  ;;  %v43_v42 = vld [vmem:[%s6376_s0 + $0x48] sm:$0xff] }
  0x20   :  { %695 = vmatpush.bf16.msrb.mxu3 %v3366_v4  ;;  %v70_v46 = vpack.c.bf16 %v43_v42, %v42_v41  ;;  %v3485_v51 = vld [vmem:[%s6381_s5 + $0x60] sm:$0xf]  ;;  %v3875_v52 = vld [vmem:[%s6381_s5 + $0x68] sm:$0xf0]  ;;  %v44_v8 = vld [vmem:[%s6376_s0 + $0x50] sm:$0xff] }
  0x21   :  { %784 = vmatpush.bf16.msrb.mxu0 %v3370_v10  ;;  %v45_v9 = vld [vmem:[%s6376_s0 + $0x58] sm:$0xff] }
  0x22   :  { %873 = vmatpush.bf16.msrb.mxu1 %v3374_v24  ;;  %1694 = vmatpush.bf16.msra.mxu2 %v3510_v53  ;;  %v3498_v24 = vor.u32 %v3878_v23, %v3497_v22  ;;  %v3486_v53 = vor.u32 %v3875_v52, %v3485_v51  ;;  %v71_v23 = vpack.c.bf16 %v45_v9, %v44_v8  ;;  %v47_v51 = vld [vmem:[%s6376_s0 + $0x68] sm:$0xff] }
  0x24   :  { %696 = vmatpush.bf16.msrb.mxu3 %v3354_v25 }
  0x25   :  { %785 = vmatpush.bf16.msrb.mxu0 %v3358_v26 }
  0x26   :  { %874 = vmatpush.bf16.msrb.mxu1 %v3362_v31  ;;  %1695 = vmatpush.bf16.msra.mxu2 %v3498_v24  ;;  %v41_v31 = vld [vmem:[%s6376_s0 + $0x38] sm:$0xff] }
  0x27   :  { %3293 = vmatmul.msk.bf16.gmra.mxu0 %vm246_vm0, %v4133_v13  ;;  %3301 = vmatmul.msk.bf16.gmra.mxu2 %vm246_vm0, %v4138_v14  ;;  %v69_v34 = vpack.c.bf16 %v41_v31, %v40_v28 }
  0x28   :  { %3309 = vmatmul.msk.bf16.gmra.mxu1 %vm246_vm0, %v4133_v13  ;;  %697 = vmatpush.bf16.msrb.mxu3 %v3342_v35 }
  0x29   :  { %3317 = vmatmul.msk.bf16.gmra.mxu3 %vm246_vm0, %v4138_v14  ;;  %786 = vmatpush.bf16.msrb.mxu0 %v3346_v39 }
  0x2a   :  { %875 = vmatpush.bf16.msrb.mxu1 %v3350_v40  ;;  %1696 = vmatpush.bf16.msra.mxu2 %v3486_v53 }
  0x37   :  { %3294 = vmatmul.msk.bf16.gmra.mxu0 %vm246_vm0, %v4151_v15  ;;  %3302 = vmatmul.msk.bf16.gmra.mxu2 %vm246_vm0, %v4156_v16 }
  0x38   :  { %3310 = vmatmul.msk.bf16.gmra.mxu1 %vm246_vm0, %v4151_v15 }
  0x39   :  { %3318 = vmatmul.msk.bf16.gmra.mxu3 %vm246_vm0, %v4156_v16 }
  0x47   :  { %3295 = vmatmul.msk.bf16.gmra.mxu0 %vm246_vm0, %v4169_v17  ;;  %3303 = vmatmul.msk.bf16.gmra.mxu2 %vm246_vm0, %v4174_v18 }
  0x48   :  { %3311 = vmatmul.msk.bf16.gmra.mxu1 %vm246_vm0, %v4169_v17 }
  0x49   :  { %3319 = vmatmul.msk.bf16.gmra.mxu3 %vm246_vm0, %v4174_v18 }
  0x57   :  { %3296 = vmatmul.msk.bf16.gmra.mxu0 %vm246_vm0, %v4259_v54  ;;  %3304 = vmatmul.msk.bf16.gmra.mxu2 %vm246_vm0, %v4264_v55 }
  0x58   :  { %3312 = vmatmul.msk.bf16.gmra.mxu1 %vm246_vm0, %v4259_v54 }
  0x59   :  { %3320 = vmatmul.msk.bf16.gmra.mxu3 %vm246_vm0, %v4264_v55 }
  0x67   :  { %3297 = vmatmul.msk.bf16.gmra.mxu0 %vm246_vm0, %v4331_v29  ;;  %3305 = vmatmul.msk.bf16.gmra.mxu2 %vm246_vm0, %v4336_v30 }
  0x68   :  { %3313 = vmatmul.msk.bf16.gmra.mxu1 %vm246_vm0, %v4331_v29 }
  0x69   :  { %3321 = vmatmul.msk.bf16.gmra.mxu3 %vm246_vm0, %v4336_v30 }
  0x77   :  { %3298 = vmatmul.msk.bf16.gmra.mxu0 %vm246_vm0, %v4373_v44  ;;  %3306 = vmatmul.msk.bf16.gmra.mxu2 %vm246_vm0, %v4378_v45 }
  0x78   :  { %3314 = vmatmul.msk.bf16.gmra.mxu1 %vm246_vm0, %v4373_v44 }
  0x79   :  { %3322 = vmatmul.msk.bf16.gmra.mxu3 %vm246_vm0, %v4378_v45 }
  0x84   :  { %v4394_v49 = vpop.f32.mrf.mxu0 }
  0x85   :  { %v4396_v50 = vpop.f32.mrf.mxu1 }
  0x87   :  { %3323 = vmatmul.msk.bf16.vlgmr.msrb.gmra.mxu2 %vm246_vm0, %v4091_v5  ;;  %787 = vmatmul.bf16.vlgmr.msrb.gmra.mxu0 %v66_v48 }
  0x88   :  { %876 = vmatmul.bf16.vlgmr.msrb.gmra.mxu1 %v66_v48 }
  0x89   :  { %698 = vmatmul.bf16.vlgmr.msrb.gmra.mxu3 %v66_v48 }
  0x8a   :  { %v4406_v56 = vpop.f32.mrf.mxu2 }
  0x8b   :  { %6420 = vst [vmem:[#allocation5_spill] sm:$0xff] %v4406_v56 }
  0x8c   :  { %v4408_v57 = vpop.f32.mrf.mxu3  ;;  %v4410_v58 = vpop.f32.mrf.mxu0 }
  0x8d   :  { %6421 = vst [vmem:[#allocation6_spill] sm:$0xff] %v4408_v57  ;;  %v4412_v5 = vpop.f32.mrf.mxu1 }
  0x92   :  { %v4420_v61 = vpop.f32.mrf.mxu2 }
  0x93   :  { %6422 = vst [vmem:[#allocation7_spill] sm:$0xff] %v4420_v61 }
  0x94   :  { %v4422_v62 = vpop.f32.mrf.mxu3  ;;  %v4424_v0 = vpop.f32.mrf.mxu0 }
  0x95   :  { %6423 = vst [vmem:[#allocation8_spill] sm:$0xff] %v4422_v62  ;;  %v4426_v1 = vpop.f32.mrf.mxu1  ;;  %v57_v62 = vld [vmem:[%s6376_s0 + $0xb8] sm:$0xff] }
  0x97   :  { %3324 = vmatmul.msk.bf16.gmra.mxu2 %vm246_vm0, %v4115_v11  ;;  %792 = vmatmul.bf16.gmra.mxu0 %v67_v63 }
  0x98   :  { %881 = vmatmul.bf16.gmra.mxu1 %v67_v63 }
  0x99   :  { %703 = vmatmul.bf16.gmra.mxu3 %v67_v63 }
  0x9a   :  { %v4430_v2 = vpop.f32.mrf.mxu2 }
  0x9b   :  { %6424 = vst [vmem:[#allocation9_spill] sm:$0xff] %v4430_v2 }
  0x9c   :  { %v4432_v3 = vpop.f32.mrf.mxu3  ;;  %v4434_v4 = vpop.f32.mrf.mxu0 }
  0x9d   :  { %6425 = vst [vmem:[#allocation10_spill] sm:$0xff] %v4432_v3  ;;  %v4436_v6 = vpop.f32.mrf.mxu1 }
  0xa2   :  { %v4444_v11 = vpop.f32.mrf.mxu2 }
  0xa3   :  { %6426 = vst [vmem:[#allocation11_spill] sm:$0xff] %v4444_v11 }
  0xa4   :  { %v4446_v10 = vpop.f32.mrf.mxu3  ;;  %v4448_v20 = vpop.f32.mrf.mxu0 }
  0xa5   :  { %6427 = vst [vmem:[#allocation12_spill] sm:$0xff] %v4446_v10  ;;  %v4450_v21 = vpop.f32.mrf.mxu1 }
  0xa7   :  { %3325 = vmatmul.msk.bf16.gmra.mxu2 %vm246_vm0, %v4133_v13  ;;  %797 = vmatmul.bf16.gmra.mxu0 %v68_v19 }
  0xa8   :  { %886 = vmatmul.bf16.gmra.mxu1 %v68_v19 }
  0xa9   :  { %708 = vmatmul.bf16.gmra.mxu3 %v68_v19 }
  0xaa   :  { %v4460_v25 = vpop.f32.mrf.mxu2 }
  0xab   :  { %6428 = vst [vmem:[#allocation13_spill] sm:$0xff] %v4460_v25 }
  0xac   :  { %v4462_v26 = vpop.f32.mrf.mxu3  ;;  %v4464_v27 = vpop.f32.mrf.mxu0 }
  0xad   :  { %6429 = vst [vmem:[#allocation14_spill] sm:$0xff] %v4462_v26  ;;  %v4466_v13 = vpop.f32.mrf.mxu1 }
  0xb2   :  { %v4474_v32 = vpop.f32.mrf.mxu2 }
  0xb3   :  { %6430 = vst [vmem:[#allocation15_spill] sm:$0xff] %v4474_v32 }
  0xb4   :  { %v4476_v33 = vpop.f32.mrf.mxu3  ;;  %v4478_v35 = vpop.f32.mrf.mxu0 }
  0xb5   :  { %6431 = vst [vmem:[#allocation16_spill] sm:$0xff] %v4476_v33  ;;  %v4480_v36 = vpop.f32.mrf.mxu1 }
  0xb7   :  { %3326 = vmatmul.msk.bf16.gmra.mxu2 %vm246_vm0, %v4151_v15  ;;  %802 = vmatmul.bf16.gmra.mxu0 %v69_v34 }
  0xb8   :  { %891 = vmatmul.bf16.gmra.mxu1 %v69_v34 }
  0xb9   :  { %713 = vmatmul.bf16.gmra.mxu3 %v69_v34 }
  0xba   :  { %v4484_v37 = vpop.f32.mrf.mxu2 }
  0xbb   :  { %6432 = vst [vmem:[#allocation17_spill] sm:$0xff] %v4484_v37 }
  0xbc   :  { %v4486_v38 = vpop.f32.mrf.mxu3  ;;  %v4488_v39 = vpop.f32.mrf.mxu0 }
  0xbd   :  { %6433 = vst [vmem:[#allocation18_spill] sm:$0xff] %v4486_v38  ;;  %v4490_v40 = vpop.f32.mrf.mxu1 }
  0xc2   :  { %v4498_v15 = vpop.f32.mrf.mxu2 }
  0xc3   :  { %6434 = vst [vmem:[#allocation19_spill] sm:$0xff] %v4498_v15  ;;  %v52_v15 = vld [vmem:[%s6376_s0 + $0x90] sm:$0xff] }
  0xc4   :  { %v4500_v43 = vpop.f32.mrf.mxu3  ;;  %v4502_v47 = vpop.f32.mrf.mxu0 }
  0xc5   :  { %6435 = vst [vmem:[#allocation20_spill] sm:$0xff] %v4500_v43  ;;  %v4504_v48 = vpop.f32.mrf.mxu1 }
  0xc7   :  { %3327 = vmatmul.msk.bf16.gmra.mxu2 %vm246_vm0, %v4169_v17  ;;  %807 = vmatmul.bf16.gmra.mxu0 %v70_v46 }
  0xc8   :  { %896 = vmatmul.bf16.gmra.mxu1 %v70_v46 }
  0xc9   :  { %718 = vmatmul.bf16.gmra.mxu3 %v70_v46  ;;  %v46_v46 = vld [vmem:[%s6376_s0 + $0x60] sm:$0xff] }
  0xca   :  { %v4514_v59 = vpop.f32.mrf.mxu2  ;;  %v72_v53 = vpack.c.bf16 %v47_v51, %v46_v46 }
  0xcb   :  { %6436 = vst [vmem:[#allocation21_spill] sm:$0xff] %v4514_v59 }
  0xcc   :  { %v4516_v60 = vpop.f32.mrf.mxu3  ;;  %v4518_v63 = vpop.f32.mrf.mxu0 }
  0xcd   :  { %6437 = vst [vmem:[#allocation22_spill] sm:$0xff] %v4516_v60  ;;  %v4520_v17 = vpop.f32.mrf.mxu1 }
  0xce   :  { %6438 = vst [vmem:[#allocation23_spill] sm:$0xff] %v4520_v17 }
  0xd2   :  { %v4528_v19 = vpop.f32.mrf.mxu2 }
  0xd3   :  { %6439 = vst [vmem:[#allocation24_spill] sm:$0xff] %v4528_v19  ;;  %v50_v19 = vld [vmem:[%s6376_s0 + $0x80] sm:$0xff] }
  0xd4   :  { %v4530_v22 = vpop.f32.mrf.mxu3  ;;  %v4532_v24 = vpop.f32.mrf.mxu0 }
  0xd5   :  { %6440 = vst [vmem:[#allocation25_spill] sm:$0xff] %v4530_v22  ;;  %v4534_v28 = vpop.f32.mrf.mxu1 }
  0xd6   :  { %6441 = vst [vmem:[#allocation26_spill] sm:$0xff] %v4532_v24 }
  0xd7   :  { %6442 = vst [vmem:[#allocation27_spill] sm:$0xff] %v4534_v28  ;;  %3328 = vmatmul.msk.bf16.gmra.mxu2 %vm246_vm0, %v4259_v54  ;;  %812 = vmatmul.bf16.gmra.mxu0 %v71_v23 }
  0xd8   :  { %901 = vmatmul.bf16.gmra.mxu1 %v71_v23 }
  0xd9   :  { %723 = vmatmul.bf16.gmra.mxu3 %v71_v23  ;;  %v3473_v23 = vld [vmem:[%s6381_s5 + $0x48] sm:$0xf] }
  0xda   :  { %v4538_v31 = vpop.f32.mrf.mxu2 }
  0xdb   :  { %6443 = vst [vmem:[#allocation28_spill] sm:$0xff] %v4538_v31 }
  0xdc   :  { %v4540_v34 = vpop.f32.mrf.mxu3  ;;  %v4542_v41 = vpop.f32.mrf.mxu0 }
  0xdd   :  { %6444 = vst [vmem:[#allocation29_spill] sm:$0xff] %v4540_v34  ;;  %v4544_v42 = vpop.f32.mrf.mxu1  ;;  %v3872_v34 = vld [vmem:[%s6381_s5 + $0x50] sm:$0xf0] }
  0xde   :  { %6445 = vst [vmem:[#allocation30_spill] sm:$0xff] %v4542_v41  ;;  %v3474_v46 = vor.u32 %v3872_v34, %v3473_v23  ;;  %v3617_v23 = vld [vmem:[%s6381_s5 + $0x168] sm:$0xf] }
  0xdf   :  { %6446 = vst [vmem:[#allocation31_spill] sm:$0xff] %v4544_v42 }
  0xe0   :  { %1697 = vmatpush.bf16.msra.mxu2 %v3474_v46  ;;  %v3908_v46 = vld [vmem:[%s6381_s5 + $0x170] sm:$0xf0] }
  0xe2   :  { %v4552_v54 = vpop.f32.mrf.mxu2 }
  0xe3   :  { %6447 = vst [vmem:[#allocation32_spill] sm:$0xff] %v4552_v54 }
  0xe4   :  { %v4554_v52 = vpop.f32.mrf.mxu3  ;;  %v4556_v8 = vpop.f32.mrf.mxu0 }
  0xe5   :  { %6448 = vst [vmem:[#allocation33_spill] sm:$0xff] %v4554_v52  ;;  %v4558_v9 = vpop.f32.mrf.mxu1  ;;  %v49_v52 = vld [vmem:[%s6376_s0 + $0x78] sm:$0xff] }
  0xe6   :  { %6449 = vst [vmem:[#allocation34_spill] sm:$0xff] %v4556_v8 }
  0xe7   :  { %6450 = vst [vmem:[#allocation35_spill] sm:$0xff] %v4558_v9  ;;  %3329 = vmatmul.msk.bf16.gmra.mxu2 %vm246_vm0, %v4331_v29  ;;  %817 = vmatmul.bf16.gmra.mxu0 %v72_v53 }
  0xe8   :  { %906 = vmatmul.bf16.gmra.mxu1 %v72_v53 }
  0xe9   :  { %728 = vmatmul.bf16.gmra.mxu3 %v72_v53  ;;  %v48_v53 = vld [vmem:[%s6376_s0 + $0x70] sm:$0xff] }
  0xea   :  { %v4568_v31 = vpop.f32.mrf.mxu2  ;;  %v73_v34 = vpack.c.bf16 %v49_v52, %v48_v53  ;;  %v3713_v53 = vld [vmem:[%s6381_s5 + $0x228] sm:$0xf] }
  0xeb   :  { %6451 = vst [vmem:[#allocation36_spill] sm:$0xff] %v4568_v31  ;;  %v3618_v31 = vor.u32 %v3908_v46, %v3617_v23 }
  0xec   :  { %v4570_v51 = vpop.f32.mrf.mxu3  ;;  %v4572_v54 = vpop.f32.mrf.mxu0 }
  0xed   :  { %6452 = vst [vmem:[#allocation37_spill] sm:$0xff] %v4570_v51  ;;  %v4574_v29 = vpop.f32.mrf.mxu1  ;;  %1782 = vmatpush.bf16.msra.mxu3 %v3618_v31  ;;  %v3883_v31 = vld [vmem:[%s6381_s5 + $0xac] sm:$0xf] }
  0xee   :  { %6453 = vst [vmem:[#allocation38_spill] sm:$0xff] %v4572_v54  ;;  %v61_v54 = vld [vmem:[%s6376_s0 + $0xd8] sm:$0xff] }
  0xef   :  { %6454 = vst [vmem:[#allocation39_spill] sm:$0xff] %v4574_v29 }
  0xf2   :  { %v4582_v60 = vpop.f32.mrf.mxu2 }
  0xf3   :  { %6455 = vst [vmem:[#allocation40_spill] sm:$0xff] %v4582_v60  ;;  %v3932_v60 = vld [vmem:[%s6381_s5 + $0x230] sm:$0xf0] }
  0xf4   :  { %v4584_v59 = vpop.f32.mrf.mxu3  ;;  %v4592_v51 = vpop.f32.mrf.mxu0 }
  0xf5   :  { %6456 = vst [vmem:[#allocation41_spill] sm:$0xff] %v4584_v59  ;;  %v4594_v22 = vpop.f32.mrf.mxu1 }
  0xf6   :  { %6457 = vst [vmem:[#allocation42_spill] sm:$0xff] %v4592_v51 }
  0xf7   :  { %6458 = vst [vmem:[#allocation43_spill] sm:$0xff] %v4594_v22  ;;  %3330 = vmatmul.msk.bf16.gmra.mxu2 %vm246_vm0, %v4373_v44  ;;  %822 = vmatmul.bf16.gmra.mxu0 %v73_v34  ;;  %v3714_v44 = vor.u32 %v3932_v60, %v3713_v53 }
  0xf8   :  { %911 = vmatmul.bf16.gmra.mxu1 %v73_v34 }
  0xf9   :  { %733 = vmatmul.bf16.gmra.mxu3 %v73_v34  ;;  %v3523_v34 = vld [vmem:[%s6381_s5 + $0xb4] sm:$0xf0]  ;;  %1871 = vmatpush.bf16.msra.mxu0 %v3714_v44  ;;  %v3869_v44 = vld [vmem:[%s6381_s5 + $0x38] sm:$0xf0] }
  0xfa   :  { %v4598_v52 = vpop.f32.mrf.mxu2 }
  0xfb   :  { %6459 = vst [vmem:[#allocation44_spill] sm:$0xff] %v4598_v52  ;;  %v3526_v52 = vor.u32 %v3883_v31, %v3523_v34 }
  0xfc   :  { %v4609_v23 = vpop.f32.mrf.mxu3  ;;  %v4614_v46 = vpop.f32.mrf.mxu0 }
  0xfd   :  { %6460 = vst [vmem:[#allocation45_spill] sm:$0xff] %v4609_v23  ;;  %v4616_v59 = vpop.f32.mrf.mxu1  ;;  %1960 = vmatpush.bf16.msra.mxu1 %v3526_v52  ;;  %v51_v23 = vld [vmem:[%s6376_s0 + $0x88] sm:$0xff]  ;;  %v3461_v52 = vld [vmem:[%s6381_s5 + $0x30] sm:$0xf] }
  0xfe   :  { %6461 = vst [vmem:[#allocation46_spill] sm:$0xff] %v4614_v46  ;;  %v74_v38 = vpack.c.bf16 %v51_v23, %v50_v19  ;;  %v4643_v23 = vld [vmem:[%s6380_s4] sm:$0x7]  ;;  %s4023_s4 = smov [#allocation2]  }
  0xff   :  { %6462 = vst [vmem:[#allocation47_spill] sm:$0xff] %v4616_v59  ;;  %v4648_v43 = vperm.slane %v4643_v23, 2  ;;  %s3201_s1 = sshll.u32 %s4023_s4, 4  ;;  %s3202_s1 = int_to_ptr.vmem [resolvable:$true] %s3201_s1 }
 0x102   :  { %v4624_v60 = vpop.f32.mrf.mxu2 }
 0x103   :  { %6463 = vst [vmem:[#allocation48_spill] sm:$0xff] %v4624_v60 }
 0x104   :  { %v4626_v53 = vpop.f32.mrf.mxu3  ;;  %v4628_v37 = vpop.f32.mrf.mxu0 }
 0x105   :  { %6464 = vst [vmem:[#allocation49_spill] sm:$0xff] %v4626_v53  ;;  %v877_v31 = vpop.f32.mrf.mxu1  ;;  %v3462_v53 = vor.u32 %v3869_v44, %v3461_v52  ;;  %v53_v52 = vld [vmem:[%s6376_s0 + $0x98] sm:$0xff]  ;;  %v3605_v44 = vld [vmem:[%s6381_s5 + $0x150] sm:$0xf] }
 0x106   :  { %v75_v32 = vpack.c.bf16 %v53_v52, %v52_v15  ;;  %v3701_v15 = vld [vmem:[%s6381_s5 + $0x210] sm:$0xf] }
 0x107   :  { %3331 = vmatmul.msk.bf16.gmra.mxu2 %vm246_vm0, %v4096_v7  ;;  %827 = vmatmul.bf16.gmra.mxu0 %v74_v38 }
 0x108   :  { %916 = vmatmul.bf16.gmra.mxu1 %v74_v38  ;;  %1698 = vmatpush.bf16.msra.mxu2 %v3462_v53  ;;  %v3905_v53 = vld [vmem:[%s6381_s5 + $0x158] sm:$0xf0] }
 0x109   :  { %738 = vmatmul.bf16.gmra.mxu3 %v74_v38 }
 0x10a   :  { %v482_v34 = vpop.f32.mrf.mxu2 }
 0x10b   :  { %v878_v60 = vadd.f32 %v877_v31, %v482_v34  ;;  %v3606_v34 = vor.u32 %v3905_v53, %v3605_v44  ;;  %v54_v53 = vld [vmem:[%s6376_s0 + $0xa0] sm:$0xff] }
 0x10c   :  { %v4638_v19 = vpop.f32.mrf.mxu3  ;;  %v4645_v7 = vpop.f32.mrf.mxu0 }
 0x10d   :  { %v879_v38 = vpop.f32.mrf.mxu1  ;;  %v967_v26 = vadd.f32 %v4648_v43, %v878_v60  ;;  %1783 = vmatpush.bf16.msra.mxu3 %v3606_v34  ;;  %v3929_v60 = vld [vmem:[%s6381_s5 + $0x218] sm:$0xf0] }
 0x10f   :  { %v1063_v11 = vmax.f32 %v967_v26, 0.0 }
 0x112   :  { %v484_v31 = vpop.f32.mrf.mxu2 }
 0x113   :  { %v880_v25 = vadd.f32 %v879_v38, %v484_v31  ;;  %v3702_v38 = vor.u32 %v3929_v60, %v3701_v15  ;;  %v55_v31 = vld [vmem:[%s6376_s0 + $0xa8] sm:$0xff] }
 0x114   :  { %v4663_v33 = vpop.f32.mrf.mxu3  ;;  %v4665_v3 = vpop.f32.mrf.mxu0 }
 0x115   :  { %v970_v2 = vadd.f32 %v4648_v43, %v880_v25  ;;  %v882_v10 = vpop.f32.mrf.mxu1  ;;  %1872 = vmatpush.bf16.msra.mxu0 %v3702_v38 }
 0x117   :  { %v1066_v57 = vmax.f32 %v970_v2, 0.0  ;;  %3332 = vmatmul.msk.bf16.gmra.mxu2 %vm246_vm0, %v4120_v12  ;;  %832 = vmatmul.bf16.gmra.mxu0 %v75_v32  ;;  %v3880_v2 = vld [vmem:[%s6381_s5 + $0x94] sm:$0xf]  ;;  %v3511_v12 = vld [vmem:[%s6381_s5 + $0x9c] sm:$0xf0] }
 0x118   :  { %921 = vmatmul.bf16.gmra.mxu1 %v75_v32 }
 0x119   :  { %743 = vmatmul.bf16.gmra.mxu3 %v75_v32  ;;  %v4670_v44 = vpack.c.bf16 %v1066_v57, %v1063_v11  ;;  %v3514_v11 = vor.u32 %v3880_v2, %v3511_v12  ;;  %v76_v2 = vpack.c.bf16 %v55_v31, %v54_v53 }
 0x11a   :  { %v487_v25 = vpop.f32.mrf.mxu2 }
 0x11b   :  { %1961 = vmatpush.bf16.msra.mxu1 %v3514_v11  ;;  %v883_v52 = vadd.f32 %v882_v10, %v487_v25 }
 0x11c   :  { %v4684_v57 = vpop.f32.mrf.mxu3  ;;  %v4686_v26 = vpop.f32.mrf.mxu0 }
 0x11d   :  { %v884_v32 = vpop.f32.mrf.mxu1  ;;  %v973_v15 = vadd.f32 %v4648_v43, %v883_v52  ;;  %v3866_v52 = vld [vmem:[%s6381_s5 + $0x20] sm:$0xf0] }
 0x11f   :  { %v1069_v25 = vmax.f32 %v973_v15, 0.0 }
 0x122   :  { %v489_v34 = vpop.f32.mrf.mxu2 }
 0x123   :  { %v885_v60 = vadd.f32 %v884_v32, %v489_v34  ;;  %v3449_v32 = vld [vmem:[%s6381_s5 + $0x18] sm:$0xf] }
 0x124   :  { %v4695_v56 = vpop.f32.mrf.mxu3  ;;  %v4697_v12 = vpop.f32.mrf.mxu0  ;;  %v3450_v34 = vor.u32 %v3866_v52, %v3449_v32 }
 0x125   :  { %v976_v38 = vadd.f32 %v4648_v43, %v885_v60  ;;  %v887_v10 = vpop.f32.mrf.mxu1 }
 0x126   :  { %1699 = vmatpush.bf16.msra.mxu2 %v3450_v34 }
 0x127   :  { %v1072_v11 = vmax.f32 %v976_v38, 0.0  ;;  %3333 = vmatmul.msk.bf16.gmra.mxu2 %vm246_vm0, %v4138_v14  ;;  %837 = vmatmul.bf16.gmra.mxu0 %v76_v2 }
 0x128   :  { %926 = vmatmul.bf16.gmra.mxu1 %v76_v2 }
 0x129   :  { %748 = vmatmul.bf16.gmra.mxu3 %v76_v2  ;;  %v4708_v53 = vpack.c.bf16 %v1072_v11, %v1069_v25  ;;  %v56_v2 = vld [vmem:[%s6376_s0 + $0xb0] sm:$0xff]  ;;  %v3593_v25 = vld [vmem:[%s6381_s5 + $0x138] sm:$0xf]  ;;  %v3902_v11 = vld [vmem:[%s6381_s5 + $0x140] sm:$0xf0] }
 0x12a   :  { %v492_v31 = vpop.f32.mrf.mxu2  ;;  %v3594_v52 = vor.u32 %v3902_v11, %v3593_v25  ;;  %v77_v61 = vpack.c.bf16 %v57_v62, %v56_v2  ;;  %v3926_v62 = vld [vmem:[%s6381_s5 + $0x200] sm:$0xf0] }
 0x12b   :  { %6465 = vst [vmem:[#allocation50_spill] sm:$0xff] %v4708_v53  ;;  %v888_v38 = vadd.f32 %v887_v10, %v492_v31 }
 0x12c   :  { %v4710_v15 = vpop.f32.mrf.mxu3  ;;  %v4712_v60 = vpop.f32.mrf.mxu0  ;;  %1784 = vmatpush.bf16.msra.mxu3 %v3594_v52 }
 0x12d   :  { %v889_v14 = vpop.f32.mrf.mxu1  ;;  %v979_v10 = vadd.f32 %v4648_v43, %v888_v38 }
 0x12f   :  { %v1075_v51 = vmax.f32 %v979_v10, 0.0  ;;  %v59_v10 = vld [vmem:[%s6376_s0 + $0xc8] sm:$0xff] }
 0x132   :  { %v494_v32 = vpop.f32.mrf.mxu2 }
 0x133   :  { %v890_v31 = vadd.f32 %v889_v14, %v494_v32  ;;  %v3689_v14 = vld [vmem:[%s6381_s5 + $0x1f8] sm:$0xf] }
 0x134   :  { %v4727_v34 = vpop.f32.mrf.mxu3  ;;  %v4729_v59 = vpop.f32.mrf.mxu0  ;;  %v3690_v25 = vor.u32 %v3926_v62, %v3689_v14 }
 0x135   :  { %v982_v22 = vadd.f32 %v4648_v43, %v890_v31  ;;  %v892_v46 = vpop.f32.mrf.mxu1 }
 0x136   :  { %1873 = vmatpush.bf16.msra.mxu0 %v3690_v25 }
 0x137   :  { %v1078_v29 = vmax.f32 %v982_v22, 0.0  ;;  %3334 = vmatmul.msk.bf16.gmra.mxu2 %vm246_vm0, %v4156_v16  ;;  %842 = vmatmul.bf16.gmra.mxu0 %v77_v61  ;;  %v3877_v22 = vld [vmem:[%s6381_s5 + $0x7c] sm:$0xf]  ;;  %v3499_v16 = vld [vmem:[%s6381_s5 + $0x84] sm:$0xf0] }
 0x138   :  { %931 = vmatmul.bf16.gmra.mxu1 %v77_v61  ;;  %v3502_v11 = vor.u32 %v3877_v22, %v3499_v16 }
 0x139   :  { %753 = vmatmul.bf16.gmra.mxu3 %v77_v61  ;;  %v4740_v38 = vpack.c.bf16 %v1078_v29, %v1075_v51  ;;  %v58_v29 = vld [vmem:[%s6376_s0 + $0xc0] sm:$0xff] }
 0x13a   :  { %v497_v2 = vpop.f32.mrf.mxu2  ;;  %1962 = vmatpush.bf16.msra.mxu1 %v3502_v11  ;;  %v78_v22 = vpack.c.bf16 %v59_v10, %v58_v29 }
 0x13b   :  { %6466 = vst [vmem:[#allocation51_spill] sm:$0xff] %v4740_v38  ;;  %v893_v51 = vadd.f32 %v892_v46, %v497_v2 }
 0x13c   :  { %v4748_v61 = vpop.f32.mrf.mxu3  ;;  %v4750_v32 = vpop.f32.mrf.mxu0 }
 0x13d   :  { %v894_v52 = vpop.f32.mrf.mxu1  ;;  %v985_v14 = vadd.f32 %v4648_v43, %v893_v51  ;;  %v3863_v51 = vld [vmem:[%s6381_s5 + $0x8] sm:$0xf0] }
 0x13f   :  { %v1081_v2 = vmax.f32 %v985_v14, 0.0 }
 0x142   :  { %v499_v31 = vpop.f32.mrf.mxu2 }
 0x143   :  { %v895_v62 = vadd.f32 %v894_v52, %v499_v31  ;;  %v3437_v52 = vld [vmem:[%s6381_s5] sm:$0xf] }
 0x144   :  { %v4759_v9 = vpop.f32.mrf.mxu3  ;;  %v4761_v16 = vpop.f32.mrf.mxu0  ;;  %v3438_v31 = vor.u32 %v3863_v51, %v3437_v52 }
 0x145   :  { %6467 = vst [vmem:[#allocation52_spill] sm:$0xff] %v4761_v16  ;;  %v988_v25 = vadd.f32 %v4648_v43, %v895_v62  ;;  %v897_v46 = vpop.f32.mrf.mxu1 }
 0x146   :  { %1700 = vmatpush.bf16.msra.mxu2 %v3438_v31  ;;  %v3874_v31 = vld [vmem:[%s6381_s5 + $0x64] sm:$0xf] }
 0x147   :  { %v1084_v11 = vmax.f32 %v988_v25, 0.0  ;;  %3335 = vmatmul.msk.bf16.gmra.mxu2 %vm246_vm0, %v4174_v18  ;;  %847 = vmatmul.bf16.gmra.mxu0 %v78_v22 }
 0x148   :  { %936 = vmatmul.bf16.gmra.mxu1 %v78_v22 }
 0x149   :  { %758 = vmatmul.bf16.gmra.mxu3 %v78_v22  ;;  %v4772_v29 = vpack.c.bf16 %v1084_v11, %v1081_v2  ;;  %v60_v22 = vld [vmem:[%s6376_s0 + $0xd0] sm:$0xff]  ;;  %v3581_v2 = vld [vmem:[%s6381_s5 + $0x120] sm:$0xf]  ;;  %v3899_v11 = vld [vmem:[%s6381_s5 + $0x128] sm:$0xf0] }
 0x14a   :  { %v502_v10 = vpop.f32.mrf.mxu2  ;;  %v3582_v51 = vor.u32 %v3899_v11, %v3581_v2  ;;  %v79_v41 = vpack.c.bf16 %v61_v54, %v60_v22  ;;  %v3487_v2 = vld [vmem:[%s6381_s5 + $0x6c] sm:$0xf0]  ;;  %v3896_v54 = vld [vmem:[%s6381_s5 + $0x110] sm:$0xf0] }
 0x14b   :  { %6468 = vst [vmem:[#allocation53_spill] sm:$0xff] %v4772_v29  ;;  %v898_v25 = vadd.f32 %v897_v46, %v502_v10  ;;  %v3677_v46 = vld [vmem:[%s6381_s5 + $0x1e0] sm:$0xf]  ;;  %v3923_v10 = vld [vmem:[%s6381_s5 + $0x1e8] sm:$0xf0] }
 0x14c   :  { %v4774_v14 = vpop.f32.mrf.mxu3  ;;  %v4776_v62 = vpop.f32.mrf.mxu0  ;;  %v3678_v24 = vor.u32 %v3923_v10, %v3677_v46  ;;  %1785 = vmatpush.bf16.msra.mxu3 %v3582_v51  ;;  %v3557_v10 = vld [vmem:[%s6381_s5 + $0xf0] sm:$0xf] }
 0x14d   :  { %6469 = vst [vmem:[#allocation54_spill] sm:$0xff] %v4776_v62  ;;  %v899_v18 = vpop.f32.mrf.mxu1  ;;  %v991_v8 = vadd.f32 %v4648_v43, %v898_v25  ;;  %v3490_v62 = vor.u32 %v3874_v31, %v3487_v2  ;;  %v3665_v25 = vld [vmem:[%s6381_s5 + $0x1c8] sm:$0xf]  ;;  %v3893_v31 = vld [vmem:[%s6381_s5 + $0xf8] sm:$0xf0] }
 0x14e   :  { %1874 = vmatpush.bf16.msra.mxu0 %v3678_v24 }
 0x14f   :  { %1963 = vmatpush.bf16.msra.mxu1 %v3490_v62  ;;  %v1087_v22 = vmax.f32 %v991_v8, 0.0  ;;  %v3871_v62 = vld [vmem:[%s6381_s5 + $0x4c] sm:$0xf] }
 0x152   :  { %v504_v52 = vpop.f32.mrf.mxu2 }
 0x153   :  { %v900_v42 = vadd.f32 %v899_v18, %v504_v52  ;;  %v3569_v18 = vld [vmem:[%s6381_s5 + $0x108] sm:$0xf] }
 0x154   :  { %v4800_v28 = vpop.f32.mrf.mxu3  ;;  %v4805_v11 = vpop.f32.mrf.mxu0  ;;  %v3570_v24 = vor.u32 %v3896_v54, %v3569_v18  ;;  %v3558_v18 = vor.u32 %v3893_v31, %v3557_v10  ;;  %v3917_v54 = vld [vmem:[%s6381_s5 + $0x1b8] sm:$0xf0] }
 0x155   :  { %6470 = vst [vmem:[#allocation55_spill] sm:$0xff] %v4805_v11  ;;  %v994_v17 = vadd.f32 %v4648_v43, %v900_v42  ;;  %v902_v16 = vpop.f32.mrf.mxu1  ;;  %v3920_v42 = vld [vmem:[%s6381_s5 + $0x1d0] sm:$0xf0]  ;;  %v3439_v11 = vld [vmem:[%s6381_s5 + $0xc] sm:$0xf0] }
 0x156   :  { %v3666_v51 = vor.u32 %v3920_v42, %v3665_v25  ;;  %1786 = vmatpush.bf16.msra.mxu3 %v3570_v24  ;;  %v3868_v25 = vld [vmem:[%s6381_s5 + $0x34] sm:$0xf] }
 0x157   :  { %v1090_v52 = vmax.f32 %v994_v17, 0.0  ;;  %3336 = vmatmul.msk.bf16.gmra.mxu2 %vm246_vm0, %v4264_v55  ;;  %852 = vmatmul.bf16.gmra.mxu0 %v79_v41  ;;  %v3475_v17 = vld [vmem:[%s6381_s5 + $0x54] sm:$0xf0] }
 0x158   :  { %941 = vmatmul.bf16.gmra.mxu1 %v79_v41  ;;  %v3478_v8 = vor.u32 %v3871_v62, %v3475_v17  ;;  %1875 = vmatpush.bf16.msra.mxu0 %v3666_v51  ;;  %v3545_v51 = vld [vmem:[%s6381_s5 + $0xd8] sm:$0xf]  ;;  %v3890_v17 = vld [vmem:[%s6381_s5 + $0xe0] sm:$0xf0] }
 0x159   :  { %763 = vmatmul.bf16.gmra.mxu3 %v79_v41  ;;  %v4828_v55 = vpack.c.bf16 %v1090_v52, %v1087_v22  ;;  %v3653_v41 = vld [vmem:[%s6381_s5 + $0x1b0] sm:$0xf]  ;;  %v3463_v22 = vld [vmem:[%s6381_s5 + $0x3c] sm:$0xf0]  ;;  %v3546_v31 = vor.u32 %v3890_v17, %v3545_v51  ;;  %v3887_v51 = vld [vmem:[%s6381_s5 + $0xc8] sm:$0xf0] }
 0x15a   :  { %v507_v46 = vpop.f32.mrf.mxu2  ;;  %1964 = vmatpush.bf16.msra.mxu1 %v3478_v8  ;;  %v3654_v24 = vor.u32 %v3917_v54, %v3653_v41  ;;  %v3466_v42 = vor.u32 %v3868_v25, %v3463_v22  ;;  %1787 = vmatpush.bf16.msra.mxu3 %v3558_v18  ;;  %v3641_v8 = vld [vmem:[%s6381_s5 + $0x198] sm:$0xf]  ;;  %v3914_v41 = vld [vmem:[%s6381_s5 + $0x1a0] sm:$0xf0]  ;;  %v3865_v18 = vld [vmem:[%s6381_s5 + $0x1c] sm:$0xf] }
 0x15b   :  { %6471 = vst [vmem:[#allocation56_spill] sm:$0xff] %v4828_v55  ;;  %v903_v10 = vadd.f32 %v902_v16, %v507_v46  ;;  %v62_v54 = vld [vmem:[%s6376_s0 + $0xe0] sm:$0xff]  ;;  %v63_v25 = vld [vmem:[%s6376_s0 + $0xe8] sm:$0xff]  ;;  %v3642_v22 = vor.u32 %v3914_v41, %v3641_v8 }
 0x15c   :  { %v4839_v2 = vpop.f32.mrf.mxu3  ;;  %v4850_v52 = vpop.f32.mrf.mxu0  ;;  %1876 = vmatpush.bf16.msra.mxu0 %v3654_v24  ;;  %v3451_v16 = vld [vmem:[%s6381_s5 + $0x24] sm:$0xf0]  ;;  %v3629_v17 = vld [vmem:[%s6381_s5 + $0x180] sm:$0xf] }
 0x15d   :  { %6472 = vst [vmem:[#allocation57_spill] sm:$0xff] %v4839_v2  ;;  %v904_v62 = vpop.f32.mrf.mxu1  ;;  %v3454_v46 = vor.u32 %v3865_v18, %v3451_v16  ;;  %v997_v8 = vadd.f32 %v4648_v43, %v903_v10  ;;  %v3862_v16 = vld [vmem:[%s6381_s5 + $0x4] sm:$0xf] }
 0x15e   :  { %6473 = vst [vmem:[#allocation58_spill] sm:$0xff] %v4850_v52  ;;  %1965 = vmatpush.bf16.msra.mxu1 %v3466_v42  ;;  %1788 = vmatpush.bf16.msra.mxu3 %v3546_v31  ;;  %v3533_v42 = vld [vmem:[%s6381_s5 + $0xc0] sm:$0xf]  ;;  %v80_v31 = vpack.c.bf16 %v63_v25, %v62_v54  ;;  %v3442_v25 = vor.u32 %v3862_v16, %v3439_v11  ;;  %v65_v16 = vld [vmem:[%s6376_s0 + $0xf8] sm:$0xff] }
 0x15f   :  { %v3534_v18 = vor.u32 %v3887_v51, %v3533_v42  ;;  %v3907_v42 = vld [vmem:[%s6381_s5 + $0x16c] sm:$0xf]  ;;  %v3619_v51 = vld [vmem:[%s6381_s5 + $0x174] sm:$0xf0] }
 0x160   :  { %1877 = vmatpush.bf16.msra.mxu0 %v3642_v22  ;;  %v3911_v22 = vld [vmem:[%s6381_s5 + $0x188] sm:$0xf0] }
 0x162   :  { %v509_v24 = vpop.f32.mrf.mxu2  ;;  %1966 = vmatpush.bf16.msra.mxu1 %v3454_v46  ;;  %1789 = vmatpush.bf16.msra.mxu3 %v3534_v18  ;;  %v1093_v46 = vmax.f32 %v997_v8, 0.0  ;;  %v3622_v8 = vor.u32 %v3907_v42, %v3619_v51 }
 0x163   :  { %v905_v41 = vadd.f32 %v904_v62, %v509_v24  ;;  %v3630_v62 = vor.u32 %v3911_v22, %v3629_v17  ;;  %v64_v22 = vld [vmem:[%s6376_s0 + $0xf0] sm:$0xff] }
 0x164   :  { %v4886_v52 = vpop.f32.mrf.mxu3  ;;  %v4897_v2 = vpop.f32.mrf.mxu0  ;;  %2049 = vmatpush.bf16.msrb.mxu2 %v3622_v8 }
 0x165   :  { %v1000_v10 = vadd.f32 %v4648_v43, %v905_v41  ;;  %v907_v54 = vpop.f32.mrf.mxu1  ;;  %1878 = vmatpush.bf16.msra.mxu0 %v3630_v62 }
 0x166   :  { %1967 = vmatpush.bf16.msra.mxu1 %v3442_v25 }
 0x167   :  { %v1096_v24 = vmax.f32 %v1000_v10, 0.0  ;;  %3337 = vmatmul.msk.bf16.gmra.mxu2 %vm246_vm0, %v4336_v30  ;;  %857 = vmatmul.bf16.gmra.mxu0 %v80_v31 }
 0x168   :  { %946 = vmatmul.bf16.gmra.mxu1 %v80_v31 }
 0x169   :  { %768 = vmatmul.bf16.gmra.mxu3 %v80_v31  ;;  %v4908_v17 = vpack.c.bf16 %v1096_v24, %v1093_v46  ;;  %v81_v24 = vpack.c.bf16 %v65_v16, %v64_v22  ;;  %v702_v22 = vadd.f32 %v4663_v33, %v4410_v58 }
 0x16a   :  { %v512_v11 = vpop.f32.mrf.mxu2 }
 0x16b   :  { %6474 = vst [vmem:[#allocation59_spill] sm:$0xff] %v4908_v17  ;;  %v908_v31 = vadd.f32 %v907_v54, %v512_v11 }
 0x16c   :  { %v4910_v41 = vpop.f32.mrf.mxu3  ;;  %v4912_v18 = vpop.f32.mrf.mxu0 }
 0x16d   :  { %6475 = vst [vmem:[#allocation60_spill] sm:$0xff] %v4912_v18  ;;  %v909_v30 = vpop.f32.mrf.mxu1  ;;  %v1003_v10 = vadd.f32 %v4648_v43, %v908_v31  ;;  %v700_v31 = vadd.f32 %v4638_v19, %v4394_v49 }
 0x16f   :  { %v1099_v11 = vmax.f32 %v1003_v10, 0.0  ;;  %v4940_v10 = vperm.slane %v4643_v23, 1 }
 0x172   :  { %v514_v62 = vpop.f32.mrf.mxu2 }
 0x173   :  { %v910_v25 = vadd.f32 %v909_v30, %v514_v62  ;;  %v4931_v30 = vperm.slane %v4643_v23, 0  ;;  %v789_v62 = vadd.f32 %v4628_v37, %v4396_v50 }
 0x174   :  { %v4921_v46 = vpop.f32.mrf.mxu3  ;;  %v4923_v42 = vpop.f32.mrf.mxu0 }
 0x175   :  { %6476 = vst [vmem:[#allocation61_spill] sm:$0xff] %v4923_v42  ;;  %v1006_v51 = vadd.f32 %v4648_v43, %v910_v25  ;;  %v912_v54 = vpop.f32.mrf.mxu1  ;;  %v965_v19 = vadd.f32 %v4931_v30, %v700_v31  ;;  %v968_v58 = vadd.f32 %v4931_v30, %v702_v22 }
 0x177   :  { %v1102_v8 = vmax.f32 %v1006_v51, 0.0  ;;  %3338 = vmatmul.msk.bf16.gmra.mxu2 %vm246_vm0, %v4378_v45  ;;  %862 = vmatmul.bf16.gmra.mxu0 %v81_v24  ;;  %v791_v45 = vadd.f32 %v4645_v7, %v4412_v5  ;;  %v966_v51 = vadd.f32 %v4940_v10, %v789_v62  ;;  %v1061_v23 = vmax.f32 %v965_v19, 0.0 }
 0x178   :  { %951 = vmatmul.bf16.gmra.mxu1 %v81_v24  ;;  %v707_v19 = vadd.f32 %v4695_v56, %v4434_v4 }
 0x179   :  { %773 = vmatmul.bf16.gmra.mxu3 %v81_v24  ;;  %v4935_v16 = vpack.c.bf16 %v1102_v8, %v1099_v11  ;;  %v969_v50 = vadd.f32 %v4940_v10, %v791_v45  ;;  %v1064_v11 = vmax.f32 %v968_v58, 0.0  ;;  %v1062_v8 = vmax.f32 %v966_v51, 0.0 }
 0x17a   :  { %v517_v25 = vpop.f32.mrf.mxu2  ;;  %v796_v51 = vadd.f32 %v4686_v26, %v4436_v6 }
 0x17b   :  { %6477 = vst [vmem:[#allocation62_spill] sm:$0xff] %v4935_v16  ;;  %v913_v37 = vadd.f32 %v912_v54, %v517_v25  ;;  %v1065_v42 = vmax.f32 %v969_v50, 0.0  ;;  %v4957_v31 = vpack.c.bf16 %v1064_v11, %v1061_v23  ;;  %v705_v25 = vadd.f32 %v4684_v57, %v4424_v0 }
 0x17c   :  { %v4944_v24 = vpop.f32.mrf.mxu3  ;;  %v4946_v49 = vpop.f32.mrf.mxu0 }
 0x17d   :  { %6478 = vst [vmem:[#allocation63_spill] sm:$0xff] %v4944_v24  ;;  %v914_v33 = vpop.f32.mrf.mxu1  ;;  %v1009_v7 = vadd.f32 %v4648_v43, %v913_v37  ;;  %v4960_v18 = vpack.c.bf16 %v1065_v42, %v1062_v8  ;;  %v3904_v42 = vld [vmem:[%s6381_s5 + $0x154] sm:$0xf]  ;;  %v971_v4 = vadd.f32 %v4931_v30, %v705_v25  ;;  %v974_v37 = vadd.f32 %v4931_v30, %v707_v19 }
 0x17e   :  { %6479 = vst [vmem:[#allocation64_spill] sm:$0xff] %v4946_v49  ;;  %v975_v8 = vadd.f32 %v4940_v10, %v796_v51 }
 0x17f   :  { %v1105_v54 = vmax.f32 %v1009_v7, 0.0 }
 0x180   :  { %v1071_v26 = vmax.f32 %v975_v8, 0.0 }
 0x182   :  { %v519_v5 = vpop.f32.mrf.mxu2 }
 0x183   :  { %v915_v24 = vadd.f32 %v914_v33, %v519_v5  ;;  %v794_v33 = vadd.f32 %v4665_v3, %v4426_v1  ;;  %v1067_v3 = vmax.f32 %v971_v4, 0.0  ;;  %v1070_v5 = vmax.f32 %v974_v37, 0.0 }
 0x184   :  { %v4953_v16 = vpop.f32.mrf.mxu3  ;;  %v4955_v49 = vpop.f32.mrf.mxu0  ;;  %v799_v37 = vadd.f32 %v4697_v12, %v4450_v21 }
 0x185   :  { %v1012_v22 = vadd.f32 %v4648_v43, %v915_v24  ;;  %v917_v62 = vpop.f32.mrf.mxu1  ;;  %v3607_v24 = vld [vmem:[%s6381_s5 + $0x15c] sm:$0xf0]  ;;  %v972_v11 = vadd.f32 %v4940_v10, %v794_v33 }
 0x186   :  { %v3610_v57 = vor.u32 %v3904_v42, %v3607_v24  ;;  %v4996_v24 = vpack.c.bf16 %v1070_v5, %v1067_v3 }
 0x187   :  { %v1108_v45 = vmax.f32 %v1012_v22, 0.0  ;;  %1701 = vmatmul.bf16.vlgmr.msra.gmra.mxu2 %v4957_v31  ;;  %1879 = vmatmul.bf16.vlgmr.msra.gmra.mxu0 %v4670_v44  ;;  %v1068_v6 = vmax.f32 %v972_v11, 0.0 }
 0x188   :  { %1968 = vmatmul.bf16.vlgmr.msra.gmra.mxu1 %v4957_v31  ;;  %2050 = vmatpush.bf16.msrb.mxu2 %v3610_v57  ;;  %6481 = vst [vmem:[#allocation66_spill] sm:$0xff] %v4996_v24  ;;  %v712_v57 = vadd.f32 %v4727_v34, %v4464_v27  ;;  %v978_v27 = vadd.f32 %v4940_v10, %v799_v37 }
 0x189   :  { %1790 = vmatmul.bf16.vlgmr.msra.gmra.mxu3 %v4960_v18  ;;  %v4976_v58 = vpack.c.bf16 %v1108_v45, %v1105_v54  ;;  %v4998_v33 = vpack.c.bf16 %v1071_v26, %v1068_v6  ;;  %v715_v37 = vadd.f32 %v4748_v61, %v4478_v35 }
 0x18a   :  { %v522_v0 = vpop.f32.mrf.mxu2  ;;  %v1074_v12 = vmax.f32 %v978_v27, 0.0  ;;  %v806_v27 = vadd.f32 %v4750_v32, %v4490_v40 }
 0x18b   :  { %6480 = vst [vmem:[#allocation65_spill] sm:$0xff] %v4976_v58  ;;  %v918_v1 = vadd.f32 %v917_v62, %v522_v0  ;;  %v710_v0 = vadd.f32 %v4710_v15, %v4448_v20  ;;  %v980_v20 = vadd.f32 %v4931_v30, %v712_v57 }
 0x18c   :  { %v4982_v50 = vpop.f32.mrf.mxu3  ;;  %v4984_v56 = vpop.f32.mrf.mxu0 }
 0x18d   :  { %v919_v23 = vpop.f32.mrf.mxu1  ;;  %v1015_v22 = vadd.f32 %v4648_v43, %v918_v1  ;;  %v977_v3 = vadd.f32 %v4931_v30, %v710_v0  ;;  %v1076_v21 = vmax.f32 %v980_v20, 0.0 }
 0x18f   :  { %v1111_v62 = vmax.f32 %v1015_v22, 0.0  ;;  %v1073_v6 = vmax.f32 %v977_v3, 0.0  ;;  %v3595_v3 = vld [vmem:[%s6381_s5 + $0x144] sm:$0xf0] }
 0x192   :  { %v524_v7 = vpop.f32.mrf.mxu2 }
 0x193   :  { %v920_v54 = vadd.f32 %v919_v23, %v524_v7  ;;  %v801_v23 = vadd.f32 %v4712_v60, %v4466_v13 }
 0x194   :  { %v4991_v45 = vpop.f32.mrf.mxu3  ;;  %v4993_v42 = vpop.f32.mrf.mxu0 }
 0x195   :  { %v1018_v25 = vadd.f32 %v4648_v43, %v920_v54  ;;  %v922_v19 = vpop.f32.mrf.mxu1  ;;  %v981_v34 = vadd.f32 %v4940_v10, %v801_v23  ;;  %v717_v23 = vadd.f32 %v4759_v9, %v4488_v39  ;;  %v983_v9 = vadd.f32 %v4931_v30, %v715_v37 }
 0x197   :  { %v1114_v51 = vmax.f32 %v1018_v25, 0.0  ;;  %1706 = vmatmul.bf16.gmra.mxu2 %v4996_v24  ;;  %1884 = vmatmul.bf16.gmra.mxu0 %v4708_v53  ;;  %v1077_v26 = vmax.f32 %v981_v34, 0.0 }
 0x198   :  { %1973 = vmatmul.bf16.gmra.mxu1 %v4996_v24 }
 0x199   :  { %1795 = vmatmul.bf16.gmra.mxu3 %v4998_v33  ;;  %v5008_v4 = vpack.c.bf16 %v1114_v51, %v1111_v62  ;;  %v5028_v51 = vpack.c.bf16 %v1076_v21, %v1073_v6  ;;  %v5030_v0 = vpack.c.bf16 %v1077_v26, %v1074_v12  ;;  %v987_v12 = vadd.f32 %v4940_v10, %v806_v27 }
 0x19a   :  { %v527_v11 = vpop.f32.mrf.mxu2  ;;  %v722_v27 = vadd.f32 %v4800_v28, %v4518_v63 }
 0x19b   :  { %v923_v5 = vadd.f32 %v922_v19, %v527_v11  ;;  %6482 = vst [vmem:[#allocation67_spill] sm:$0xff] %v5028_v51  ;;  %v3901_v11 = vld [vmem:[%s6381_s5 + $0x13c] sm:$0xf]  ;;  %v1083_v32 = vmax.f32 %v987_v12, 0.0 }
 0x19c   :  { %v5014_v8 = vpop.f32.mrf.mxu3  ;;  %v5016_v1 = vpop.f32.mrf.mxu0  ;;  %6483 = vst [vmem:[#allocation68_spill] sm:$0xff] %v5030_v0  ;;  %v3598_v61 = vor.u32 %v3901_v11, %v3595_v3 }
 0x19d   :  { %v924_v15 = vpop.f32.mrf.mxu1  ;;  %v1021_v60 = vadd.f32 %v4648_v43, %v923_v5  ;;  %v986_v5 = vadd.f32 %v4931_v30, %v717_v23 }
 0x19e   :  { %2051 = vmatpush.bf16.msrb.mxu2 %v3598_v61  ;;  %v6487_v61 = vld [vmem:[#allocation52_spill] sm:$0xff] }
 0x19f   :  { %v1117_v19 = vmax.f32 %v1021_v60, 0.0  ;;  %v1082_v26 = vmax.f32 %v986_v5, 0.0  ;;  %v6488_v5 = vld [vmem:[#allocation23_spill] sm:$0xff] }
 0x1a2   :  { %v529_v13 = vpop.f32.mrf.mxu2 }
 0x1a3   :  { %v925_v7 = vadd.f32 %v924_v15, %v529_v13  ;;  %v804_v15 = vadd.f32 %v4729_v59, %v4480_v36  ;;  %v1079_v59 = vmax.f32 %v983_v9, 0.0  ;;  %v809_v9 = vadd.f32 %v6487_v61, %v4504_v48 }
 0x1a4   :  { %v5023_v22 = vpop.f32.mrf.mxu3  ;;  %v5025_v54 = vpop.f32.mrf.mxu0 }
 0x1a5   :  { %v1024_v25 = vadd.f32 %v4648_v43, %v925_v7  ;;  %v927_v62 = vpop.f32.mrf.mxu1  ;;  %v984_v21 = vadd.f32 %v4940_v10, %v804_v15  ;;  %v5066_v23 = vpack.c.bf16 %v1082_v26, %v1079_v59  ;;  %v720_v15 = vadd.f32 %v4774_v14, %v4502_v47 }
 0x1a6   :  { %v992_v47 = vadd.f32 %v4931_v30, %v722_v27  ;;  %v990_v63 = vadd.f32 %v4940_v10, %v809_v9 }
 0x1a7   :  { %v1120_v57 = vmax.f32 %v1024_v25, 0.0  ;;  %1711 = vmatmul.bf16.gmra.mxu2 %v5028_v51  ;;  %1889 = vmatmul.bf16.gmra.mxu0 %v4740_v38  ;;  %v1080_v40 = vmax.f32 %v984_v21, 0.0  ;;  %6485 = vst [vmem:[#allocation70_spill] sm:$0xff] %v5066_v23  ;;  %v989_v26 = vadd.f32 %v4931_v30, %v720_v15 }
 0x1a8   :  { %1978 = vmatmul.bf16.gmra.mxu1 %v5028_v51  ;;  %v1088_v48 = vmax.f32 %v992_v47, 0.0  ;;  %v6494_v47 = vld [vmem:[#allocation30_spill] sm:$0xff] }
 0x1a9   :  { %1800 = vmatmul.bf16.gmra.mxu3 %v5030_v0  ;;  %v5046_v20 = vpack.c.bf16 %v1120_v57, %v1117_v19  ;;  %v5068_v11 = vpack.c.bf16 %v1083_v32, %v1080_v40  ;;  %v1085_v32 = vmax.f32 %v989_v26, 0.0 }
 0x1aa   :  { %v532_v35 = vpop.f32.mrf.mxu2 }
 0x1ab   :  { %6484 = vst [vmem:[#allocation69_spill] sm:$0xff] %v5046_v20  ;;  %v928_v36 = vadd.f32 %v927_v62, %v532_v35 }
 0x1ac   :  { %v5052_v34 = vpop.f32.mrf.mxu3  ;;  %v5054_v39 = vpop.f32.mrf.mxu0  ;;  %6486 = vst [vmem:[#allocation71_spill] sm:$0xff] %v5068_v11 }
 0x1ad   :  { %v929_v6 = vpop.f32.mrf.mxu1  ;;  %v1027_v60 = vadd.f32 %v4648_v43, %v928_v36 }
 0x1af   :  { %v1123_v62 = vmax.f32 %v1027_v60, 0.0 }
 0x1b2   :  { %v534_v13 = vpop.f32.mrf.mxu2 }
 0x1b3   :  { %v930_v7 = vadd.f32 %v929_v6, %v534_v13  ;;  %v6489_v6 = vld [vmem:[#allocation54_spill] sm:$0xff]  ;;  %v1086_v13 = vmax.f32 %v990_v63, 0.0  ;;  %v3898_v63 = vld [vmem:[%s6381_s5 + $0x124] sm:$0xf] }
 0x1b4   :  { %v5061_v25 = vpop.f32.mrf.mxu3  ;;  %v5063_v19 = vpop.f32.mrf.mxu0  ;;  %v811_v21 = vadd.f32 %v6489_v6, %v6488_v5  ;;  %v5098_v5 = vpack.c.bf16 %v1088_v48, %v1085_v32  ;;  %v6495_v32 = vld [vmem:[#allocation27_spill] sm:$0xff] }
 0x1b5   :  { %v1030_v57 = vadd.f32 %v4648_v43, %v930_v7  ;;  %v932_v37 = vpop.f32.mrf.mxu1  ;;  %v6496_v48 = vld [vmem:[#allocation55_spill] sm:$0xff] }
 0x1b6   :  { %v993_v28 = vadd.f32 %v4940_v10, %v811_v21  ;;  %6490 = vst [vmem:[#allocation52_spill] sm:$0xff] %v5098_v5  ;;  %v6492_v21 = vld [vmem:[#allocation26_spill] sm:$0xff] }
 0x1b7   :  { %v1126_v3 = vmax.f32 %v1030_v57, 0.0  ;;  %1716 = vmatmul.bf16.gmra.mxu2 %v5066_v23  ;;  %1894 = vmatmul.bf16.gmra.mxu0 %v4772_v29 }
 0x1b8   :  { %1983 = vmatmul.bf16.gmra.mxu1 %v5066_v23  ;;  %v1089_v60 = vmax.f32 %v993_v28, 0.0  ;;  %v3583_v28 = vld [vmem:[%s6381_s5 + $0x12c] sm:$0xf0] }
 0x1b9   :  { %1805 = vmatmul.bf16.gmra.mxu3 %v5068_v11  ;;  %v5078_v35 = vpack.c.bf16 %v1126_v3, %v1123_v62 }
 0x1ba   :  { %v537_v12 = vpop.f32.mrf.mxu2  ;;  %v5100_v9 = vpack.c.bf16 %v1089_v60, %v1086_v13  ;;  %v814_v13 = vadd.f32 %v6496_v48, %v6495_v32  ;;  %v6497_v60 = vld [vmem:[#allocation31_spill] sm:$0xff] }
 0x1bb   :  { %v933_v40 = vadd.f32 %v932_v37, %v537_v12  ;;  %v6493_v12 = vld [vmem:[#allocation57_spill] sm:$0xff] }
 0x1bc   :  { %v5084_v36 = vpop.f32.mrf.mxu3  ;;  %v5086_v59 = vpop.f32.mrf.mxu0  ;;  %6491 = vst [vmem:[#allocation23_spill] sm:$0xff] %v5100_v9  ;;  %v725_v26 = vadd.f32 %v6493_v12, %v6492_v21 }
 0x1bd   :  { %v934_v14 = vpop.f32.mrf.mxu1  ;;  %v1033_v57 = vadd.f32 %v4648_v43, %v933_v40 }
 0x1be   :  { %v995_v12 = vadd.f32 %v4931_v30, %v725_v26 }
 0x1bf   :  { %v1129_v37 = vmax.f32 %v1033_v57, 0.0 }
 0x1c0   :  { %v1091_v48 = vmax.f32 %v995_v12, 0.0  ;;  %v6502_v12 = vld [vmem:[#allocation38_spill] sm:$0xff] }
 0x1c2   :  { %v539_v7 = vpop.f32.mrf.mxu2 }
 0x1c3   :  { %v935_v62 = vadd.f32 %v934_v14, %v539_v7  ;;  %v727_v14 = vadd.f32 %v4886_v52, %v6494_v47  ;;  %v6498_v7 = vld [vmem:[#allocation58_spill] sm:$0xff] }
 0x1c4   :  { %v5093_v3 = vpop.f32.mrf.mxu3  ;;  %v5095_v61 = vpop.f32.mrf.mxu0  ;;  %v816_v57 = vadd.f32 %v6498_v7, %v6497_v60 }
 0x1c5   :  { %v1036_v15 = vadd.f32 %v4648_v43, %v935_v62  ;;  %v937_v27 = vpop.f32.mrf.mxu1  ;;  %v998_v47 = vadd.f32 %v4931_v30, %v727_v14 }
 0x1c7   :  { %v1132_v6 = vmax.f32 %v1036_v15, 0.0  ;;  %1721 = vmatmul.bf16.gmra.mxu2 %v5098_v5  ;;  %1899 = vmatmul.bf16.gmra.mxu0 %v4828_v55  ;;  %v3586_v15 = vor.u32 %v3898_v63, %v3583_v28 }
 0x1c8   :  { %1988 = vmatmul.bf16.gmra.mxu1 %v5098_v5  ;;  %v1094_v5 = vmax.f32 %v998_v47, 0.0  ;;  %v6503_v47 = vld [vmem:[#allocation35_spill] sm:$0xff] }
 0x1c9   :  { %1810 = vmatmul.bf16.gmra.mxu3 %v5100_v9  ;;  %v5116_v40 = vpack.c.bf16 %v1132_v6, %v1129_v37  ;;  %2052 = vmatpush.bf16.msrb.mxu2 %v3586_v15  ;;  %v996_v37 = vadd.f32 %v4940_v10, %v814_v13  ;;  %v999_v6 = vadd.f32 %v4940_v10, %v816_v57 }
 0x1ca   :  { %v542_v62 = vpop.f32.mrf.mxu2  ;;  %v5136_v23 = vpack.c.bf16 %v1094_v5, %v1091_v48 }
 0x1cb   :  { %v938_v32 = vadd.f32 %v937_v27, %v542_v62  ;;  %v1092_v60 = vmax.f32 %v996_v37, 0.0  ;;  %v1095_v7 = vmax.f32 %v999_v6, 0.0  ;;  %v819_v37 = vadd.f32 %v4897_v2, %v6503_v47  ;;  %v6504_v6 = vld [vmem:[#allocation39_spill] sm:$0xff] }
 0x1cc   :  { %v5122_v21 = vpop.f32.mrf.mxu3  ;;  %v5124_v52 = vpop.f32.mrf.mxu0  ;;  %6499 = vst [vmem:[#allocation54_spill] sm:$0xff] %v5136_v23 }
 0x1cd   :  { %v939_v55 = vpop.f32.mrf.mxu1  ;;  %v1039_v28 = vadd.f32 %v4648_v43, %v938_v32  ;;  %v5138_v13 = vpack.c.bf16 %v1095_v7, %v1092_v60  ;;  %v6505_v32 = vld [vmem:[#allocation60_spill] sm:$0xff] }
 0x1ce   :  { %v821_v48 = vadd.f32 %v6505_v32, %v6504_v6 }
 0x1cf   :  { %6500 = vst [vmem:[#allocation26_spill] sm:$0xff] %v5138_v13  ;;  %v1135_v27 = vmax.f32 %v1039_v28, 0.0 }
 0x1d2   :  { %v544_v63 = vpop.f32.mrf.mxu2 }
 0x1d3   :  { %v940_v9 = vadd.f32 %v939_v55, %v544_v63  ;;  %v6501_v55 = vld [vmem:[#allocation34_spill] sm:$0xff] }
 0x1d4   :  { %v5131_v29 = vpop.f32.mrf.mxu3  ;;  %v5133_v15 = vpop.f32.mrf.mxu0  ;;  %v730_v62 = vadd.f32 %v4910_v41, %v6501_v55 }
 0x1d5   :  { %v1042_v26 = vadd.f32 %v4648_v43, %v940_v9  ;;  %v942_v14 = vpop.f32.mrf.mxu1  ;;  %v732_v9 = vadd.f32 %v4921_v46, %v6502_v12  ;;  %v1002_v46 = vadd.f32 %v4940_v10, %v819_v37 }
 0x1d6   :  { %v1001_v28 = vadd.f32 %v4931_v30, %v730_v62 }
 0x1d7   :  { %v1138_v57 = vmax.f32 %v1042_v26, 0.0  ;;  %1726 = vmatmul.bf16.gmra.mxu2 %v5136_v23  ;;  %1904 = vmatmul.bf16.gmra.mxu0 %v4908_v17  ;;  %v1004_v41 = vadd.f32 %v4931_v30, %v732_v9  ;;  %v1098_v12 = vmax.f32 %v1002_v46, 0.0 }
 0x1d8   :  { %1993 = vmatmul.bf16.gmra.mxu1 %v5136_v23  ;;  %v1097_v55 = vmax.f32 %v1001_v28, 0.0  ;;  %v3895_v28 = vld [vmem:[%s6381_s5 + $0x10c] sm:$0xf] }
 0x1d9   :  { %1815 = vmatmul.bf16.gmra.mxu3 %v5138_v13  ;;  %v5148_v5 = vpack.c.bf16 %v1138_v57, %v1135_v27  ;;  %v1005_v27 = vadd.f32 %v4940_v10, %v821_v48  ;;  %v1100_v2 = vmax.f32 %v1004_v41, 0.0  ;;  %v6509_v41 = vld [vmem:[#allocation42_spill] sm:$0xff] }
 0x1da   :  { %v547_v60 = vpop.f32.mrf.mxu2 }
 0x1db   :  { %v943_v57 = vadd.f32 %v942_v14, %v547_v60  ;;  %v1101_v47 = vmax.f32 %v1005_v27, 0.0  ;;  %v5168_v11 = vpack.c.bf16 %v1100_v2, %v1097_v55  ;;  %v6508_v60 = vld [vmem:[#allocation62_spill] sm:$0xff] }
 0x1dc   :  { %v5154_v7 = vpop.f32.mrf.mxu3  ;;  %v5156_v63 = vpop.f32.mrf.mxu0  ;;  %v6511_v27 = vld [vmem:[#allocation46_spill] sm:$0xff] }
 0x1dd   :  { %v944_v26 = vpop.f32.mrf.mxu1  ;;  %v1045_v32 = vadd.f32 %v4648_v43, %v943_v57  ;;  %6506 = vst [vmem:[#allocation57_spill] sm:$0xff] %v5168_v11  ;;  %v5170_v37 = vpack.c.bf16 %v1101_v47, %v1098_v12  ;;  %v737_v57 = vadd.f32 %v4953_v16, %v6511_v27  ;;  %v6512_v12 = vld [vmem:[#allocation43_spill] sm:$0xff]  ;;  %v6513_v47 = vld [vmem:[#allocation61_spill] sm:$0xff] }
 0x1df   :  { %6507 = vst [vmem:[#allocation30_spill] sm:$0xff] %v5170_v37  ;;  %v1141_v14 = vmax.f32 %v1045_v32, 0.0  ;;  %v6514_v32 = vld [vmem:[#allocation47_spill] sm:$0xff] }
 0x1e2   :  { %v549_v6 = vpop.f32.mrf.mxu2 }
 0x1e3   :  { %v945_v17 = vadd.f32 %v944_v26, %v549_v6  ;;  %v6510_v26 = vld [vmem:[#allocation63_spill] sm:$0xff]  ;;  %v824_v6 = vadd.f32 %v6513_v47, %v6512_v12  ;;  %v3931_v12 = vld [vmem:[%s6381_s5 + $0x22c] sm:$0xf] }
 0x1e4   :  { %v5163_v23 = vpop.f32.mrf.mxu3  ;;  %v5165_v13 = vpop.f32.mrf.mxu0  ;;  %v735_v46 = vadd.f32 %v6510_v26, %v6509_v41  ;;  %v1010_v26 = vadd.f32 %v4931_v30, %v737_v57 }
 0x1e5   :  { %v1048_v62 = vadd.f32 %v4648_v43, %v945_v17  ;;  %v947_v9 = vpop.f32.mrf.mxu1  ;;  %v3571_v17 = vld [vmem:[%s6381_s5 + $0x114] sm:$0xf0] }
 0x1e6   :  { %v3574_v55 = vor.u32 %v3895_v28, %v3571_v17  ;;  %v1007_v41 = vadd.f32 %v4931_v30, %v735_v46  ;;  %v1106_v27 = vmax.f32 %v1010_v26, 0.0 }
 0x1e7   :  { %v1144_v48 = vmax.f32 %v1048_v62, 0.0  ;;  %1731 = vmatmul.bf16.gmra.mxu2 %v5168_v11  ;;  %1909 = vmatmul.bf16.gmra.mxu0 %v6508_v60  ;;  %v6515_v62 = vld [vmem:[#allocation64_spill] sm:$0xff] }
 0x1e8   :  { %1998 = vmatmul.bf16.gmra.mxu1 %v5168_v11  ;;  %v826_v60 = vadd.f32 %v6515_v62, %v6514_v32  ;;  %2053 = vmatpush.bf16.msrb.mxu2 %v3574_v55  ;;  %v1103_v17 = vmax.f32 %v1007_v41, 0.0  ;;  %v3715_v55 = vld [vmem:[%s6381_s5 + $0x234] sm:$0xf0] }
 0x1e9   :  { %1820 = vmatmul.bf16.gmra.mxu3 %v5170_v37  ;;  %v5186_v2 = vpack.c.bf16 %v1144_v48, %v1141_v14  ;;  %v1008_v14 = vadd.f32 %v4940_v10, %v824_v6  ;;  %v3718_v57 = vor.u32 %v3931_v12, %v3715_v55  ;;  %v6519_v12 = vld [vmem:[#allocation8_spill] sm:$0xff]  ;;  %v6520_v55 = vld [vmem:[#allocation5_spill] sm:$0xff] }
 0x1ea   :  { %v552_v11 = vpop.f32.mrf.mxu2  ;;  %v1011_v48 = vadd.f32 %v4940_v10, %v826_v60  ;;  %v5212_v41 = vpack.c.bf16 %v1106_v27, %v1103_v17  ;;  %v831_v17 = vadd.f32 %v4984_v56, %v6519_v12 }
 0x1eb   :  { %v948_v28 = vadd.f32 %v947_v9, %v552_v11  ;;  %v1104_v47 = vmax.f32 %v1008_v14, 0.0  ;;  %2138 = vmatpush.bf16.msrb.mxu3 %v3718_v57  ;;  %v3885_v57 = vld [vmem:[%s6381_s5 + $0xb8] sm:$0xf0] }
 0x1ec   :  { %v5192_v37 = vpop.f32.mrf.mxu3  ;;  %v5194_v38 = vpop.f32.mrf.mxu0  ;;  %v1107_v46 = vmax.f32 %v1011_v48, 0.0  ;;  %6516 = vst [vmem:[#allocation27_spill] sm:$0xff] %v5212_v41  ;;  %v1017_v12 = vadd.f32 %v4940_v10, %v831_v17 }
 0x1ed   :  { %v949_v16 = vpop.f32.mrf.mxu1  ;;  %v1051_v62 = vadd.f32 %v4648_v43, %v948_v28 }
 0x1ee   :  { %v5214_v26 = vpack.c.bf16 %v1107_v46, %v1104_v47  ;;  %v740_v47 = vadd.f32 %v4982_v50, %v6520_v55 }
 0x1ef   :  { %v1147_v0 = vmax.f32 %v1051_v62, 0.0 }
 0x1f0   :  { %6517 = vst [vmem:[#allocation55_spill] sm:$0xff] %v5214_v26  ;;  %v1013_v55 = vadd.f32 %v4931_v30, %v740_v47 }
 0x1f2   :  { %v554_v32 = vpop.f32.mrf.mxu2 }
 0x1f3   :  { %v950_v6 = vadd.f32 %v949_v16, %v554_v32  ;;  %v6518_v16 = vld [vmem:[#allocation7_spill] sm:$0xff] }
 0x1f4   :  { %v5207_v51 = vpop.f32.mrf.mxu3  ;;  %v5209_v11 = vpop.f32.mrf.mxu0  ;;  %v742_v48 = vadd.f32 %v4991_v45, %v6518_v16  ;;  %v3529_v32 = vld [vmem:[%s6381_s5 + $0xb0] sm:$0xf] }
 0x1f5   :  { %v1054_v9 = vadd.f32 %v4648_v43, %v950_v6  ;;  %v952_v60 = vpop.f32.mrf.mxu1  ;;  %v3625_v45 = vld [vmem:[%s6381_s5 + $0x170] sm:$0xf]  ;;  %v3530_v50 = vor.u32 %v3885_v57, %v3529_v32  ;;  %v3909_v6 = vld [vmem:[%s6381_s5 + $0x178] sm:$0xf0]  ;;  %v1109_v57 = vmax.f32 %v1013_v55, 0.0 }
 0x1f6   :  { %v3626_v16 = vor.u32 %v3909_v6, %v3625_v45 }
 0x1f7   :  { %v1150_v14 = vmax.f32 %v1054_v9, 0.0  ;;  %1736 = vmatmul.bf16.gmra.mxu2 %v5212_v41  ;;  %1914 = vmatmul.bf16.gmra.mxu0 %v4976_v58  ;;  %v1016_v9 = vadd.f32 %v4931_v30, %v742_v48 }
 0x1f8   :  { %2003 = vmatmul.bf16.gmra.mxu1 %v5212_v41  ;;  %2227 = vmatpush.bf16.msrb.mxu0 %v3530_v50  ;;  %v1113_v41 = vmax.f32 %v1017_v12, 0.0 }
 0x1f9   :  { %1825 = vmatmul.bf16.gmra.mxu3 %v5214_v26  ;;  %v5222_v28 = vpack.c.bf16 %v1150_v14, %v1147_v0  ;;  %v6521_v0 = vld [vmem:[#allocation6_spill] sm:$0xff]  ;;  %2316 = vmatpush.bf16.msrb.mxu1 %v3626_v16 }
 0x1fa   :  { %v557_v27 = vpop.f32.mrf.mxu2  ;;  %v829_v56 = vadd.f32 %v4955_v49, %v6521_v0  ;;  %v1112_v0 = vmax.f32 %v1016_v9, 0.0 }
 0x1fb   :  { %v953_v58 = vadd.f32 %v952_v60, %v557_v27  ;;  %v1301_v60 = vld [vmem:[%s6382_s6] sm:$0x7] }
 0x1fc   :  { %v5228_v46 = vpop.f32.mrf.mxu3  ;;  %v5241_v62 = vpop.f32.mrf.mxu0  ;;  %v1014_v49 = vadd.f32 %v4940_v10, %v829_v56  ;;  %v5256_v47 = vpack.c.bf16 %v1112_v0, %v1109_v57  ;;  %v6525_v57 = vld [vmem:[#allocation10_spill] sm:$0xff] }
 0x1fd   :  { %v954_v14 = vpop.f32.mrf.mxu1  ;;  %v1057_v26 = vadd.f32 %v4648_v43, %v953_v58  ;;  %v5265_v58 = vperm.slane %v1301_v60, 0 }
 0x1fe   :  { %v1110_v48 = vmax.f32 %v1014_v49, 0.0  ;;  %v6524_v49 = vld [vmem:[#allocation9_spill] sm:$0xff] }
 0x1ff   :  { %v1153_v56 = vmax.f32 %v1057_v26, 0.0  ;;  %v3559_v26 = vld [vmem:[%s6381_s5 + $0xfc] sm:$0xf0]  ;;  %v745_v0 = vadd.f32 %v5014_v8, %v6524_v49 }
 0x200   :  { %v5261_v27 = vpack.c.bf16 %v1113_v41, %v1110_v48  ;;  %v3892_v41 = vld [vmem:[%s6381_s5 + $0xf4] sm:$0xf]  ;;  %v834_v48 = vadd.f32 %v4993_v42, %v6525_v57  ;;  %v3703_v42 = vld [vmem:[%s6381_s5 + $0x21c] sm:$0xf0] }
 0x201   :  { %v3562_v55 = vor.u32 %v3892_v41, %v3559_v26 }
 0x202   :  { %v559_v32 = vpop.f32.mrf.mxu2  ;;  %v1020_v8 = vadd.f32 %v4940_v10, %v834_v48 }
 0x203   :  { %v955_v53 = vadd.f32 %v954_v14, %v559_v32  ;;  %v6523_v14 = vld [vmem:[#allocation12_spill] sm:$0xff]  ;;  %2054 = vmatpush.bf16.msrb.mxu2 %v3562_v55 }
 0x204   :  { %v5251_v24 = vpop.f32.mrf.mxu3  ;;  %v1880_v45 = vpop.f32.mrf.mxu0  ;;  %v836_v16 = vadd.f32 %v5016_v1, %v6523_v14  ;;  %v3928_v14 = vld [vmem:[%s6381_s5 + $0x214] sm:$0xf] }
 0x205   :  { %v1060_v17 = vadd.f32 %v4648_v43, %v955_v53  ;;  %v5254_v50 = vpop.f32.mrf.mxu1  ;;  %v6522_v43 = vld [vmem:[#allocation11_spill] sm:$0xff]  ;;  %v3706_v55 = vor.u32 %v3928_v14, %v3703_v42  ;;  %v6528_v42 = vld [vmem:[#allocation16_spill] sm:$0xff] }
 0x206   :  { %v747_v53 = vadd.f32 %v5023_v22, %v6522_v43  ;;  %v1023_v1 = vadd.f32 %v4940_v10, %v836_v16  ;;  %v1019_v43 = vadd.f32 %v4931_v30, %v745_v0  ;;  %v1116_v0 = vmax.f32 %v1020_v8, 0.0 }
 0x207   :  { %v1156_v6 = vmax.f32 %v1060_v17, 0.0  ;;  %1741 = vmatmul.bf16.gmra.mxu2 %v5256_v47  ;;  %1919 = vmatmul.bf16.gmra.mxu0 %v5008_v4 }
 0x208   :  { %2008 = vmatmul.bf16.gmra.mxu1 %v5256_v47  ;;  %v1022_v60 = vadd.f32 %v4931_v30, %v747_v53  ;;  %v1119_v53 = vmax.f32 %v1023_v1, 0.0  ;;  %v1115_v49 = vmax.f32 %v1019_v43, 0.0  ;;  %2139 = vmatpush.bf16.msrb.mxu3 %v3706_v55  ;;  %v6527_v1 = vld [vmem:[#allocation15_spill] sm:$0xff] }
 0x209   :  { %1830 = vmatmul.bf16.gmra.mxu3 %v5261_v27  ;;  %v5277_v9 = vpack.c.bf16 %v1156_v6, %v1153_v56  ;;  %v752_v43 = vadd.f32 %v5061_v25, %v6527_v1  ;;  %v3906_v25 = vld [vmem:[%s6381_s5 + $0x160] sm:$0xf0] }
 0x20a   :  { %v1702_v12 = vpop.f32.mrf.mxu2  ;;  %v1118_v26 = vmax.f32 %v1022_v60, 0.0  ;;  %v5303_v60 = vpack.c.bf16 %v1119_v53, %v1116_v0  ;;  %v841_v53 = vadd.f32 %v5054_v39, %v6528_v42  ;;  %v6531_v39 = vld [vmem:[#allocation14_spill] sm:$0xff] }
 0x20b   :  { %v1703_v22 = vadd.f32 %v1702_v12, %v5265_v58  ;;  %v839_v1 = vadd.f32 %v5025_v54, %v6531_v39 }
 0x20c   :  { %v1791_v32 = vpop.f32.mrf.mxu3  ;;  %v1882_v17 = vpop.f32.mrf.mxu0  ;;  %v5301_v48 = vpack.c.bf16 %v1118_v26, %v1115_v49  ;;  %v3517_v26 = vld [vmem:[%s6381_s5 + $0x98] sm:$0xf] }
 0x20d   :  { %v1792_v56 = vadd.f32 %v1791_v32, %v1703_v22  ;;  %v5287_v6 = vpop.f32.mrf.mxu1  ;;  %v3613_v49 = vld [vmem:[%s6381_s5 + $0x158] sm:$0xf] }
 0x20f   :  { %v1881_v41 = vadd.f32 %v1880_v45, %v1792_v56 }
 0x211   :  { %v2494_v8 = vmax.f32 %v1881_v41, 0.0  ;;  %v6529_v41 = vld [vmem:[#allocation13_spill] sm:$0xff] }
 0x212   :  { %v1704_v12 = vpop.f32.mrf.mxu2 }
 0x213   :  { %v1705_v16 = vadd.f32 %v1704_v12, %v5265_v58 }
 0x214   :  { %v1793_v22 = vpop.f32.mrf.mxu3  ;;  %v1885_v45 = vpop.f32.mrf.mxu0 }
 0x215   :  { %v1794_v32 = vadd.f32 %v1793_v22, %v1705_v16  ;;  %v5299_v57 = vpop.f32.mrf.mxu1  ;;  %v750_v16 = vadd.f32 %v5052_v34, %v6529_v41 }
 0x216   :  { %6526 = vst [vmem:[#allocation31_spill] sm:$0xff] %v5299_v57 }
 0x217   :  { %v1883_v56 = vadd.f32 %v1882_v17, %v1794_v32  ;;  %1746 = vmatmul.bf16.gmra.mxu2 %v5301_v48  ;;  %1924 = vmatmul.bf16.gmra.mxu0 %v5046_v20  ;;  %v3882_v17 = vld [vmem:[%s6381_s5 + $0xa0] sm:$0xf0]  ;;  %v1029_v20 = vadd.f32 %v4940_v10, %v841_v53  ;;  %v1025_v34 = vadd.f32 %v4931_v30, %v750_v16 }
 0x218   :  { %2013 = vmatmul.bf16.gmra.mxu1 %v5301_v48  ;;  %v3518_v55 = vor.u32 %v3882_v17, %v3517_v26  ;;  %v1028_v17 = vadd.f32 %v4931_v30, %v752_v43 }
 0x219   :  { %1835 = vmatmul.bf16.gmra.mxu3 %v5303_v60  ;;  %v2497_v14 = vmax.f32 %v1883_v56, 0.0  ;;  %v3614_v56 = vor.u32 %v3906_v25, %v3613_v49  ;;  %v1125_v49 = vmax.f32 %v1029_v20, 0.0  ;;  %v1121_v41 = vmax.f32 %v1025_v34, 0.0  ;;  %v6532_v20 = vld [vmem:[#allocation19_spill] sm:$0xff]  ;;  %v6533_v34 = vld [vmem:[#allocation20_spill] sm:$0xff] }
 0x21a   :  { %v1707_v12 = vpop.f32.mrf.mxu2  ;;  %2228 = vmatpush.bf16.msrb.mxu0 %v3518_v55 }
 0x21b   :  { %v5327_v22 = vpack.c.bf16 %v2497_v14, %v2494_v8  ;;  %v1708_v0 = vadd.f32 %v1707_v12, %v5265_v58  ;;  %2317 = vmatpush.bf16.msrb.mxu1 %v3614_v56  ;;  %v1026_v14 = vadd.f32 %v4940_v10, %v839_v1  ;;  %v1124_v12 = vmax.f32 %v1028_v17, 0.0 }
 0x21c   :  { %v1796_v32 = vpop.f32.mrf.mxu3  ;;  %v1887_v26 = vpop.f32.mrf.mxu0 }
 0x21d   :  { %6530 = vst [vmem:[#allocation58_spill] sm:$0xff] %v5327_v22  ;;  %v1797_v42 = vadd.f32 %v1796_v32, %v1708_v0  ;;  %v5333_v57 = vpop.f32.mrf.mxu1  ;;  %v1122_v39 = vmax.f32 %v1026_v14, 0.0  ;;  %v5341_v56 = vpack.c.bf16 %v1124_v12, %v1121_v41  ;;  %v846_v14 = vadd.f32 %v5086_v59, %v6533_v34 }
 0x21f   :  { %v1886_v8 = vadd.f32 %v1885_v45, %v1797_v42  ;;  %v5343_v53 = vpack.c.bf16 %v1125_v49, %v1122_v39  ;;  %v757_v45 = vadd.f32 %v5093_v3, %v6532_v20  ;;  %v3889_v42 = vld [vmem:[%s6381_s5 + $0xdc] sm:$0xf]  ;;  %v1035_v59 = vadd.f32 %v4940_v10, %v846_v14 }
 0x221   :  { %v2500_v1 = vmax.f32 %v1886_v8, 0.0 }
 0x222   :  { %v1709_v25 = vpop.f32.mrf.mxu2 }
 0x223   :  { %v1710_v54 = vadd.f32 %v1709_v25, %v5265_v58  ;;  %v6534_v25 = vld [vmem:[#allocation17_spill] sm:$0xff] }
 0x224   :  { %v1798_v55 = vpop.f32.mrf.mxu3  ;;  %v1890_v43 = vpop.f32.mrf.mxu0  ;;  %v755_v41 = vadd.f32 %v5084_v36, %v6534_v25 }
 0x225   :  { %v1799_v0 = vadd.f32 %v1798_v55, %v1710_v54  ;;  %v5339_v32 = vpop.f32.mrf.mxu1  ;;  %v6536_v55 = vld [vmem:[#allocation18_spill] sm:$0xff] }
 0x226   :  { %v844_v39 = vadd.f32 %v5063_v19, %v6536_v55  ;;  %v3691_v19 = vld [vmem:[%s6381_s5 + $0x204] sm:$0xf0] }
 0x227   :  { %v1888_v16 = vadd.f32 %v1887_v26, %v1799_v0  ;;  %1751 = vmatmul.bf16.gmra.mxu2 %v5341_v56  ;;  %1929 = vmatmul.bf16.gmra.mxu0 %v5078_v35  ;;  %v3547_v26 = vld [vmem:[%s6381_s5 + $0xe4] sm:$0xf0] }
 0x228   :  { %2018 = vmatmul.bf16.gmra.mxu1 %v5341_v56  ;;  %v3550_v49 = vor.u32 %v3889_v42, %v3547_v26  ;;  %v1031_v42 = vadd.f32 %v4931_v30, %v755_v41  ;;  %v1032_v26 = vadd.f32 %v4940_v10, %v844_v39 }
 0x229   :  { %1840 = vmatmul.bf16.gmra.mxu3 %v5343_v53  ;;  %v2503_v17 = vmax.f32 %v1888_v16, 0.0  ;;  %v1034_v16 = vadd.f32 %v4931_v30, %v757_v45  ;;  %v1131_v45 = vmax.f32 %v1035_v59, 0.0 }
 0x22a   :  { %v1712_v12 = vpop.f32.mrf.mxu2  ;;  %2055 = vmatpush.bf16.msrb.mxu2 %v3550_v49  ;;  %v1127_v49 = vmax.f32 %v1031_v42, 0.0  ;;  %v1128_v41 = vmax.f32 %v1032_v26, 0.0 }
 0x22b   :  { %v1713_v3 = vadd.f32 %v1712_v12, %v5265_v58  ;;  %v5362_v54 = vpack.c.bf16 %v2503_v17, %v2500_v1  ;;  %v1130_v34 = vmax.f32 %v1034_v16, 0.0  ;;  %v3925_v1 = vld [vmem:[%s6381_s5 + $0x1fc] sm:$0xf] }
 0x22c   :  { %v1801_v8 = vpop.f32.mrf.mxu3  ;;  %v1892_v0 = vpop.f32.mrf.mxu0  ;;  %v3694_v12 = vor.u32 %v3925_v1, %v3691_v19  ;;  %v5383_v39 = vpack.c.bf16 %v1131_v45, %v1128_v41  ;;  %v6538_v1 = vld [vmem:[#allocation25_spill] sm:$0xff] }
 0x22d   :  { %6535 = vst [vmem:[#allocation34_spill] sm:$0xff] %v5362_v54  ;;  %v1802_v20 = vadd.f32 %v1801_v8, %v1713_v3  ;;  %v5367_v22 = vpop.f32.mrf.mxu1  ;;  %v5381_v55 = vpack.c.bf16 %v1130_v34, %v1127_v49  ;;  %v3505_v34 = vld [vmem:[%s6381_s5 + $0x80] sm:$0xf]  ;;  %v851_v19 = vadd.f32 %v5124_v52, %v6538_v1  ;;  %v6541_v52 = vld [vmem:[#allocation22_spill] sm:$0xff] }
 0x22e   :  { %2140 = vmatpush.bf16.msrb.mxu3 %v3694_v12  ;;  %v3601_v12 = vld [vmem:[%s6381_s5 + $0x140] sm:$0xf] }
 0x22f   :  { %v1891_v36 = vadd.f32 %v1890_v43, %v1802_v20  ;;  %v6537_v20 = vld [vmem:[#allocation24_spill] sm:$0xff]  ;;  %v1041_v54 = vadd.f32 %v4940_v10, %v851_v19 }
 0x230   :  { %v762_v59 = vadd.f32 %v5131_v29, %v6537_v20  ;;  %v3903_v29 = vld [vmem:[%s6381_s5 + $0x148] sm:$0xf0] }
 0x231   :  { %v2506_v42 = vmax.f32 %v1891_v36, 0.0  ;;  %v6539_v36 = vld [vmem:[#allocation21_spill] sm:$0xff]  ;;  %v3602_v41 = vor.u32 %v3903_v29, %v3601_v12 }
 0x232   :  { %v1714_v17 = vpop.f32.mrf.mxu2  ;;  %v760_v49 = vadd.f32 %v5122_v21, %v6539_v36 }
 0x233   :  { %v1715_v14 = vadd.f32 %v1714_v17, %v5265_v58  ;;  %2318 = vmatpush.bf16.msrb.mxu1 %v3602_v41 }
 0x234   :  { %v1803_v25 = vpop.f32.mrf.mxu3  ;;  %v1895_v43 = vpop.f32.mrf.mxu0  ;;  %v1037_v21 = vadd.f32 %v4931_v30, %v760_v49 }
 0x235   :  { %v1804_v3 = vadd.f32 %v1803_v25, %v1715_v14  ;;  %v5379_v8 = vpop.f32.mrf.mxu1 }
 0x236   :  { %v1133_v36 = vmax.f32 %v1037_v21, 0.0 }
 0x237   :  { %v1893_v16 = vadd.f32 %v1892_v0, %v1804_v3  ;;  %1756 = vmatmul.bf16.gmra.mxu2 %v5381_v55  ;;  %1934 = vmatmul.bf16.gmra.mxu0 %v5116_v40  ;;  %v3879_v0 = vld [vmem:[%s6381_s5 + $0x88] sm:$0xf0] }
 0x238   :  { %2023 = vmatmul.bf16.gmra.mxu1 %v5381_v55  ;;  %v3506_v17 = vor.u32 %v3879_v0, %v3505_v34  ;;  %v1040_v34 = vadd.f32 %v4931_v30, %v762_v59 }
 0x239   :  { %1845 = vmatmul.bf16.gmra.mxu3 %v5383_v39  ;;  %v2509_v26 = vmax.f32 %v1893_v16, 0.0  ;;  %v849_v16 = vadd.f32 %v5095_v61, %v6541_v52 }
 0x23a   :  { %v1717_v45 = vpop.f32.mrf.mxu2  ;;  %2229 = vmatpush.bf16.msrb.mxu0 %v3506_v17 }
 0x23b   :  { %v1718_v14 = vadd.f32 %v1717_v45, %v5265_v58  ;;  %v5408_v3 = vpack.c.bf16 %v2509_v26, %v2506_v42  ;;  %v1038_v12 = vadd.f32 %v4940_v10, %v849_v16  ;;  %v1136_v42 = vmax.f32 %v1040_v34, 0.0  ;;  %v6543_v16 = vld [vmem:[#allocation32_spill] sm:$0xff] }
 0x23c   :  { %v1806_v25 = vpop.f32.mrf.mxu3  ;;  %v1897_v20 = vpop.f32.mrf.mxu0  ;;  %v1137_v26 = vmax.f32 %v1041_v54, 0.0  ;;  %v6542_v54 = vld [vmem:[#allocation33_spill] sm:$0xff]  ;;  %v767_v34 = vadd.f32 %v5163_v23, %v6543_v16 }
 0x23d   :  { %6540 = vst [vmem:[#allocation38_spill] sm:$0xff] %v5408_v3  ;;  %v1807_v0 = vadd.f32 %v1806_v25, %v1718_v14  ;;  %v5413_v1 = vpop.f32.mrf.mxu1  ;;  %v1134_v52 = vmax.f32 %v1038_v12, 0.0  ;;  %v5421_v41 = vpack.c.bf16 %v1136_v42, %v1133_v36  ;;  %v3535_v12 = vld [vmem:[%s6381_s5 + $0xcc] sm:$0xf0]  ;;  %v6546_v23 = vld [vmem:[#allocation29_spill] sm:$0xff] }
 0x23f   :  { %v1896_v45 = vadd.f32 %v1895_v43, %v1807_v0  ;;  %v5423_v19 = vpack.c.bf16 %v1137_v26, %v1134_v52  ;;  %v856_v43 = vadd.f32 %v5156_v63, %v6542_v54 }
 0x241   :  { %v2512_v0 = vmax.f32 %v1896_v45, 0.0  ;;  %v854_v45 = vadd.f32 %v5133_v15, %v6546_v23  ;;  %v3922_v15 = vld [vmem:[%s6381_s5 + $0x1e4] sm:$0xf] }
 0x242   :  { %v1719_v29 = vpop.f32.mrf.mxu2 }
 0x243   :  { %v1720_v61 = vadd.f32 %v1719_v29, %v5265_v58  ;;  %v6544_v29 = vld [vmem:[#allocation28_spill] sm:$0xff] }
 0x244   :  { %v1808_v17 = vpop.f32.mrf.mxu3  ;;  %v1900_v59 = vpop.f32.mrf.mxu0  ;;  %v765_v36 = vadd.f32 %v5154_v7, %v6544_v29  ;;  %v3589_v29 = vld [vmem:[%s6381_s5 + $0x128] sm:$0xf] }
 0x245   :  { %v1809_v14 = vadd.f32 %v1808_v17, %v1720_v61  ;;  %v5419_v25 = vpop.f32.mrf.mxu1 }
 0x247   :  { %v1898_v49 = vadd.f32 %v1897_v20, %v1809_v14  ;;  %1761 = vmatmul.bf16.gmra.mxu2 %v5421_v41  ;;  %1939 = vmatmul.bf16.gmra.mxu0 %v5148_v5  ;;  %v3886_v20 = vld [vmem:[%s6381_s5 + $0xc4] sm:$0xf]  ;;  %v1047_v14 = vadd.f32 %v4940_v10, %v856_v43  ;;  %v3679_v43 = vld [vmem:[%s6381_s5 + $0x1ec] sm:$0xf0] }
 0x248   :  { %2028 = vmatmul.bf16.gmra.mxu1 %v5421_v41  ;;  %v3538_v26 = vor.u32 %v3886_v20, %v3535_v12  ;;  %v1043_v20 = vadd.f32 %v4931_v30, %v765_v36  ;;  %v1044_v12 = vadd.f32 %v4940_v10, %v854_v45  ;;  %v3900_v45 = vld [vmem:[%s6381_s5 + $0x130] sm:$0xf0] }
 0x249   :  { %1850 = vmatmul.bf16.gmra.mxu3 %v5423_v19  ;;  %v2515_v21 = vmax.f32 %v1898_v49, 0.0  ;;  %v1046_v49 = vadd.f32 %v4931_v30, %v767_v34  ;;  %v3682_v34 = vor.u32 %v3922_v15, %v3679_v43 }
 0x24a   :  { %v1722_v42 = vpop.f32.mrf.mxu2  ;;  %2056 = vmatpush.bf16.msrb.mxu2 %v3538_v26  ;;  %v3493_v26 = vld [vmem:[%s6381_s5 + $0x68] sm:$0xf]  ;;  %v1139_v36 = vmax.f32 %v1043_v20, 0.0  ;;  %v3919_v20 = vld [vmem:[%s6381_s5 + $0x1cc] sm:$0xf] }
 0x24b   :  { %v1723_v63 = vadd.f32 %v1722_v42, %v5265_v58  ;;  %v5442_v17 = vpack.c.bf16 %v2515_v21, %v2512_v0  ;;  %v1143_v42 = vmax.f32 %v1047_v14, 0.0  ;;  %v1142_v0 = vmax.f32 %v1046_v49, 0.0  ;;  %2141 = vmatpush.bf16.msrb.mxu3 %v3682_v34 }
 0x24c   :  { %v1811_v61 = vpop.f32.mrf.mxu3  ;;  %v1902_v52 = vpop.f32.mrf.mxu0  ;;  %v1140_v14 = vmax.f32 %v1044_v12, 0.0  ;;  %v3667_v12 = vld [vmem:[%s6381_s5 + $0x1d4] sm:$0xf0] }
 0x24d   :  { %6545 = vst [vmem:[#allocation35_spill] sm:$0xff] %v5442_v17  ;;  %v1812_v54 = vadd.f32 %v1811_v61, %v1723_v63  ;;  %v5448_v16 = vpop.f32.mrf.mxu1  ;;  %v5473_v17 = vpack.c.bf16 %v1142_v0, %v1139_v36  ;;  %v3873_v0 = vld [vmem:[%s6381_s5 + $0x58] sm:$0xf0] }
 0x24e   :  { %v5475_v3 = vpack.c.bf16 %v1143_v42, %v1140_v14  ;;  %v3670_v42 = vor.u32 %v3919_v20, %v3667_v12  ;;  %v3655_v12 = vld [vmem:[%s6381_s5 + $0x1bc] sm:$0xf0] }
 0x24f   :  { %v1901_v7 = vadd.f32 %v1900_v59, %v1812_v54  ;;  %v3876_v59 = vld [vmem:[%s6381_s5 + $0x70] sm:$0xf0]  ;;  %v3590_v54 = vor.u32 %v3900_v45, %v3589_v29  ;;  %v6548_v29 = vld [vmem:[#allocation36_spill] sm:$0xff] }
 0x250   :  { %v3494_v23 = vor.u32 %v3876_v59, %v3493_v26  ;;  %v3577_v26 = vld [vmem:[%s6381_s5 + $0x110] sm:$0xf]  ;;  %v3897_v59 = vld [vmem:[%s6381_s5 + $0x118] sm:$0xf0]  ;;  %2142 = vmatpush.bf16.msrb.mxu3 %v3670_v42  ;;  %v3565_v42 = vld [vmem:[%s6381_s5 + $0xf8] sm:$0xf] }
 0x251   :  { %2319 = vmatpush.bf16.msrb.mxu1 %v3590_v54  ;;  %v6550_v45 = vld [vmem:[#allocation40_spill] sm:$0xff]  ;;  %v2518_v54 = vmax.f32 %v1901_v7, 0.0 }
 0x252   :  { %v1724_v21 = vpop.f32.mrf.mxu2  ;;  %2230 = vmatpush.bf16.msrb.mxu0 %v3494_v23  ;;  %v772_v14 = vadd.f32 %v5207_v51, %v6550_v45 }
 0x253   :  { %v1725_v63 = vadd.f32 %v1724_v21, %v5265_v58  ;;  %v3481_v21 = vld [vmem:[%s6381_s5 + $0x50] sm:$0xf] }
 0x254   :  { %v1813_v61 = vpop.f32.mrf.mxu3  ;;  %v1905_v49 = vpop.f32.mrf.mxu0  ;;  %v3482_v36 = vor.u32 %v3873_v0, %v3481_v21  ;;  %v3894_v0 = vld [vmem:[%s6381_s5 + $0x100] sm:$0xf0] }
 0x255   :  { %v1814_v15 = vadd.f32 %v1813_v61, %v1725_v63  ;;  %v5471_v43 = vpop.f32.mrf.mxu1  ;;  %v3578_v63 = vor.u32 %v3897_v59, %v3577_v26  ;;  %v6549_v61 = vld [vmem:[#allocation41_spill] sm:$0xff] }
 0x256   :  { %6547 = vst [vmem:[#allocation39_spill] sm:$0xff] %v5471_v43  ;;  %v861_v23 = vadd.f32 %v5194_v38, %v6549_v61  ;;  %2231 = vmatpush.bf16.msrb.mxu0 %v3482_v36  ;;  %v3469_v38 = vld [vmem:[%s6381_s5 + $0x38] sm:$0xf]  ;;  %v6552_v59 = vld [vmem:[#allocation37_spill] sm:$0xff]  ;;  %v3566_v61 = vor.u32 %v3894_v0, %v3565_v42 }
 0x257   :  { %v1903_v34 = vadd.f32 %v1902_v52, %v1814_v15  ;;  %1766 = vmatmul.bf16.gmra.mxu2 %v5473_v17  ;;  %1944 = vmatmul.bf16.gmra.mxu0 %v5186_v2  ;;  %v770_v52 = vadd.f32 %v5192_v37, %v6548_v29  ;;  %v3916_v37 = vld [vmem:[%s6381_s5 + $0x1b4] sm:$0xf]  ;;  %v859_v29 = vadd.f32 %v5165_v13, %v6552_v59  ;;  %v3643_v13 = vld [vmem:[%s6381_s5 + $0x1a4] sm:$0xf0] }
 0x258   :  { %2033 = vmatmul.bf16.gmra.mxu1 %v5473_v17  ;;  %v3658_v21 = vor.u32 %v3916_v37, %v3655_v12  ;;  %v1052_v37 = vadd.f32 %v4931_v30, %v772_v14 }
 0x259   :  { %1855 = vmatmul.bf16.gmra.mxu3 %v5475_v3  ;;  %v2521_v15 = vmax.f32 %v1903_v34, 0.0  ;;  %2320 = vmatpush.bf16.msrb.mxu1 %v3578_v63  ;;  %v3870_v34 = vld [vmem:[%s6381_s5 + $0x40] sm:$0xf0]  ;;  %v1049_v45 = vadd.f32 %v4931_v30, %v770_v52  ;;  %v3457_v52 = vld [vmem:[%s6381_s5 + $0x20] sm:$0xf] }
 0x25a   :  { %v1727_v20 = vpop.f32.mrf.mxu2  ;;  %v3470_v63 = vor.u32 %v3870_v34, %v3469_v38  ;;  %2143 = vmatpush.bf16.msrb.mxu3 %v3658_v21  ;;  %v3553_v38 = vld [vmem:[%s6381_s5 + $0xe0] sm:$0xf] }
 0x25b   :  { %v1728_v51 = vadd.f32 %v1727_v20, %v5265_v58  ;;  %v5524_v26 = vpack.c.bf16 %v2521_v15, %v2518_v54  ;;  %v1053_v20 = vadd.f32 %v4940_v10, %v861_v23  ;;  %v3913_v54 = vld [vmem:[%s6381_s5 + $0x19c] sm:$0xf]  ;;  %v3867_v15 = vld [vmem:[%s6381_s5 + $0x28] sm:$0xf0]  ;;  %v1145_v42 = vmax.f32 %v1049_v45, 0.0 }
 0x25c   :  { %v1816_v7 = vpop.f32.mrf.mxu3  ;;  %v1907_v36 = vpop.f32.mrf.mxu0  ;;  %2232 = vmatpush.bf16.msrb.mxu0 %v3470_v63  ;;  %v3646_v14 = vor.u32 %v3913_v54, %v3643_v13  ;;  %v3458_v21 = vor.u32 %v3867_v15, %v3457_v52  ;;  %v3910_v63 = vld [vmem:[%s6381_s5 + $0x184] sm:$0xf]  ;;  %v3541_v54 = vld [vmem:[%s6381_s5 + $0xc8] sm:$0xf]  ;;  %v3888_v13 = vld [vmem:[%s6381_s5 + $0xd0] sm:$0xf0] }
 0x25d   :  { %6551 = vst [vmem:[#allocation60_spill] sm:$0xff] %v5524_v26  ;;  %v1817_v12 = vadd.f32 %v1816_v7, %v1728_v51  ;;  %v5531_v43 = vpop.f32.mrf.mxu1  ;;  %2321 = vmatpush.bf16.msrb.mxu1 %v3566_v61  ;;  %v3891_v51 = vld [vmem:[%s6381_s5 + $0xe8] sm:$0xf0]  ;;  %v1050_v7 = vadd.f32 %v4940_v10, %v859_v29  ;;  %v1149_v0 = vmax.f32 %v1053_v20, 0.0  ;;  %v3631_v61 = vld [vmem:[%s6381_s5 + $0x18c] sm:$0xf0] }
 0x25e   :  { %v3554_v34 = vor.u32 %v3891_v51, %v3553_v38  ;;  %2144 = vmatpush.bf16.msrb.mxu3 %v3646_v14  ;;  %v3445_v29 = vld [vmem:[%s6381_s5 + $0x8] sm:$0xf]  ;;  %v3542_v38 = vor.u32 %v3888_v13, %v3541_v54 }
 0x25f   :  { %v1906_v23 = vadd.f32 %v1905_v49, %v1817_v12  ;;  %v1148_v49 = vmax.f32 %v1052_v37, 0.0  ;;  %v3634_v37 = vor.u32 %v3910_v63, %v3631_v61  ;;  %v3864_v12 = vld [vmem:[%s6381_s5 + $0x10] sm:$0xf0]  ;;  %v1146_v52 = vmax.f32 %v1050_v7, 0.0  ;;  %v6553_v7 = vld [vmem:[#allocation48_spill] sm:$0xff] }
 0x260   :  { %2233 = vmatpush.bf16.msrb.mxu0 %v3458_v21  ;;  %v3446_v15 = vor.u32 %v3864_v12, %v3445_v29  ;;  %v777_v61 = vadd.f32 %v5251_v24, %v6553_v7  ;;  %v6555_v12 = vld [vmem:[#allocation44_spill] sm:$0xff] }
 0x261   :  { %2322 = vmatpush.bf16.msrb.mxu1 %v3554_v34  ;;  %v5573_v34 = vpack.c.bf16 %v1148_v49, %v1145_v42  ;;  %v2524_v29 = vmax.f32 %v1906_v23, 0.0  ;;  %v6554_v49 = vld [vmem:[#allocation49_spill] sm:$0xff]  ;;  %v775_v54 = vadd.f32 %v5228_v46, %v6555_v12 }
 0x262   :  { %v1729_v59 = vpop.f32.mrf.mxu2  ;;  %2145 = vmatpush.bf16.msrb.mxu3 %v3634_v37 }
 0x263   :  { %v1730_v45 = vadd.f32 %v1729_v59, %v5265_v58  ;;  %v5575_v59 = vpack.c.bf16 %v1149_v0, %v1146_v52  ;;  %v3721_v0 = vld [vmem:[%s6381_s5 + $0x230] sm:$0xf]  ;;  %v6557_v52 = vld [vmem:[#allocation45_spill] sm:$0xff] }
 0x264   :  { %v1818_v20 = vpop.f32.mrf.mxu3  ;;  %v1910_v14 = vpop.f32.mrf.mxu0  ;;  %2234 = vmatpush.bf16.msrb.mxu0 %v3446_v15  ;;  %v864_v15 = vadd.f32 %v5209_v11, %v6557_v52 }
 0x265   :  { %v1819_v51 = vadd.f32 %v1818_v20, %v1730_v45  ;;  %v5571_v21 = vpop.f32.mrf.mxu1  ;;  %2323 = vmatpush.bf16.msrb.mxu1 %v3542_v38  ;;  %v866_v45 = vadd.f32 %v5241_v62, %v6554_v49 }
 0x267   :  { %v1908_v63 = vadd.f32 %v1907_v36, %v1819_v51  ;;  %1771 = vmatmul.bf16.gmra.mxu2 %v5573_v34  ;;  %1949 = vmatmul.bf16.gmra.mxu0 %v5222_v28  ;;  %v3933_v36 = vld [vmem:[%s6381_s5 + $0x238] sm:$0xf0]  ;;  %v1058_v51 = vadd.f32 %v4931_v30, %v777_v61  ;;  %v1059_v62 = vadd.f32 %v4940_v10, %v866_v45 }
 0x268   :  { %2038 = vmatmul.bf16.gmra.mxu1 %v5573_v34  ;;  %v3722_v37 = vor.u32 %v3933_v36, %v3721_v0  ;;  %v1055_v0 = vadd.f32 %v4931_v30, %v775_v54  ;;  %v1056_v36 = vadd.f32 %v4940_v10, %v864_v15 }
 0x269   :  { %1860 = vmatmul.bf16.gmra.mxu3 %v5575_v59  ;;  %v2527_v42 = vmax.f32 %v1908_v63, 0.0  ;;  %v1154_v49 = vmax.f32 %v1058_v51, 0.0 }
 0x26a   :  { %v1732_v20 = vpop.f32.mrf.mxu2  ;;  %2405 = vmatpush.bf16.msra.mxu2 %v3722_v37  ;;  %v1152_v37 = vmax.f32 %v1056_v36, 0.0 }
 0x26b   :  { %v1733_v24 = vadd.f32 %v1732_v20, %v5265_v58  ;;  %v5594_v13 = vpack.c.bf16 %v2527_v42, %v2524_v29  ;;  %v1155_v29 = vmax.f32 %v1059_v62, 0.0  ;;  %v1151_v20 = vmax.f32 %v1055_v0, 0.0 }
 0x26c   :  { %v1821_v23 = vpop.f32.mrf.mxu3  ;;  %v1912_v38 = vpop.f32.mrf.mxu0 }
 0x26d   :  { %6556 = vst [vmem:[#allocation42_spill] sm:$0xff] %v5594_v13  ;;  %v1822_v63 = vadd.f32 %v1821_v23, %v1733_v24  ;;  %v5599_v7 = vpop.f32.mrf.mxu1  ;;  %v5607_v23 = vpack.c.bf16 %v1154_v49, %v1151_v20  ;;  %v5609_v45 = vpack.c.bf16 %v1155_v29, %v1152_v37 }
 0x26f   :  { %v1911_v46 = vadd.f32 %v1910_v14, %v1822_v63 }
 0x271   :  { %v2530_v10 = vmax.f32 %v1911_v46, 0.0 }
 0x272   :  { %v1734_v42 = vpop.f32.mrf.mxu2 }
 0x273   :  { %v1735_v11 = vadd.f32 %v1734_v42, %v5265_v58 }
 0x274   :  { %v1823_v12 = vpop.f32.mrf.mxu3  ;;  %v1915_v52 = vpop.f32.mrf.mxu0 }
 0x275   :  { %v1824_v61 = vadd.f32 %v1823_v12, %v1735_v11  ;;  %v5605_v24 = vpop.f32.mrf.mxu1 }
 0x277   :  { %v1913_v30 = vadd.f32 %v1912_v38, %v1824_v61  ;;  %1776 = vmatmul.bf16.gmra.mxu2 %v5607_v23  ;;  %1954 = vmatmul.bf16.gmra.mxu0 %v5277_v9 }
 0x278   :  { %2043 = vmatmul.bf16.gmra.mxu1 %v5607_v23 }
 0x279   :  { %1865 = vmatmul.bf16.gmra.mxu3 %v5609_v45  ;;  %v2533_v14 = vmax.f32 %v1913_v30, 0.0  ;;  %v3930_v30 = vld [vmem:[%s6381_s5 + $0x220] sm:$0xf0] }
 0x27a   :  { %v1737_v54 = vpop.f32.mrf.mxu2 }
 0x27b   :  { %v1738_v15 = vadd.f32 %v1737_v54, %v5265_v58  ;;  %v5616_v63 = vpack.c.bf16 %v2533_v14, %v2530_v10 }
 0x27c   :  { %v1826_v51 = vpop.f32.mrf.mxu3  ;;  %v1917_v62 = vpop.f32.mrf.mxu0 }
 0x27d   :  { %6558 = vst [vmem:[#allocation63_spill] sm:$0xff] %v5616_v63  ;;  %v1827_v0 = vadd.f32 %v1826_v51, %v1738_v15  ;;  %v5618_v36 = vpop.f32.mrf.mxu1 }
 0x27f   :  { %v1916_v38 = vadd.f32 %v1915_v52, %v1827_v0  ;;  %v3709_v52 = vld [vmem:[%s6381_s5 + $0x218] sm:$0xf] }
 0x280   :  { %v3710_v14 = vor.u32 %v3930_v30, %v3709_v52  ;;  %v6560_v30 = vld [vmem:[#allocation66_spill] sm:$0xff] }
 0x281   :  { %v2536_v37 = vmax.f32 %v1916_v38, 0.0 }
 0x282   :  { %v1739_v49 = vpop.f32.mrf.mxu2  ;;  %2406 = vmatpush.bf16.msra.mxu2 %v3710_v14 }
 0x283   :  { %v1740_v29 = vadd.f32 %v1739_v49, %v5265_v58 }
 0x284   :  { %v1828_v42 = vpop.f32.mrf.mxu3  ;;  %v1920_v20 = vpop.f32.mrf.mxu0 }
 0x285   :  { %v1829_v11 = vadd.f32 %v1828_v42, %v1740_v29  ;;  %v5621_v12 = vpop.f32.mrf.mxu1 }
 0x287   :  { %v1918_v46 = vadd.f32 %v1917_v62, %v1829_v11  ;;  %2057 = vmatmul.bf16.vlgmr.msrb.gmra.mxu2 %v4960_v18  ;;  %2235 = vmatmul.bf16.vlgmr.msrb.gmra.mxu0 %v4957_v31 }
 0x288   :  { %2324 = vmatmul.bf16.vlgmr.msrb.gmra.mxu1 %v4960_v18 }
 0x289   :  { %2146 = vmatmul.bf16.vlgmr.msrb.gmra.mxu3 %v4670_v44  ;;  %v2539_v61 = vmax.f32 %v1918_v46, 0.0 }
 0x28a   :  { %v1742_v10 = vpop.f32.mrf.mxu2 }
 0x28b   :  { %v1743_v54 = vadd.f32 %v1742_v10, %v5265_v58  ;;  %v5634_v31 = vpack.c.bf16 %v2539_v61, %v2536_v37  ;;  %v6561_v37 = vld [vmem:[#allocation50_spill] sm:$0xff] }
 0x28c   :  { %v1831_v15 = vpop.f32.mrf.mxu3  ;;  %v1922_v51 = vpop.f32.mrf.mxu0 }
 0x28d   :  { %6559 = vst [vmem:[#allocation46_spill] sm:$0xff] %v5634_v31  ;;  %v1832_v18 = vadd.f32 %v1831_v15, %v1743_v54  ;;  %v5636_v62 = vpop.f32.mrf.mxu1 }
 0x28f   :  { %v1921_v0 = vadd.f32 %v1920_v20, %v1832_v18 }
 0x291   :  { %v2542_v61 = vmax.f32 %v1921_v0, 0.0 }
 0x292   :  { %v1744_v38 = vpop.f32.mrf.mxu2 }
 0x293   :  { %v1745_v49 = vadd.f32 %v1744_v38, %v5265_v58 }
 0x294   :  { %v1833_v29 = vpop.f32.mrf.mxu3  ;;  %v1925_v42 = vpop.f32.mrf.mxu0 }
 0x295   :  { %v1834_v11 = vadd.f32 %v1833_v29, %v1745_v49  ;;  %v5639_v46 = vpop.f32.mrf.mxu1 }
 0x297   :  { %v1923_v52 = vadd.f32 %v1922_v51, %v1834_v11  ;;  %2062 = vmatmul.bf16.gmra.mxu2 %v4998_v33  ;;  %2240 = vmatmul.bf16.gmra.mxu0 %v6560_v30 }
 0x298   :  { %2329 = vmatmul.bf16.gmra.mxu1 %v4998_v33 }
 0x299   :  { %2151 = vmatmul.bf16.gmra.mxu3 %v6561_v37  ;;  %v2545_v10 = vmax.f32 %v1923_v52, 0.0  ;;  %v6564_v52 = vld [vmem:[#allocation68_spill] sm:$0xff] }
 0x29a   :  { %v1747_v20 = vpop.f32.mrf.mxu2 }
 0x29b   :  { %v1748_v14 = vadd.f32 %v1747_v20, %v5265_v58  ;;  %v5646_v15 = vpack.c.bf16 %v2545_v10, %v2542_v61  ;;  %v6565_v20 = vld [vmem:[#allocation67_spill] sm:$0xff] }
 0x29c   :  { %v1836_v54 = vpop.f32.mrf.mxu3  ;;  %v1927_v18 = vpop.f32.mrf.mxu0  ;;  %v6566_v61 = vld [vmem:[#allocation51_spill] sm:$0xff] }
 0x29d   :  { %6562 = vst [vmem:[#allocation43_spill] sm:$0xff] %v5646_v15  ;;  %v1837_v38 = vadd.f32 %v1836_v54, %v1748_v14  ;;  %v5648_v49 = vpop.f32.mrf.mxu1  ;;  %v3927_v54 = vld [vmem:[%s6381_s5 + $0x208] sm:$0xf0] }
 0x29f   :  { %v1926_v51 = vadd.f32 %v1925_v42, %v1837_v38  ;;  %v3697_v42 = vld [vmem:[%s6381_s5 + $0x200] sm:$0xf] }
 0x2a1   :  { %v2548_v10 = vmax.f32 %v1926_v51, 0.0 }
 0x2a2   :  { %v1749_v29 = vpop.f32.mrf.mxu2 }
 0x2a3   :  { %v1750_v11 = vadd.f32 %v1749_v29, %v5265_v58 }
 0x2a4   :  { %v1838_v30 = vpop.f32.mrf.mxu3  ;;  %v1930_v31 = vpop.f32.mrf.mxu0 }
 0x2a5   :  { %v1839_v63 = vadd.f32 %v1838_v30, %v1750_v11  ;;  %v5651_v33 = vpop.f32.mrf.mxu1 }
 0x2a6   :  { %6563 = vst [vmem:[#allocation61_spill] sm:$0xff] %v5651_v33 }
 0x2a7   :  { %v1928_v0 = vadd.f32 %v1927_v18, %v1839_v63  ;;  %2067 = vmatmul.bf16.gmra.mxu2 %v6564_v52  ;;  %2245 = vmatmul.bf16.gmra.mxu0 %v6565_v20  ;;  %v3698_v63 = vor.u32 %v3927_v54, %v3697_v42  ;;  %v6570_v54 = vld [vmem:[#allocation71_spill] sm:$0xff] }
 0x2a8   :  { %2334 = vmatmul.bf16.gmra.mxu1 %v6564_v52 }
 0x2a9   :  { %2156 = vmatmul.bf16.gmra.mxu3 %v6566_v61  ;;  %v2551_v14 = vmax.f32 %v1928_v0, 0.0  ;;  %2407 = vmatpush.bf16.msra.mxu2 %v3698_v63 }
 0x2aa   :  { %v1752_v38 = vpop.f32.mrf.mxu2 }
 0x2ab   :  { %v1753_v18 = vadd.f32 %v1752_v38, %v5265_v58  ;;  %v5664_v11 = vpack.c.bf16 %v2551_v14, %v2548_v10  ;;  %v6571_v38 = vld [vmem:[#allocation70_spill] sm:$0xff]  ;;  %v6572_v10 = vld [vmem:[#allocation53_spill] sm:$0xff] }
 0x2ac   :  { %v1841_v29 = vpop.f32.mrf.mxu3  ;;  %v1932_v30 = vpop.f32.mrf.mxu0 }
 0x2ad   :  { %6567 = vst [vmem:[#allocation47_spill] sm:$0xff] %v5664_v11  ;;  %v1842_v52 = vadd.f32 %v1841_v29, %v1753_v18  ;;  %v5666_v51 = vpop.f32.mrf.mxu1 }
 0x2ae   :  { %6568 = vst [vmem:[#allocation64_spill] sm:$0xff] %v5666_v51 }
 0x2af   :  { %v1931_v0 = vadd.f32 %v1930_v31, %v1842_v52 }
 0x2b1   :  { %v2554_v14 = vmax.f32 %v1931_v0, 0.0 }
 0x2b2   :  { %v1754_v20 = vpop.f32.mrf.mxu2 }
 0x2b3   :  { %v1755_v15 = vadd.f32 %v1754_v20, %v5265_v58 }
 0x2b4   :  { %v1843_v13 = vpop.f32.mrf.mxu3  ;;  %v1935_v26 = vpop.f32.mrf.mxu0 }
 0x2b5   :  { %v1844_v33 = vadd.f32 %v1843_v13, %v1755_v15  ;;  %v5669_v61 = vpop.f32.mrf.mxu1 }
 0x2b6   :  { %6569 = vst [vmem:[#allocation7_spill] sm:$0xff] %v5669_v61 }
 0x2b7   :  { %v1933_v42 = vadd.f32 %v1932_v30, %v1844_v33  ;;  %2072 = vmatmul.bf16.gmra.mxu2 %v6570_v54  ;;  %2250 = vmatmul.bf16.gmra.mxu0 %v6571_v38 }
 0x2b8   :  { %2339 = vmatmul.bf16.gmra.mxu1 %v6570_v54 }
 0x2b9   :  { %2161 = vmatmul.bf16.gmra.mxu3 %v6572_v10  ;;  %v2557_v63 = vmax.f32 %v1933_v42, 0.0  ;;  %v6576_v42 = vld [vmem:[#allocation23_spill] sm:$0xff] }
 0x2ba   :  { %v1757_v31 = vpop.f32.mrf.mxu2 }
 0x2bb   :  { %v1758_v18 = vadd.f32 %v1757_v31, %v5265_v58  ;;  %v5676_v52 = vpack.c.bf16 %v2557_v63, %v2554_v14  ;;  %v6577_v31 = vld [vmem:[#allocation52_spill] sm:$0xff] }
 0x2bc   :  { %v1846_v29 = vpop.f32.mrf.mxu3  ;;  %v1937_v13 = vpop.f32.mrf.mxu0  ;;  %v6578_v14 = vld [vmem:[#allocation56_spill] sm:$0xff] }
 0x2bd   :  { %6573 = vst [vmem:[#allocation8_spill] sm:$0xff] %v5676_v52  ;;  %v1847_v15 = vadd.f32 %v1846_v29, %v1758_v18  ;;  %v5678_v20 = vpop.f32.mrf.mxu1 }
 0x2be   :  { %6574 = vst [vmem:[#allocation5_spill] sm:$0xff] %v5678_v20 }
 0x2bf   :  { %v1936_v33 = vadd.f32 %v1935_v26, %v1847_v15  ;;  %v3685_v26 = vld [vmem:[%s6381_s5 + $0x1e8] sm:$0xf] }
 0x2c1   :  { %v2560_v63 = vmax.f32 %v1936_v33, 0.0 }
 0x2c2   :  { %v1759_v30 = vpop.f32.mrf.mxu2 }
 0x2c3   :  { %v1760_v38 = vadd.f32 %v1759_v30, %v5265_v58 }
 0x2c4   :  { %v1848_v11 = vpop.f32.mrf.mxu3  ;;  %v1940_v61 = vpop.f32.mrf.mxu0 }
 0x2c5   :  { %v1849_v10 = vadd.f32 %v1848_v11, %v1760_v38  ;;  %v5681_v54 = vpop.f32.mrf.mxu1  ;;  %v3924_v11 = vld [vmem:[%s6381_s5 + $0x1f0] sm:$0xf0] }
 0x2c6   :  { %6575 = vst [vmem:[#allocation6_spill] sm:$0xff] %v5681_v54 }
 0x2c7   :  { %v1938_v0 = vadd.f32 %v1937_v13, %v1849_v10  ;;  %2077 = vmatmul.bf16.gmra.mxu2 %v6576_v42  ;;  %2255 = vmatmul.bf16.gmra.mxu0 %v6577_v31  ;;  %v3686_v10 = vor.u32 %v3924_v11, %v3685_v26  ;;  %v6581_v11 = vld [vmem:[#allocation26_spill] sm:$0xff] }
 0x2c8   :  { %2344 = vmatmul.bf16.gmra.mxu1 %v6576_v42 }
 0x2c9   :  { %2166 = vmatmul.bf16.gmra.mxu3 %v6578_v14  ;;  %v2563_v18 = vmax.f32 %v1938_v0, 0.0  ;;  %2408 = vmatpush.bf16.msra.mxu2 %v3686_v10 }
 0x2ca   :  { %v1762_v29 = vpop.f32.mrf.mxu2 }
 0x2cb   :  { %v1763_v13 = vadd.f32 %v1762_v29, %v5265_v58  ;;  %v5694_v30 = vpack.c.bf16 %v2563_v18, %v2560_v63  ;;  %v6582_v29 = vld [vmem:[#allocation54_spill] sm:$0xff]  ;;  %v6583_v63 = vld [vmem:[#allocation59_spill] sm:$0xff] }
 0x2cc   :  { %v1851_v15 = vpop.f32.mrf.mxu3  ;;  %v1942_v38 = vpop.f32.mrf.mxu0 }
 0x2cd   :  { %6579 = vst [vmem:[#allocation11_spill] sm:$0xff] %v5694_v30  ;;  %v1852_v42 = vadd.f32 %v1851_v15, %v1763_v13  ;;  %v5696_v33 = vpop.f32.mrf.mxu1 }
 0x2cf   :  { %v1941_v0 = vadd.f32 %v1940_v61, %v1852_v42 }
 0x2d1   :  { %v2566_v18 = vmax.f32 %v1941_v0, 0.0 }
 0x2d2   :  { %v1764_v31 = vpop.f32.mrf.mxu2 }
 0x2d3   :  { %v1765_v52 = vadd.f32 %v1764_v31, %v5265_v58 }
 0x2d4   :  { %v1853_v54 = vpop.f32.mrf.mxu3  ;;  %v1945_v14 = vpop.f32.mrf.mxu0 }
 0x2d5   :  { %v1854_v20 = vadd.f32 %v1853_v54, %v1765_v52  ;;  %v5699_v51 = vpop.f32.mrf.mxu1 }
 0x2d6   :  { %6580 = vst [vmem:[#allocation12_spill] sm:$0xff] %v5699_v51 }
 0x2d7   :  { %v1943_v26 = vadd.f32 %v1942_v38, %v1854_v20  ;;  %2082 = vmatmul.bf16.gmra.mxu2 %v6581_v11  ;;  %2260 = vmatmul.bf16.gmra.mxu0 %v6582_v29 }
 0x2d8   :  { %2349 = vmatmul.bf16.gmra.mxu1 %v6581_v11 }
 0x2d9   :  { %2171 = vmatmul.bf16.gmra.mxu3 %v6583_v63  ;;  %v2569_v10 = vmax.f32 %v1943_v26, 0.0  ;;  %v6586_v26 = vld [vmem:[#allocation30_spill] sm:$0xff] }
 0x2da   :  { %v1767_v61 = vpop.f32.mrf.mxu2 }
 0x2db   :  { %v1768_v13 = vadd.f32 %v1767_v61, %v5265_v58  ;;  %v5706_v42 = vpack.c.bf16 %v2569_v10, %v2566_v18  ;;  %v6587_v61 = vld [vmem:[#allocation57_spill] sm:$0xff]  ;;  %v6588_v18 = vld [vmem:[#allocation62_spill] sm:$0xff] }
 0x2dc   :  { %v1856_v15 = vpop.f32.mrf.mxu3  ;;  %v1947_v52 = vpop.f32.mrf.mxu0 }
 0x2dd   :  { %6584 = vst [vmem:[#allocation9_spill] sm:$0xff] %v5706_v42  ;;  %v1857_v54 = vadd.f32 %v1856_v15, %v1768_v13  ;;  %v5708_v31 = vpop.f32.mrf.mxu1 }
 0x2df   :  { %v1946_v20 = vadd.f32 %v1945_v14, %v1857_v54  ;;  %v3673_v14 = vld [vmem:[%s6381_s5 + $0x1d0] sm:$0xf] }
 0x2e1   :  { %v2572_v10 = vmax.f32 %v1946_v20, 0.0 }
 0x2e2   :  { %v1769_v38 = vpop.f32.mrf.mxu2 }
 0x2e3   :  { %v1770_v29 = vadd.f32 %v1769_v38, %v5265_v58 }
 0x2e4   :  { %v1858_v30 = vpop.f32.mrf.mxu3  ;;  %v1950_v51 = vpop.f32.mrf.mxu0 }
 0x2e5   :  { %v1859_v63 = vadd.f32 %v1858_v30, %v1770_v29  ;;  %v5711_v11 = vpop.f32.mrf.mxu1  ;;  %v3921_v30 = vld [vmem:[%s6381_s5 + $0x1d8] sm:$0xf0] }
 0x2e6   :  { %6585 = vst [vmem:[#allocation10_spill] sm:$0xff] %v5711_v11 }
 0x2e7   :  { %v1948_v0 = vadd.f32 %v1947_v52, %v1859_v63  ;;  %2087 = vmatmul.bf16.gmra.mxu2 %v6586_v26  ;;  %2265 = vmatmul.bf16.gmra.mxu0 %v6587_v61  ;;  %v3674_v63 = vor.u32 %v3921_v30, %v3673_v14  ;;  %v3941_v61 = vld [vmem:[%s6383_s7 + $0x38] sm:$0xff] }
 0x2e8   :  { %2354 = vmatmul.bf16.gmra.mxu1 %v6586_v26  ;;  %2830 = vmatpush.bf16.msra.mxu3 %v3941_v61 }
 0x2e9   :  { %2176 = vmatmul.bf16.gmra.mxu3 %v6588_v18  ;;  %v2575_v13 = vmax.f32 %v1948_v0, 0.0  ;;  %2409 = vmatpush.bf16.msra.mxu2 %v3674_v63  ;;  %v6593_v63 = vld [vmem:[#allocation27_spill] sm:$0xff] }
 0x2ea   :  { %v1772_v15 = vpop.f32.mrf.mxu2 }
 0x2eb   :  { %v1773_v52 = vadd.f32 %v1772_v15, %v5265_v58  ;;  %v5724_v38 = vpack.c.bf16 %v2575_v13, %v2572_v10  ;;  %v6592_v13 = vld [vmem:[#allocation55_spill] sm:$0xff] }
 0x2ec   :  { %v1861_v54 = vpop.f32.mrf.mxu3  ;;  %v1952_v29 = vpop.f32.mrf.mxu0 }
 0x2ed   :  { %6589 = vst [vmem:[#allocation15_spill] sm:$0xff] %v5724_v38  ;;  %v1862_v26 = vadd.f32 %v1861_v54, %v1773_v52  ;;  %v5726_v20 = vpop.f32.mrf.mxu1  ;;  %v6594_v52 = vld [vmem:[#allocation65_spill] sm:$0xff] }
 0x2ee   :  { %6590 = vst [vmem:[#allocation16_spill] sm:$0xff] %v5726_v20 }
 0x2ef   :  { %v1951_v0 = vadd.f32 %v1950_v51, %v1862_v26 }
 0x2f1   :  { %v2578_v51 = vmax.f32 %v1951_v0, 0.0 }
 0x2f2   :  { %v1774_v42 = vpop.f32.mrf.mxu2 }
 0x2f3   :  { %v1775_v11 = vadd.f32 %v1774_v42, %v5265_v58  ;;  %v3949_v42 = vld [vmem:[%s6383_s7 + $0x78] sm:$0xff] }
 0x2f4   :  { %v1863_v14 = vpop.f32.mrf.mxu3  ;;  %v1955_v30 = vpop.f32.mrf.mxu0  ;;  %2919 = vmatpush.bf16.msra.mxu0 %v3949_v42 }
 0x2f5   :  { %v1864_v15 = vadd.f32 %v1863_v14, %v1775_v11  ;;  %v5732_v18 = vpop.f32.mrf.mxu1  ;;  %v3957_v11 = vld [vmem:[%s6383_s7 + $0xb8] sm:$0xff] }
 0x2f6   :  { %6591 = vst [vmem:[#allocation13_spill] sm:$0xff] %v5732_v18  ;;  %3008 = vmatpush.bf16.msra.mxu1 %v3957_v11 }
 0x2f7   :  { %v1953_v10 = vadd.f32 %v1952_v29, %v1864_v15  ;;  %2092 = vmatmul.bf16.gmra.mxu2 %v6592_v13  ;;  %2270 = vmatmul.bf16.gmra.mxu0 %v6593_v63  ;;  %v3964_v63 = vld [vmem:[%s6382_s6] sm:$0x7] }
 0x2f8   :  { %2359 = vmatmul.bf16.gmra.mxu1 %v6592_v13  ;;  %v5752_v38 = vperm.slane %v3964_v63, 2  ;;  %v5755_v42 = vperm.slane %v3964_v63, 1 }
 0x2f9   :  { %2181 = vmatmul.bf16.gmra.mxu3 %v6594_v52  ;;  %v2581_v54 = vmax.f32 %v1953_v10, 0.0 }
 0x2fa   :  { %v1777_v26 = vpop.f32.mrf.mxu2 }
 0x2fb   :  { %v1778_v29 = vadd.f32 %v1777_v26, %v5265_v58  ;;  %v5745_v14 = vpack.c.bf16 %v2581_v54, %v2578_v51 }
 0x2fc   :  { %v1866_v61 = vpop.f32.mrf.mxu3  ;;  %v1957_v15 = vpop.f32.mrf.mxu0 }
 0x2fd   :  { %6595 = vst [vmem:[#allocation14_spill] sm:$0xff] %v5745_v14  ;;  %v1867_v13 = vadd.f32 %v1866_v61, %v1778_v29  ;;  %v5747_v0 = vpop.f32.mrf.mxu1 }
 0x2ff   :  { %v1956_v10 = vadd.f32 %v1955_v30, %v1867_v13 }
 0x301   :  { %v2584_v30 = vmax.f32 %v1956_v10, 0.0  ;;  %v1972_v10 = vadd.f32 %v5287_v6, %v5755_v42  ;;  %v3948_v6 = vld [vmem:[%s6383_s7 + $0x70] sm:$0xff] }
 0x302   :  { %v1779_v18 = vpop.f32.mrf.mxu2  ;;  %2920 = vmatpush.bf16.msra.mxu0 %v3948_v6 }
 0x303   :  { %v1780_v52 = vadd.f32 %v1779_v18, %v5265_v58  ;;  %v3661_v58 = vld [vmem:[%s6381_s5 + $0x1b8] sm:$0xf]  ;;  %v3918_v18 = vld [vmem:[%s6381_s5 + $0x1c0] sm:$0xf0] }
 0x304   :  { %v1868_v26 = vpop.f32.mrf.mxu3  ;;  %v2236_v20 = vpop.f32.mrf.mxu0 }
 0x305   :  { %v1869_v51 = vadd.f32 %v1868_v26, %v1780_v52  ;;  %v2237_v54 = vadd.f32 %v2236_v20, %v5752_v38  ;;  %v2325_v11 = vpop.f32.mrf.mxu1  ;;  %v1970_v20 = vadd.f32 %v5254_v50, %v5755_v42  ;;  %v3940_v50 = vld [vmem:[%s6383_s7 + $0x30] sm:$0xff] }
 0x306   :  { %2831 = vmatpush.bf16.msra.mxu3 %v3940_v50 }
 0x307   :  { %v1958_v29 = vadd.f32 %v1957_v15, %v1869_v51  ;;  %v5758_v61 = vadd.f32 %v2325_v11, %v2237_v54  ;;  %2097 = vmatmul.bf16.gmra.mxu2 %v5261_v27  ;;  %2275 = vmatmul.bf16.gmra.mxu0 %v5256_v47  ;;  %v3662_v15 = vor.u32 %v3918_v18, %v3661_v58 }
 0x308   :  { %2364 = vmatmul.bf16.gmra.mxu1 %v5261_v27 }
 0x309   :  { %2186 = vmatmul.bf16.gmra.mxu3 %v5008_v4  ;;  %v2587_v52 = vmax.f32 %v1958_v29, 0.0  ;;  %2410 = vmatpush.bf16.msra.mxu2 %v3662_v15 }
 0x30a   :  { %v2058_v13 = vpop.f32.mrf.mxu2 }
 0x30b   :  { %v2059_v47 = vadd.f32 %v2058_v13, %v1970_v20  ;;  %v5772_v26 = vpack.c.bf16 %v2587_v52, %v2584_v30 }
 0x30c   :  { %v2147_v63 = vpop.f32.mrf.mxu3  ;;  %v2238_v27 = vpop.f32.mrf.mxu0 }
 0x30d   :  { %6596 = vst [vmem:[#allocation19_spill] sm:$0xff] %v5772_v26  ;;  %v2148_v51 = vadd.f32 %v2147_v63, %v2059_v47  ;;  %v2239_v54 = vadd.f32 %v2238_v27, %v5752_v38  ;;  %v2327_v11 = vpop.f32.mrf.mxu1  ;;  %v6598_v27 = vld [vmem:[#allocation69_spill] sm:$0xff] }
 0x30f   :  { %v5775_v14 = vadd.f32 %v2327_v11, %v2239_v54  ;;  %v2495_v13 = vmax.f32 %v2148_v51, 0.0  ;;  %v3956_v54 = vld [vmem:[%s6383_s7 + $0xb0] sm:$0xff] }
 0x310   :  { %v6599_v51 = vld [vmem:[#allocation31_spill] sm:$0xff]  ;;  %3009 = vmatpush.bf16.msra.mxu1 %v3956_v54 }
 0x311   :  { %v1975_v11 = vadd.f32 %v6599_v51, %v5755_v42 }
 0x312   :  { %v2060_v29 = vpop.f32.mrf.mxu2 }
 0x313   :  { %v2061_v58 = vadd.f32 %v2060_v29, %v1972_v10 }
 0x314   :  { %v2149_v18 = vpop.f32.mrf.mxu3  ;;  %v2241_v20 = vpop.f32.mrf.mxu0 }
 0x315   :  { %v2150_v30 = vadd.f32 %v2149_v18, %v2061_v58  ;;  %v2242_v52 = vadd.f32 %v2241_v20, %v5752_v38  ;;  %v2330_v15 = vpop.f32.mrf.mxu1 }
 0x317   :  { %v2498_v47 = vmax.f32 %v2150_v30, 0.0  ;;  %v5783_v63 = vadd.f32 %v2330_v15, %v2242_v52  ;;  %2102 = vmatmul.bf16.gmra.mxu2 %v5303_v60  ;;  %2280 = vmatmul.bf16.gmra.mxu0 %v5301_v48  ;;  %v1977_v52 = vadd.f32 %v5333_v57, %v5755_v42  ;;  %v3649_v57 = vld [vmem:[%s6381_s5 + $0x1a0] sm:$0xf] }
 0x318   :  { %2369 = vmatmul.bf16.gmra.mxu1 %v5303_v60 }
 0x319   :  { %6597 = vst [vmem:[#allocation20_spill] sm:$0xff] %v5783_v63  ;;  %2191 = vmatmul.bf16.gmra.mxu3 %v6598_v27  ;;  %v5797_v50 = vpack.c.bf16 %v2498_v47, %v2495_v13 }
 0x31a   :  { %v2063_v10 = vpop.f32.mrf.mxu2 }
 0x31b   :  { %v2064_v48 = vadd.f32 %v2063_v10, %v1975_v11 }
 0x31c   :  { %v2152_v29 = vpop.f32.mrf.mxu3  ;;  %v2243_v58 = vpop.f32.mrf.mxu0 }
 0x31d   :  { %v2153_v60 = vadd.f32 %v2152_v29, %v2064_v48  ;;  %v2244_v18 = vadd.f32 %v2243_v58, %v5752_v38  ;;  %v2332_v20 = vpop.f32.mrf.mxu1  ;;  %v1980_v48 = vadd.f32 %v5339_v32, %v5755_v42  ;;  %v1982_v32 = vadd.f32 %v5367_v22, %v5755_v42  ;;  %v3947_v22 = vld [vmem:[%s6383_s7 + $0x68] sm:$0xff] }
 0x31e   :  { %2921 = vmatpush.bf16.msra.mxu0 %v3947_v22 }
 0x31f   :  { %v5800_v30 = vadd.f32 %v2332_v20, %v2244_v18  ;;  %v2501_v11 = vmax.f32 %v2153_v60, 0.0 }
 0x322   :  { %v2065_v15 = vpop.f32.mrf.mxu2 }
 0x323   :  { %v2066_v26 = vadd.f32 %v2065_v15, %v1977_v52 }
 0x324   :  { %v2154_v51 = vpop.f32.mrf.mxu3  ;;  %v2246_v13 = vpop.f32.mrf.mxu0 }
 0x325   :  { %v2155_v47 = vadd.f32 %v2154_v51, %v2066_v26  ;;  %v2247_v6 = vadd.f32 %v2246_v13, %v5752_v38  ;;  %v2335_v54 = vpop.f32.mrf.mxu1  ;;  %v3915_v26 = vld [vmem:[%s6381_s5 + $0x1a8] sm:$0xf0] }
 0x326   :  { %v3650_v29 = vor.u32 %v3915_v26, %v3649_v57  ;;  %v3939_v13 = vld [vmem:[%s6383_s7 + $0x28] sm:$0xff] }
 0x327   :  { %v2504_v10 = vmax.f32 %v2155_v47, 0.0  ;;  %v5805_v63 = vadd.f32 %v2335_v54, %v2247_v6  ;;  %2107 = vmatmul.bf16.gmra.mxu2 %v5343_v53  ;;  %2285 = vmatmul.bf16.gmra.mxu0 %v5341_v56 }
 0x328   :  { %2374 = vmatmul.bf16.gmra.mxu1 %v5343_v53  ;;  %2411 = vmatpush.bf16.msra.mxu2 %v3650_v29 }
 0x329   :  { %2196 = vmatmul.bf16.gmra.mxu3 %v5078_v35  ;;  %v5819_v58 = vpack.c.bf16 %v2504_v10, %v2501_v11 }
 0x32a   :  { %v2068_v60 = vpop.f32.mrf.mxu2  ;;  %2832 = vmatpush.bf16.msra.mxu3 %v3939_v13 }
 0x32b   :  { %v2069_v56 = vadd.f32 %v2068_v60, %v1980_v48 }
 0x32c   :  { %v2157_v18 = vpop.f32.mrf.mxu3  ;;  %v2248_v20 = vpop.f32.mrf.mxu0 }
 0x32d   :  { %v2158_v53 = vadd.f32 %v2157_v18, %v2069_v56  ;;  %v2249_v52 = vadd.f32 %v2248_v20, %v5752_v38  ;;  %v2337_v15 = vpop.f32.mrf.mxu1  ;;  %v3955_v56 = vld [vmem:[%s6383_s7 + $0xa8] sm:$0xff]  ;;  %v1985_v18 = vadd.f32 %v5379_v8, %v5755_v42 }
 0x32e   :  { %3010 = vmatpush.bf16.msra.mxu1 %v3955_v56 }
 0x32f   :  { %v5822_v51 = vadd.f32 %v2337_v15, %v2249_v52  ;;  %v2507_v48 = vmax.f32 %v2158_v53, 0.0 }
 0x332   :  { %v2070_v47 = vpop.f32.mrf.mxu2 }
 0x333   :  { %v2071_v6 = vadd.f32 %v2070_v47, %v1982_v32 }
 0x334   :  { %v2159_v54 = vpop.f32.mrf.mxu3  ;;  %v2251_v11 = vpop.f32.mrf.mxu0 }
 0x335   :  { %v2160_v10 = vadd.f32 %v2159_v54, %v2071_v6  ;;  %v2252_v57 = vadd.f32 %v2251_v11, %v5752_v38  ;;  %v2340_v26 = vpop.f32.mrf.mxu1  ;;  %v1987_v6 = vadd.f32 %v5413_v1, %v5755_v42  ;;  %v3637_v1 = vld [vmem:[%s6381_s5 + $0x188] sm:$0xf] }
 0x337   :  { %v2510_v29 = vmax.f32 %v2160_v10, 0.0  ;;  %v5830_v60 = vadd.f32 %v2340_v26, %v2252_v57  ;;  %2112 = vmatmul.bf16.gmra.mxu2 %v5383_v39  ;;  %2290 = vmatmul.bf16.gmra.mxu0 %v5381_v55 }
 0x338   :  { %2379 = vmatmul.bf16.gmra.mxu1 %v5383_v39 }
 0x339   :  { %2201 = vmatmul.bf16.gmra.mxu3 %v5116_v40  ;;  %v5844_v20 = vpack.c.bf16 %v2510_v29, %v2507_v48 }
 0x33a   :  { %v2073_v53 = vpop.f32.mrf.mxu2 }
 0x33b   :  { %v2074_v55 = vadd.f32 %v2073_v53, %v1985_v18  ;;  %v3912_v18 = vld [vmem:[%s6381_s5 + $0x190] sm:$0xf0]  ;;  %v1990_v53 = vadd.f32 %v5419_v25, %v5755_v42 }
 0x33c   :  { %v2162_v52 = vpop.f32.mrf.mxu3  ;;  %v2253_v15 = vpop.f32.mrf.mxu0 }
 0x33d   :  { %v2163_v39 = vadd.f32 %v2162_v52, %v2074_v55  ;;  %v2254_v13 = vadd.f32 %v2253_v15, %v5752_v38  ;;  %v2342_v32 = vpop.f32.mrf.mxu1  ;;  %v3638_v55 = vor.u32 %v3912_v18, %v3637_v1 }
 0x33f   :  { %v5847_v47 = vadd.f32 %v2342_v32, %v2254_v13  ;;  %v2513_v29 = vmax.f32 %v2163_v39, 0.0  ;;  %2412 = vmatpush.bf16.msra.mxu2 %v3638_v55  ;;  %v3954_v55 = vld [vmem:[%s6383_s7 + $0xa0] sm:$0xff] }
 0x340   :  { %3011 = vmatpush.bf16.msra.mxu1 %v3954_v55 }
 0x342   :  { %v2075_v54 = vpop.f32.mrf.mxu2 }
 0x343   :  { %v2076_v11 = vadd.f32 %v2075_v54, %v1987_v6  ;;  %v3938_v6 = vld [vmem:[%s6383_s7 + $0x20] sm:$0xff]  ;;  %v1992_v54 = vadd.f32 %v5448_v16, %v5755_v42  ;;  %v3937_v16 = vld [vmem:[%s6383_s7 + $0x18] sm:$0xff] }
 0x344   :  { %v2164_v8 = vpop.f32.mrf.mxu3  ;;  %v2256_v10 = vpop.f32.mrf.mxu0  ;;  %2833 = vmatpush.bf16.msra.mxu3 %v3938_v6 }
 0x345   :  { %v2165_v57 = vadd.f32 %v2164_v8, %v2076_v11  ;;  %v2257_v26 = vadd.f32 %v2256_v10, %v5752_v38  ;;  %v2345_v48 = vpop.f32.mrf.mxu1  ;;  %v3946_v10 = vld [vmem:[%s6383_s7 + $0x60] sm:$0xff] }
 0x346   :  { %2922 = vmatpush.bf16.msra.mxu0 %v3946_v10  ;;  %v3935_v10 = vld [vmem:[%s6383_s7 + $0x8] sm:$0xff] }
 0x347   :  { %v2516_v22 = vmax.f32 %v2165_v57, 0.0  ;;  %v5852_v56 = vadd.f32 %v2345_v48, %v2257_v26  ;;  %2117 = vmatmul.bf16.gmra.mxu2 %v5423_v19  ;;  %2295 = vmatmul.bf16.gmra.mxu0 %v5421_v41 }
 0x348   :  { %2384 = vmatmul.bf16.gmra.mxu1 %v5423_v19  ;;  %2834 = vmatpush.bf16.msra.mxu3 %v3937_v16  ;;  %v3942_v16 = vld [vmem:[%s6383_s7 + $0x40] sm:$0xff] }
 0x349   :  { %2206 = vmatmul.bf16.gmra.mxu3 %v5148_v5  ;;  %v5866_v52 = vpack.c.bf16 %v2516_v22, %v2513_v29 }
 0x34a   :  { %v2078_v15 = vpop.f32.mrf.mxu2 }
 0x34b   :  { %v2079_v41 = vadd.f32 %v2078_v15, %v1990_v53  ;;  %v3945_v53 = vld [vmem:[%s6383_s7 + $0x58] sm:$0xff]  ;;  %v6600_v15 = vld [vmem:[#allocation39_spill] sm:$0xff] }
 0x34c   :  { %v2167_v39 = vpop.f32.mrf.mxu3  ;;  %v5868_v13 = vpop.f32.mrf.mxu0  ;;  %2923 = vmatpush.bf16.msra.mxu0 %v3945_v53 }
 0x34d   :  { %v2168_v19 = vadd.f32 %v2167_v39, %v2079_v41  ;;  %v5870_v32 = vpop.f32.mrf.mxu1  ;;  %v1995_v41 = vadd.f32 %v6600_v15, %v5755_v42 }
 0x34f   :  { %v2519_v22 = vmax.f32 %v2168_v19, 0.0 }
 0x352   :  { %v2080_v25 = vpop.f32.mrf.mxu2 }
 0x353   :  { %v2081_v11 = vadd.f32 %v2080_v25, %v1992_v54  ;;  %v3936_v54 = vld [vmem:[%s6383_s7 + $0x10] sm:$0xff] }
 0x354   :  { %v2169_v8 = vpop.f32.mrf.mxu3  ;;  %v2261_v57 = vpop.f32.mrf.mxu0  ;;  %2835 = vmatpush.bf16.msra.mxu3 %v3936_v54 }
 0x355   :  { %v2170_v26 = vadd.f32 %v2169_v8, %v2081_v11  ;;  %v2262_v48 = vadd.f32 %v2261_v57, %v5752_v38  ;;  %v2350_v29 = vpop.f32.mrf.mxu1  ;;  %v3943_v57 = vld [vmem:[%s6383_s7 + $0x48] sm:$0xff] }
 0x357   :  { %v2522_v1 = vmax.f32 %v2170_v26, 0.0  ;;  %v5881_v18 = vadd.f32 %v2350_v29, %v2262_v48  ;;  %2122 = vmatmul.bf16.gmra.mxu2 %v5475_v3  ;;  %2300 = vmatmul.bf16.gmra.mxu0 %v5473_v17  ;;  %v1997_v26 = vadd.f32 %v5531_v43, %v5755_v42 }
 0x358   :  { %2389 = vmatmul.bf16.gmra.mxu1 %v5475_v3  ;;  %v3944_v3 = vld [vmem:[%s6383_s7 + $0x50] sm:$0xff]  ;;  %2836 = vmatpush.bf16.msra.mxu3 %v3935_v10 }
 0x359   :  { %2211 = vmatmul.bf16.gmra.mxu3 %v5186_v2  ;;  %v5898_v17 = vpack.c.bf16 %v2522_v1, %v2519_v22  ;;  %2924 = vmatpush.bf16.msra.mxu0 %v3944_v3  ;;  %v3934_v1 = vld [vmem:[%s6383_s7] sm:$0xff] }
 0x35a   :  { %v2083_v39 = vpop.f32.mrf.mxu2 }
 0x35b   :  { %v2084_v19 = vadd.f32 %v2083_v39, %v1995_v41 }
 0x35c   :  { %v2172_v6 = vpop.f32.mrf.mxu3  ;;  %v5906_v25 = vpop.f32.mrf.mxu0  ;;  %2837 = vmatpush.bf16.msra.mxu3 %v3934_v1 }
 0x35d   :  { %v2173_v11 = vadd.f32 %v2172_v6, %v2084_v19  ;;  %v5908_v8 = vpop.f32.mrf.mxu1  ;;  %2925 = vmatpush.bf16.msra.mxu0 %v3943_v57  ;;  %v2000_v6 = vadd.f32 %v5571_v21, %v5755_v42 }
 0x35f   :  { %v2525_v43 = vmax.f32 %v2173_v11, 0.0 }
 0x361   :  { %2926 = vmatpush.bf16.msra.mxu0 %v3942_v16 }
 0x362   :  { %v2085_v48 = vpop.f32.mrf.mxu2 }
 0x363   :  { %v2086_v29 = vadd.f32 %v2085_v48, %v1997_v26 }
 0x364   :  { %v2174_v22 = vpop.f32.mrf.mxu3  ;;  %v2266_v53 = vpop.f32.mrf.mxu0 }
 0x365   :  { %v2175_v55 = vadd.f32 %v2174_v22, %v2086_v29  ;;  %v2267_v15 = vadd.f32 %v2266_v53, %v5752_v38  ;;  %v2355_v41 = vpop.f32.mrf.mxu1 }
 0x367   :  { %v2528_v39 = vmax.f32 %v2175_v55, 0.0  ;;  %v5925_v19 = vadd.f32 %v2355_v41, %v2267_v15  ;;  %2127 = vmatmul.bf16.gmra.mxu2 %v5575_v59  ;;  %2305 = vmatmul.bf16.gmra.mxu0 %v5573_v34  ;;  %v2002_v34 = vadd.f32 %v5599_v7, %v5755_v42  ;;  %v3953_v7 = vld [vmem:[%s6383_s7 + $0x98] sm:$0xff] }
 0x368   :  { %2394 = vmatmul.bf16.gmra.mxu1 %v5575_v59 }
 0x369   :  { %2216 = vmatmul.bf16.gmra.mxu3 %v5222_v28  ;;  %v5933_v54 = vpack.c.bf16 %v2528_v39, %v2525_v43  ;;  %v2005_v43 = vadd.f32 %v5605_v24, %v5755_v42  ;;  %3012 = vmatpush.bf16.msra.mxu1 %v3953_v7 }
 0x36a   :  { %v2088_v3 = vpop.f32.mrf.mxu2 }
 0x36b   :  { %v2089_v10 = vadd.f32 %v2088_v3, %v2000_v6 }
 0x36c   :  { %v2177_v57 = vpop.f32.mrf.mxu3  ;;  %v5935_v11 = vpop.f32.mrf.mxu0 }
 0x36d   :  { %v2178_v26 = vadd.f32 %v2177_v57, %v2089_v10  ;;  %v5937_v48 = vpop.f32.mrf.mxu1 }
 0x36f   :  { %v2531_v55 = vmax.f32 %v2178_v26, 0.0 }
 0x372   :  { %v2090_v29 = vpop.f32.mrf.mxu2 }
 0x373   :  { %v2091_v22 = vadd.f32 %v2090_v29, %v2002_v34 }
 0x374   :  { %v2179_v1 = vpop.f32.mrf.mxu3  ;;  %v2271_v59 = vpop.f32.mrf.mxu0 }
 0x375   :  { %v2180_v16 = vadd.f32 %v2179_v1, %v2091_v22  ;;  %v2272_v21 = vadd.f32 %v2271_v59, %v5752_v38  ;;  %v2360_v53 = vpop.f32.mrf.mxu1 }
 0x377   :  { %v2534_v15 = vmax.f32 %v2180_v16, 0.0  ;;  %v5942_v41 = vadd.f32 %v2360_v53, %v2272_v21  ;;  %2132 = vmatmul.bf16.gmra.mxu2 %v5609_v45  ;;  %2310 = vmatmul.bf16.gmra.mxu0 %v5607_v23 }
 0x378   :  { %2399 = vmatmul.bf16.gmra.mxu1 %v5609_v45  ;;  %v2007_v45 = vadd.f32 %v5618_v36, %v5755_v42  ;;  %v2010_v36 = vadd.f32 %v5621_v12, %v5755_v42 }
 0x379   :  { %2221 = vmatmul.bf16.gmra.mxu3 %v5277_v9  ;;  %v5953_v39 = vpack.c.bf16 %v2534_v15, %v2531_v55  ;;  %v6601_v15 = vld [vmem:[#allocation58_spill] sm:$0xff] }
 0x37a   :  { %v2093_v6 = vpop.f32.mrf.mxu2 }
 0x37b   :  { %v2094_v3 = vadd.f32 %v2093_v6, %v2005_v43 }
 0x37c   :  { %v2182_v10 = vpop.f32.mrf.mxu3  ;;  %v5955_v57 = vpop.f32.mrf.mxu0 }
 0x37d   :  { %v2183_v23 = vadd.f32 %v2182_v10, %v2094_v3  ;;  %v5957_v26 = vpop.f32.mrf.mxu1 }
 0x37f   :  { %v2537_v21 = vmax.f32 %v2183_v23, 0.0 }
 0x382   :  { %v2095_v34 = vpop.f32.mrf.mxu2 }
 0x383   :  { %v2096_v29 = vadd.f32 %v2095_v34, %v2007_v45 }
 0x384   :  { %v2184_v22 = vpop.f32.mrf.mxu3  ;;  %v2276_v1 = vpop.f32.mrf.mxu0 }
 0x385   :  { %v2185_v59 = vadd.f32 %v2184_v22, %v2096_v29  ;;  %v2277_v24 = vadd.f32 %v2276_v1, %v5752_v38  ;;  %v2365_v16 = vpop.f32.mrf.mxu1 }
 0x387   :  { %v2540_v53 = vmax.f32 %v2185_v59, 0.0  ;;  %v5962_v55 = vadd.f32 %v2365_v16, %v2277_v24  ;;  %2413 = vmatmul.bf16.vlgmr.msra.gmra.mxu2 %v4670_v44  ;;  %2927 = vmatmul.bf16.vlgmr.msra.gmra.mxu0 %v5797_v50  ;;  %v2012_v44 = vadd.f32 %v5636_v62, %v5755_v42  ;;  %v3952_v62 = vld [vmem:[%s6383_s7 + $0x90] sm:$0xff] }
 0x388   :  { %3013 = vmatpush.bf16.msra.mxu1 %v3952_v62  ;;  %v6605_v62 = vld [vmem:[#allocation38_spill] sm:$0xff] }
 0x389   :  { %2838 = vmatmul.bf16.vlgmr.msra.gmra.mxu3 %v6601_v15  ;;  %v5969_v7 = vpack.c.bf16 %v2540_v53, %v2537_v21  ;;  %v6602_v53 = vld [vmem:[#allocation34_spill] sm:$0xff]  ;;  %v2015_v15 = vadd.f32 %v5639_v46, %v5755_v42 }
 0x38a   :  { %v2098_v43 = vpop.f32.mrf.mxu2 }
 0x38b   :  { %v2099_v6 = vadd.f32 %v2098_v43, %v2010_v36 }
 0x38c   :  { %v2187_v3 = vpop.f32.mrf.mxu3  ;;  %v5971_v10 = vpop.f32.mrf.mxu0 }
 0x38d   :  { %v2188_v23 = vadd.f32 %v2187_v3, %v2099_v6  ;;  %v5973_v45 = vpop.f32.mrf.mxu1 }
 0x38f   :  { %v2543_v24 = vmax.f32 %v2188_v23, 0.0 }
 0x392   :  { %v2100_v34 = vpop.f32.mrf.mxu2 }
 0x393   :  { %v2101_v50 = vadd.f32 %v2100_v34, %v2012_v44 }
 0x394   :  { %v2189_v29 = vpop.f32.mrf.mxu3  ;;  %v2281_v22 = vpop.f32.mrf.mxu0 }
 0x395   :  { %v2190_v1 = vadd.f32 %v2189_v29, %v2101_v50  ;;  %v2282_v12 = vadd.f32 %v2281_v22, %v5752_v38  ;;  %v2370_v59 = vpop.f32.mrf.mxu1 }
 0x397   :  { %v2546_v16 = vmax.f32 %v2190_v1, 0.0  ;;  %v5978_v21 = vadd.f32 %v2370_v59, %v2282_v12  ;;  %2418 = vmatmul.bf16.gmra.mxu2 %v6561_v37  ;;  %2932 = vmatmul.bf16.gmra.mxu0 %v5819_v58  ;;  %v2017_v58 = vadd.f32 %v5648_v49, %v5755_v42  ;;  %v6606_v49 = vld [vmem:[#allocation61_spill] sm:$0xff] }
 0x399   :  { %2843 = vmatmul.bf16.gmra.mxu3 %v6602_v53  ;;  %v5988_v36 = vpack.c.bf16 %v2546_v16, %v2543_v24  ;;  %v6604_v53 = vld [vmem:[#allocation51_spill] sm:$0xff] }
 0x39a   :  { %v2103_v43 = vpop.f32.mrf.mxu2 }
 0x39b   :  { %v2104_v6 = vadd.f32 %v2103_v43, %v2015_v15  ;;  %v2020_v15 = vadd.f32 %v6606_v49, %v5755_v42 }
 0x39c   :  { %v2192_v3 = vpop.f32.mrf.mxu3  ;;  %v5990_v23 = vpop.f32.mrf.mxu0 }
 0x39d   :  { %v2193_v37 = vadd.f32 %v2192_v3, %v2104_v6  ;;  %v5992_v44 = vpop.f32.mrf.mxu1 }
 0x39f   :  { %v2549_v59 = vmax.f32 %v2193_v37, 0.0 }
 0x3a2   :  { %v2105_v34 = vpop.f32.mrf.mxu2 }
 0x3a3   :  { %v2106_v50 = vadd.f32 %v2105_v34, %v2017_v58 }
 0x3a4   :  { %v2194_v29 = vpop.f32.mrf.mxu3  ;;  %v2286_v22 = vpop.f32.mrf.mxu0 }
 0x3a5   :  { %v2195_v1 = vadd.f32 %v2194_v29, %v2106_v50  ;;  %v2287_v46 = vadd.f32 %v2286_v22, %v5752_v38  ;;  %v2375_v12 = vpop.f32.mrf.mxu1  ;;  %v6608_v29 = vld [vmem:[#allocation64_spill] sm:$0xff] }
 0x3a6   :  { %v2022_v22 = vadd.f32 %v6608_v29, %v5755_v42  ;;  %v6612_v29 = vld [vmem:[#allocation7_spill] sm:$0xff] }
 0x3a7   :  { %v2552_v24 = vmax.f32 %v2195_v1, 0.0  ;;  %v5997_v16 = vadd.f32 %v2375_v12, %v2287_v46  ;;  %2423 = vmatmul.bf16.gmra.mxu2 %v6604_v53  ;;  %2937 = vmatmul.bf16.gmra.mxu0 %v5844_v20 }
 0x3a9   :  { %6603 = vst [vmem:[#allocation17_spill] sm:$0xff] %v5997_v16  ;;  %2848 = vmatmul.bf16.gmra.mxu3 %v6605_v62  ;;  %v6004_v43 = vpack.c.bf16 %v2552_v24, %v2549_v59 }
 0x3aa   :  { %v2108_v6 = vpop.f32.mrf.mxu2 }
 0x3ab   :  { %v2109_v3 = vadd.f32 %v2108_v6, %v2020_v15  ;;  %v6610_v6 = vld [vmem:[#allocation53_spill] sm:$0xff] }
 0x3ac   :  { %v2197_v58 = vpop.f32.mrf.mxu3  ;;  %v6006_v34 = vpop.f32.mrf.mxu0 }
 0x3ad   :  { %v2198_v37 = vadd.f32 %v2197_v58, %v2109_v3  ;;  %v6008_v50 = vpop.f32.mrf.mxu1  ;;  %v6611_v3 = vld [vmem:[#allocation35_spill] sm:$0xff]  ;;  %v3951_v58 = vld [vmem:[%s6383_s7 + $0x88] sm:$0xff] }
 0x3ae   :  { %6607 = vst [vmem:[#allocation18_spill] sm:$0xff] %v6008_v50  ;;  %3014 = vmatpush.bf16.msra.mxu1 %v3951_v58 }
 0x3af   :  { %v2555_v24 = vmax.f32 %v2198_v37, 0.0 }
 0x3b2   :  { %v2110_v1 = vpop.f32.mrf.mxu2 }
 0x3b3   :  { %v2111_v20 = vadd.f32 %v2110_v1, %v2022_v22  ;;  %v2025_v22 = vadd.f32 %v6612_v29, %v5755_v42 }
 0x3b4   :  { %v2199_v46 = vpop.f32.mrf.mxu3  ;;  %v2291_v12 = vpop.f32.mrf.mxu0 }
 0x3b5   :  { %v2200_v53 = vadd.f32 %v2199_v46, %v2111_v20  ;;  %v2292_v62 = vadd.f32 %v2291_v12, %v5752_v38  ;;  %v2380_v59 = vpop.f32.mrf.mxu1 }
 0x3b7   :  { %v2558_v49 = vmax.f32 %v2200_v53, 0.0  ;;  %v6013_v15 = vadd.f32 %v2380_v59, %v2292_v62  ;;  %2428 = vmatmul.bf16.gmra.mxu2 %v6610_v6  ;;  %2942 = vmatmul.bf16.gmra.mxu0 %v5866_v52  ;;  %v6614_v52 = vld [vmem:[#allocation5_spill] sm:$0xff] }
 0x3b8   :  { %v2027_v59 = vadd.f32 %v6614_v52, %v5755_v42 }
 0x3b9   :  { %6609 = vst [vmem:[#allocation24_spill] sm:$0xff] %v6013_v15  ;;  %2853 = vmatmul.bf16.gmra.mxu3 %v6611_v3  ;;  %v6023_v1 = vpack.c.bf16 %v2558_v49, %v2555_v24 }
 0x3ba   :  { %v2113_v20 = vpop.f32.mrf.mxu2 }
 0x3bb   :  { %v2114_v37 = vadd.f32 %v2113_v20, %v2025_v22  ;;  %v6616_v20 = vld [vmem:[#allocation56_spill] sm:$0xff] }
 0x3bc   :  { %v2202_v46 = vpop.f32.mrf.mxu3  ;;  %v6025_v12 = vpop.f32.mrf.mxu0 }
 0x3bd   :  { %v2203_v53 = vadd.f32 %v2202_v46, %v2114_v37  ;;  %v6027_v62 = vpop.f32.mrf.mxu1  ;;  %v6617_v37 = vld [vmem:[#allocation60_spill] sm:$0xff]  ;;  %v6618_v46 = vld [vmem:[#allocation6_spill] sm:$0xff] }
 0x3be   :  { %6613 = vst [vmem:[#allocation25_spill] sm:$0xff] %v6027_v62  ;;  %v2030_v52 = vadd.f32 %v6618_v46, %v5755_v42 }
 0x3bf   :  { %v2561_v29 = vmax.f32 %v2203_v53, 0.0 }
 0x3c2   :  { %v2115_v6 = vpop.f32.mrf.mxu2 }
 0x3c3   :  { %v2116_v3 = vadd.f32 %v2115_v6, %v2027_v59 }
 0x3c4   :  { %v2204_v15 = vpop.f32.mrf.mxu3  ;;  %v2296_v16 = vpop.f32.mrf.mxu0 }
 0x3c5   :  { %v2205_v50 = vadd.f32 %v2204_v15, %v2116_v3  ;;  %v2297_v24 = vadd.f32 %v2296_v16, %v5752_v38  ;;  %v2385_v49 = vpop.f32.mrf.mxu1 }
 0x3c7   :  { %v2564_v58 = vmax.f32 %v2205_v50, 0.0  ;;  %v6032_v22 = vadd.f32 %v2385_v49, %v2297_v24  ;;  %2433 = vmatmul.bf16.gmra.mxu2 %v6616_v20  ;;  %2947 = vmatmul.bf16.gmra.mxu0 %v5898_v17  ;;  %v2032_v24 = vadd.f32 %v5696_v33, %v5755_v42  ;;  %v3950_v33 = vld [vmem:[%s6383_s7 + $0x80] sm:$0xff] }
 0x3c8   :  { %3015 = vmatpush.bf16.msra.mxu1 %v3950_v33 }
 0x3c9   :  { %6615 = vst [vmem:[#allocation21_spill] sm:$0xff] %v6032_v22  ;;  %2858 = vmatmul.bf16.gmra.mxu3 %v6617_v37  ;;  %v6039_v59 = vpack.c.bf16 %v2564_v58, %v2561_v29 }
 0x3ca   :  { %v2118_v6 = vpop.f32.mrf.mxu2 }
 0x3cb   :  { %v2119_v15 = vadd.f32 %v2118_v6, %v2030_v52  ;;  %v6621_v6 = vld [vmem:[#allocation59_spill] sm:$0xff] }
 0x3cc   :  { %v2207_v3 = vpop.f32.mrf.mxu3  ;;  %v6041_v16 = vpop.f32.mrf.mxu0 }
 0x3cd   :  { %v2208_v53 = vadd.f32 %v2207_v3, %v2119_v15  ;;  %v6043_v50 = vpop.f32.mrf.mxu1  ;;  %v6622_v15 = vld [vmem:[#allocation42_spill] sm:$0xff]  ;;  %v6623_v3 = vld [vmem:[#allocation12_spill] sm:$0xff] }
 0x3ce   :  { %6619 = vst [vmem:[#allocation22_spill] sm:$0xff] %v6043_v50 }
 0x3cf   :  { %v2567_v58 = vmax.f32 %v2208_v53, 0.0 }
 0x3d2   :  { %v2120_v49 = vpop.f32.mrf.mxu2 }
 0x3d3   :  { %v2121_v17 = vadd.f32 %v2120_v49, %v2032_v24  ;;  %v2035_v24 = vadd.f32 %v6623_v3, %v5755_v42 }
 0x3d4   :  { %v2209_v20 = vpop.f32.mrf.mxu3  ;;  %v2301_v37 = vpop.f32.mrf.mxu0 }
 0x3d5   :  { %v2210_v22 = vadd.f32 %v2209_v20, %v2121_v17  ;;  %v2302_v46 = vadd.f32 %v2301_v37, %v5752_v38  ;;  %v2390_v29 = vpop.f32.mrf.mxu1 }
 0x3d7   :  { %v2570_v62 = vmax.f32 %v2210_v22, 0.0  ;;  %v6048_v52 = vadd.f32 %v2390_v29, %v2302_v46  ;;  %2438 = vmatmul.bf16.gmra.mxu2 %v6621_v6  ;;  %2952 = vmatmul.bf16.gmra.mxu0 %v5933_v54  ;;  %v2037_v54 = vadd.f32 %v5708_v31, %v5755_v42  ;;  %v6629_v31 = vld [vmem:[#allocation10_spill] sm:$0xff] }
 0x3d9   :  { %6620 = vst [vmem:[#allocation33_spill] sm:$0xff] %v6048_v52  ;;  %2863 = vmatmul.bf16.gmra.mxu3 %v6622_v15  ;;  %v6058_v49 = vpack.c.bf16 %v2570_v62, %v2567_v58 }
 0x3da   :  { %v2123_v17 = vpop.f32.mrf.mxu2 }
 0x3db   :  { %v2124_v22 = vadd.f32 %v2123_v17, %v2035_v24  ;;  %v6627_v17 = vld [vmem:[#allocation62_spill] sm:$0xff] }
 0x3dc   :  { %v2212_v53 = vpop.f32.mrf.mxu3  ;;  %v6060_v20 = vpop.f32.mrf.mxu0 }
 0x3dd   :  { %6624 = vst [vmem:[#allocation32_spill] sm:$0xff] %v6060_v20  ;;  %v2213_v37 = vadd.f32 %v2212_v53, %v2124_v22  ;;  %v6062_v46 = vpop.f32.mrf.mxu1  ;;  %v6628_v22 = vld [vmem:[#allocation63_spill] sm:$0xff]  ;;  %v2040_v53 = vadd.f32 %v6629_v31, %v5755_v42 }
 0x3de   :  { %6625 = vst [vmem:[#allocation28_spill] sm:$0xff] %v6062_v46 }
 0x3df   :  { %v2573_v3 = vmax.f32 %v2213_v37, 0.0 }
 0x3e2   :  { %v2125_v29 = vpop.f32.mrf.mxu2 }
 0x3e3   :  { %v2126_v6 = vadd.f32 %v2125_v29, %v2037_v54 }
 0x3e4   :  { %v2214_v15 = vpop.f32.mrf.mxu3  ;;  %v2306_v52 = vpop.f32.mrf.mxu0 }
 0x3e5   :  { %v2215_v50 = vadd.f32 %v2214_v15, %v2126_v6  ;;  %v2307_v62 = vadd.f32 %v2306_v52, %v5752_v38  ;;  %v2395_v58 = vpop.f32.mrf.mxu1 }
 0x3e7   :  { %v2576_v33 = vmax.f32 %v2215_v50, 0.0  ;;  %v6067_v24 = vadd.f32 %v2395_v58, %v2307_v62  ;;  %2443 = vmatmul.bf16.gmra.mxu2 %v6627_v17  ;;  %2957 = vmatmul.bf16.gmra.mxu0 %v5953_v39  ;;  %v6631_v62 = vld [vmem:[#allocation16_spill] sm:$0xff] }
 0x3e8   :  { %v2042_v58 = vadd.f32 %v6631_v62, %v5755_v42 }
 0x3e9   :  { %6626 = vst [vmem:[#allocation29_spill] sm:$0xff] %v6067_v24  ;;  %2868 = vmatmul.bf16.gmra.mxu3 %v6628_v22  ;;  %v6074_v54 = vpack.c.bf16 %v2576_v33, %v2573_v3 }
 0x3ea   :  { %v2128_v29 = vpop.f32.mrf.mxu2 }
 0x3eb   :  { %v2129_v6 = vadd.f32 %v2128_v29, %v2040_v53  ;;  %v6633_v29 = vld [vmem:[#allocation65_spill] sm:$0xff] }
 0x3ec   :  { %v2217_v15 = vpop.f32.mrf.mxu3  ;;  %v6076_v52 = vpop.f32.mrf.mxu0 }
 0x3ed   :  { %v2218_v37 = vadd.f32 %v2217_v15, %v2129_v6  ;;  %v6078_v50 = vpop.f32.mrf.mxu1  ;;  %v6634_v6 = vld [vmem:[#allocation46_spill] sm:$0xff]  ;;  %v6635_v15 = vld [vmem:[#allocation13_spill] sm:$0xff] }
 0x3ee   :  { %6630 = vst [vmem:[#allocation36_spill] sm:$0xff] %v6078_v50  ;;  %v2045_v62 = vadd.f32 %v6635_v15, %v5755_v42 }
 0x3ef   :  { %v2579_v33 = vmax.f32 %v2218_v37, 0.0 }
 0x3f2   :  { %v2130_v17 = vpop.f32.mrf.mxu2 }
 0x3f3   :  { %v2131_v39 = vadd.f32 %v2130_v17, %v2042_v58 }
 0x3f4   :  { %v2219_v24 = vpop.f32.mrf.mxu3  ;;  %v2311_v22 = vpop.f32.mrf.mxu0 }
 0x3f5   :  { %v2220_v46 = vadd.f32 %v2219_v24, %v2131_v39  ;;  %v2312_v31 = vadd.f32 %v2311_v22, %v5752_v38  ;;  %v2400_v3 = vpop.f32.mrf.mxu1 }
 0x3f7   :  { %v2582_v20 = vmax.f32 %v2220_v46, 0.0  ;;  %v6083_v53 = vadd.f32 %v2400_v3, %v2312_v31  ;;  %2448 = vmatmul.bf16.gmra.mxu2 %v6633_v29  ;;  %2962 = vmatmul.bf16.gmra.mxu0 %v5969_v7  ;;  %v2047_v46 = vadd.f32 %v5747_v0, %v5755_v42 }
 0x3f9   :  { %6632 = vst [vmem:[#allocation41_spill] sm:$0xff] %v6083_v53  ;;  %2873 = vmatmul.bf16.gmra.mxu3 %v6634_v6  ;;  %v6090_v58 = vpack.c.bf16 %v2582_v20, %v2579_v33  ;;  %v6636_v20 = vld [vmem:[#allocation43_spill] sm:$0xff] }
 0x3fa   :  { %v2133_v17 = vpop.f32.mrf.mxu2 }
 0x3fb   :  { %v2134_v24 = vadd.f32 %v2133_v17, %v2045_v62 }
 0x3fc   :  { %v2222_v39 = vpop.f32.mrf.mxu3  ;;  %v6092_v22 = vpop.f32.mrf.mxu0 }
 0x3fd   :  { %v2223_v37 = vadd.f32 %v2222_v39, %v2134_v24 }
 0x3ff   :  { %v2585_v6 = vmax.f32 %v2223_v37, 0.0 }
 0x402   :  { %v2135_v31 = vpop.f32.mrf.mxu2 }
 0x403   :  { %v2136_v3 = vadd.f32 %v2135_v31, %v2047_v46 }
 0x404   :  { %v2224_v29 = vpop.f32.mrf.mxu3  ;;  %v2928_v7 = vpop.f32.mrf.mxu0 }
 0x405   :  { %v2225_v53 = vadd.f32 %v2224_v29, %v2136_v3 }
 0x407   :  { %v2588_v50 = vmax.f32 %v2225_v53, 0.0  ;;  %2453 = vmatmul.bf16.gmra.mxu2 %v5008_v4  ;;  %2967 = vmatmul.bf16.gmra.mxu0 %v5988_v36 }
 0x409   :  { %2878 = vmatmul.bf16.gmra.mxu3 %v6636_v20  ;;  %v6099_v33 = vpack.c.bf16 %v2588_v50, %v2585_v6  ;;  %v6637_v50 = vld [vmem:[#allocation47_spill] sm:$0xff] }
 0x40a   :  { %v2414_v15 = vpop.f32.mrf.mxu2 }
 0x40b   :  { %v2415_v42 = vadd.f32 %v2414_v15, %v5758_v61 }
 0x40c   :  { %v2839_v62 = vpop.f32.mrf.mxu3  ;;  %v2930_v0 = vpop.f32.mrf.mxu0 }
 0x40d   :  { %v6101_v17 = vadd.f32 %v2928_v7, %v2839_v62  ;;  %v2496_v46 = vmax.f32 %v2415_v42, 0.0 }
 0x412   :  { %v2416_v24 = vpop.f32.mrf.mxu2 }
 0x413   :  { %v2417_v39 = vadd.f32 %v2416_v24, %v5775_v14  ;;  %v6638_v14 = vld [vmem:[#allocation20_spill] sm:$0xff] }
 0x414   :  { %v2841_v37 = vpop.f32.mrf.mxu3  ;;  %v2933_v4 = vpop.f32.mrf.mxu0 }
 0x415   :  { %v6105_v53 = vadd.f32 %v2930_v0, %v2841_v37  ;;  %v2499_v36 = vmax.f32 %v2417_v39, 0.0  ;;  %v6639_v39 = vld [vmem:[#allocation8_spill] sm:$0xff] }
 0x417   :  { %v2592_v31 = vpack.c.bf16 %v2499_v36, %v2496_v46  ;;  %2458 = vmatmul.bf16.gmra.mxu2 %v6598_v27  ;;  %2972 = vmatmul.bf16.gmra.mxu0 %v6004_v43 }
 0x419   :  { %2883 = vmatmul.bf16.gmra.mxu3 %v6637_v50  ;;  %3016 = vmatmul.bf16.vlgmr.msra.gmra.mxu1 %v2592_v31 }
 0x41a   :  { %v2419_v3 = vpop.f32.mrf.mxu2 }
 0x41b   :  { %v2420_v6 = vadd.f32 %v2419_v3, %v6638_v14  ;;  %v6640_v14 = vld [vmem:[#allocation11_spill] sm:$0xff] }
 0x41c   :  { %v2844_v29 = vpop.f32.mrf.mxu3  ;;  %v2935_v7 = vpop.f32.mrf.mxu0 }
 0x41d   :  { %v6110_v61 = vadd.f32 %v2933_v4, %v2844_v29  ;;  %v2502_v42 = vmax.f32 %v2420_v6, 0.0 }
 0x422   :  { %v2421_v20 = vpop.f32.mrf.mxu2 }
 0x423   :  { %v2422_v15 = vadd.f32 %v2421_v20, %v5800_v30 }
 0x424   :  { %v2846_v62 = vpop.f32.mrf.mxu3  ;;  %v2938_v24 = vpop.f32.mrf.mxu0 }
 0x425   :  { %v6114_v0 = vadd.f32 %v2935_v7, %v2846_v62  ;;  %v2505_v27 = vmax.f32 %v2422_v15, 0.0 }
 0x427   :  { %2463 = vmatmul.bf16.gmra.mxu2 %v5078_v35  ;;  %2977 = vmatmul.bf16.gmra.mxu0 %v6023_v1  ;;  %v2595_v43 = vpack.c.bf16 %v2505_v27, %v2502_v42 }
 0x429   :  { %2888 = vmatmul.bf16.gmra.mxu3 %v6639_v39  ;;  %3021 = vmatmul.bf16.gmra.mxu1 %v2595_v43 }
 0x42a   :  { %v2424_v37 = vpop.f32.mrf.mxu2 }
 0x42b   :  { %v2425_v30 = vadd.f32 %v2424_v37, %v5805_v63  ;;  %v6641_v37 = vld [vmem:[#allocation9_spill] sm:$0xff] }
 0x42c   :  { %v2849_v4 = vpop.f32.mrf.mxu3  ;;  %v2940_v36 = vpop.f32.mrf.mxu0 }
 0x42d   :  { %v6119_v46 = vadd.f32 %v2938_v24, %v2849_v4  ;;  %v2508_v35 = vmax.f32 %v2425_v30, 0.0 }
 0x432   :  { %v2426_v31 = vpop.f32.mrf.mxu2 }
 0x433   :  { %v2427_v50 = vadd.f32 %v2426_v31, %v5822_v51 }
 0x434   :  { %v2851_v3 = vpop.f32.mrf.mxu3  ;;  %v2943_v6 = vpop.f32.mrf.mxu0 }
 0x435   :  { %v6123_v29 = vadd.f32 %v2940_v36, %v2851_v3  ;;  %v2511_v7 = vmax.f32 %v2427_v50, 0.0 }
 0x437   :  { %2468 = vmatmul.bf16.gmra.mxu2 %v5116_v40  ;;  %2982 = vmatmul.bf16.gmra.mxu0 %v6039_v59  ;;  %v2598_v1 = vpack.c.bf16 %v2511_v7, %v2508_v35 }
 0x439   :  { %2893 = vmatmul.bf16.gmra.mxu3 %v6640_v14  ;;  %3026 = vmatmul.bf16.gmra.mxu1 %v2598_v1 }
 0x43a   :  { %v2429_v20 = vpop.f32.mrf.mxu2 }
 0x43b   :  { %v2430_v51 = vadd.f32 %v2429_v20, %v5830_v60  ;;  %v2259_v60 = vadd.f32 %v5868_v13, %v5752_v38  ;;  %v2264_v13 = vadd.f32 %v5906_v25, %v5752_v38  ;;  %v2269_v25 = vadd.f32 %v5935_v11, %v5752_v38 }
 0x43c   :  { %v2854_v15 = vpop.f32.mrf.mxu3  ;;  %v2945_v42 = vpop.f32.mrf.mxu0  ;;  %v2274_v11 = vadd.f32 %v5955_v57, %v5752_v38 }
 0x43d   :  { %v6128_v63 = vadd.f32 %v2943_v6, %v2854_v15  ;;  %v2514_v40 = vmax.f32 %v2430_v51, 0.0  ;;  %v2348_v36 = vadd.f32 %v5870_v32, %v2259_v60  ;;  %v2353_v32 = vadd.f32 %v5908_v8, %v2264_v13 }
 0x43e   :  { %v2358_v8 = vadd.f32 %v5937_v48, %v2269_v25  ;;  %v2363_v48 = vadd.f32 %v5957_v26, %v2274_v11  ;;  %v3967_v25 = vld [vmem:[%s6376_s0 + $0x10] sm:$0xff]  ;;  %v6646_v11 = vld [vmem:[#allocation17_spill] sm:$0xff] }
 0x442   :  { %v2431_v62 = vpop.f32.mrf.mxu2 }
 0x443   :  { %v2432_v27 = vadd.f32 %v2431_v62, %v5847_v47 }
 0x444   :  { %v2856_v24 = vpop.f32.mrf.mxu3 }
 0x445   :  { %v6132_v43 = vadd.f32 %v2945_v42, %v2856_v24  ;;  %v2517_v59 = vmax.f32 %v2432_v27, 0.0 }
 0x447   :  { %2473 = vmatmul.bf16.gmra.mxu2 %v5148_v5  ;;  %2987 = vmatmul.bf16.gmra.mxu0 %v6058_v49  ;;  %v2601_v39 = vpack.c.bf16 %v2517_v59, %v2514_v40  ;;  %v6642_v5 = vld [vmem:[#allocation15_spill] sm:$0xff] }
 0x449   :  { %2898 = vmatmul.bf16.gmra.mxu3 %v6641_v37  ;;  %3031 = vmatmul.bf16.gmra.mxu1 %v2601_v39 }
 0x44a   :  { %v2434_v4 = vpop.f32.mrf.mxu2 }
 0x44b   :  { %v2435_v47 = vadd.f32 %v2434_v4, %v5852_v56  ;;  %v6164_v4 = vpop.f32.mrf.mxu1 }
 0x44d   :  { %v2520_v50 = vmax.f32 %v2435_v47, 0.0 }
 0x452   :  { %v2436_v30 = vpop.f32.mrf.mxu2 }
 0x453   :  { %v2437_v31 = vadd.f32 %v2436_v30, %v2348_v36 }
 0x455   :  { %v2523_v3 = vmax.f32 %v2437_v31, 0.0 }
 0x457   :  { %v2604_v35 = vpack.c.bf16 %v2523_v3, %v2520_v50  ;;  %2478 = vmatmul.bf16.gmra.mxu2 %v5186_v2  ;;  %2992 = vmatmul.bf16.gmra.mxu0 %v6074_v54  ;;  %v6643_v2 = vld [vmem:[#allocation14_spill] sm:$0xff]  ;;  %v6172_v3 = vld [vmem:[%s6384_s8] ss:$0 sm:$0xff] }
 0x459   :  { %2903 = vmatmul.bf16.gmra.mxu3 %v6642_v5  ;;  %3036 = vmatmul.bf16.gmra.mxu1 %v2604_v35  ;;  %v2284_v5 = vadd.f32 %v5990_v23, %v5752_v38 }
 0x45a   :  { %v2439_v49 = vpop.f32.mrf.mxu2 }
 0x45b   :  { %v2440_v56 = vadd.f32 %v2439_v49, %v5881_v18  ;;  %v2373_v13 = vadd.f32 %v5992_v44, %v2284_v5 }
 0x45d   :  { %v2526_v14 = vmax.f32 %v2440_v56, 0.0  ;;  %v3966_v56 = vld [vmem:[%s6376_s0 + $0x8] sm:$0xff] }
 0x462   :  { %v2441_v7 = vpop.f32.mrf.mxu2 }
 0x463   :  { %v2442_v1 = vadd.f32 %v2441_v7, %v2353_v32 }
 0x465   :  { %v2529_v6 = vmax.f32 %v2442_v1, 0.0 }
 0x467   :  { %v2607_v20 = vpack.c.bf16 %v2529_v6, %v2526_v14  ;;  %2483 = vmatmul.bf16.gmra.mxu2 %v5222_v28  ;;  %2997 = vmatmul.bf16.gmra.mxu0 %v6090_v58  ;;  %v6644_v28 = vld [vmem:[#allocation19_spill] sm:$0xff] }
 0x469   :  { %2908 = vmatmul.bf16.gmra.mxu3 %v6643_v2  ;;  %3041 = vmatmul.bf16.gmra.mxu1 %v2607_v20  ;;  %v6187_v20 = vpop.f32.mrf.mxu3 }
 0x46a   :  { %v2444_v54 = vpop.f32.mrf.mxu2 }
 0x46b   :  { %v2445_v18 = vadd.f32 %v2444_v54, %v5925_v19  ;;  %v6189_v54 = vpop.f32.mrf.mxu0 }
 0x46d   :  { %v2532_v62 = vmax.f32 %v2445_v18, 0.0 }
 0x472   :  { %v2446_v15 = vpop.f32.mrf.mxu2 }
 0x473   :  { %v2447_v51 = vadd.f32 %v2446_v15, %v2358_v8 }
 0x475   :  { %v2535_v42 = vmax.f32 %v2447_v51, 0.0  ;;  %v2289_v51 = vadd.f32 %v6006_v34, %v5752_v38 }
 0x477   :  { %v2610_v27 = vpack.c.bf16 %v2535_v42, %v2532_v62  ;;  %2488 = vmatmul.bf16.gmra.mxu2 %v5277_v9  ;;  %3002 = vmatmul.bf16.gmra.mxu0 %v6099_v33  ;;  %v2279_v33 = vadd.f32 %v5971_v10, %v5752_v38  ;;  %v3965_v10 = vld [vmem:[%s6376_s0] sm:$0xff]  ;;  %v6198_v62 = vpop.f32.mrf.mxu3 }
 0x479   :  { %2913 = vmatmul.bf16.gmra.mxu3 %v6644_v28  ;;  %3046 = vmatmul.bf16.gmra.mxu1 %v2610_v27  ;;  %v2368_v60 = vadd.f32 %v5973_v45, %v2279_v33  ;;  %v6201_v28 = vpop.f32.mrf.mxu0 }
 0x47a   :  { %v2449_v58 = vpop.f32.mrf.mxu2 }
 0x47b   :  { %v2450_v19 = vadd.f32 %v2449_v58, %v5942_v41 }
 0x47d   :  { %v2538_v59 = vmax.f32 %v2450_v19, 0.0  ;;  %v3968_v19 = vld [vmem:[%s6376_s0 + $0x18] sm:$0xff] }
 0x482   :  { %v2451_v24 = vpop.f32.mrf.mxu2 }
 0x483   :  { %v2452_v40 = vadd.f32 %v2451_v24, %v2363_v48 }
 0x485   :  { %v2541_v39 = vmax.f32 %v2452_v40, 0.0 }
 0x487   :  { %v2613_v37 = vpack.c.bf16 %v2541_v39, %v2538_v59 }
 0x489   :  { %3051 = vmatmul.bf16.gmra.mxu1 %v2613_v37 }
 0x48a   :  { %v2454_v9 = vpop.f32.mrf.mxu2 }
 0x48b   :  { %v2455_v57 = vadd.f32 %v2454_v9, %v5962_v55 }
 0x48d   :  { %v2544_v47 = vmax.f32 %v2455_v57, 0.0  ;;  %v3969_v57 = vld [vmem:[%s6376_s0 + $0x20] sm:$0xff] }
 0x492   :  { %v2456_v36 = vpop.f32.mrf.mxu2 }
 0x493   :  { %v2457_v26 = vadd.f32 %v2456_v36, %v2368_v60  ;;  %v6210_v60 = vpop.f32.mrf.mxu3 }
 0x495   :  { %v2547_v41 = vmax.f32 %v2457_v26, 0.0  ;;  %v6215_v26 = vpop.f32.mrf.mxu0 }
 0x496   :  { %v3017_v30 = vpop.f32.mrf.mxu1 }
 0x497   :  { %v2616_v31 = vpack.c.bf16 %v2547_v41, %v2544_v47  ;;  %v3018_v50 = vadd.f32 %v3017_v30, %v6101_v17  ;;  %v2294_v30 = vadd.f32 %v6025_v12, %v5752_v38 }
 0x499   :  { %v3097_v45 = vadd.f32 %v3965_v10, %v3018_v50  ;;  %3056 = vmatmul.bf16.gmra.mxu1 %v2616_v31  ;;  %v6647_v50 = vld [vmem:[#allocation25_spill] sm:$0xff] }
 0x49a   :  { %v2459_v55 = vpop.f32.mrf.mxu2  ;;  %v2383_v10 = vadd.f32 %v6647_v50, %v2294_v30  ;;  %v6652_v30 = vld [vmem:[#allocation28_spill] sm:$0xff] }
 0x49b   :  { %v3133_v35 = vadd.f32 %v6172_v3, %v3097_v45  ;;  %v2460_v32 = vadd.f32 %v2459_v55, %v5978_v21  ;;  %v6648_v45 = vld [vmem:[#allocation24_spill] sm:$0xff] }
 0x49d   :  { %3165 = vst [vmem:[#allocation2] sm:$0xff] %v3133_v35  ;;  %v2550_v23 = vmax.f32 %v2460_v32, 0.0  ;;  %v3970_v35 = vld [vmem:[%s6376_s0 + $0x28] sm:$0xff]  ;;  %v6229_v12 = vpop.f32.mrf.mxu0 }
 0x49e   :  { %v3019_v49 = vpop.f32.mrf.mxu1 }
 0x49f   :  { %v3020_v17 = vadd.f32 %v3019_v49, %v6105_v53  ;;  %v6226_v49 = vpop.f32.mrf.mxu3 }
 0x4a1   :  { %v3098_v7 = vadd.f32 %v3966_v56, %v3020_v17 }
 0x4a2   :  { %v2461_v1 = vpop.f32.mrf.mxu2 }
 0x4a3   :  { %v3134_v14 = vadd.f32 %v6172_v3, %v3098_v7  ;;  %v2462_v6 = vadd.f32 %v2461_v1, %v2373_v13 }
 0x4a5   :  { %3166 = vst [vmem:[#allocation2 + $0x8] sm:$0xff] %v3134_v14  ;;  %v2553_v2 = vmax.f32 %v2462_v6, 0.0  ;;  %v3971_v6 = vld [vmem:[%s6376_s0 + $0x30] sm:$0xff] }
 0x4a6   :  { %v3022_v53 = vpop.f32.mrf.mxu1 }
 0x4a7   :  { %v2619_v44 = vpack.c.bf16 %v2553_v2, %v2550_v23  ;;  %v3023_v21 = vadd.f32 %v3022_v53, %v6110_v61  ;;  %v6645_v61 = vld [vmem:[#allocation18_spill] sm:$0xff] }
 0x4a8   :  { %v2378_v58 = vadd.f32 %v6645_v61, %v2289_v51  ;;  %v6650_v51 = vld [vmem:[#allocation21_spill] sm:$0xff] }
 0x4a9   :  { %v3099_v8 = vadd.f32 %v3967_v25, %v3023_v21  ;;  %3061 = vmatmul.bf16.gmra.mxu1 %v2619_v44  ;;  %v6236_v44 = vpop.f32.mrf.mxu3  ;;  %v2299_v21 = vadd.f32 %v6041_v16, %v5752_v38  ;;  %v6240_v25 = vpop.f32.mrf.mxu0  ;;  %v2949_v16 = vadd.f32 %v6189_v54, %v6187_v20  ;;  %v6651_v20 = vld [vmem:[#allocation32_spill] sm:$0xff] }
 0x4aa   :  { %v2464_v18 = vpop.f32.mrf.mxu2  ;;  %v2304_v54 = vadd.f32 %v6651_v20, %v5752_v38 }
 0x4ab   :  { %v3135_v15 = vadd.f32 %v6172_v3, %v3099_v8  ;;  %v2465_v48 = vadd.f32 %v2464_v18, %v6646_v11  ;;  %v6649_v18 = vld [vmem:[#allocation22_spill] sm:$0xff] }
 0x4ad   :  { %3167 = vst [vmem:[#allocation2 + $0x10] sm:$0xff] %v3135_v15  ;;  %v2556_v39 = vmax.f32 %v2465_v48, 0.0  ;;  %v2388_v15 = vadd.f32 %v6649_v18, %v2299_v21  ;;  %v6655_v18 = vld [vmem:[#allocation29_spill] sm:$0xff] }
 0x4ae   :  { %v3024_v42 = vpop.f32.mrf.mxu1 }
 0x4af   :  { %v3025_v27 = vadd.f32 %v3024_v42, %v6114_v0 }
 0x4b1   :  { %v3100_v24 = vadd.f32 %v3968_v19, %v3025_v27  ;;  %v3972_v27 = vld [vmem:[%s6376_s0 + $0x38] sm:$0xff] }
 0x4b2   :  { %v2466_v40 = vpop.f32.mrf.mxu2 }
 0x4b3   :  { %v3136_v34 = vadd.f32 %v6172_v3, %v3100_v24  ;;  %v2467_v59 = vadd.f32 %v2466_v40, %v2378_v58 }
 0x4b5   :  { %3168 = vst [vmem:[#allocation2 + $0x18] sm:$0xff] %v3136_v34  ;;  %v2559_v37 = vmax.f32 %v2467_v59, 0.0 }
 0x4b6   :  { %v3027_v9 = vpop.f32.mrf.mxu1 }
 0x4b7   :  { %v2622_v0 = vpack.c.bf16 %v2559_v37, %v2556_v39  ;;  %v3028_v33 = vadd.f32 %v3027_v9, %v6119_v46  ;;  %v2960_v39 = vpop.f32.mrf.mxu0  ;;  %v3973_v37 = vld [vmem:[%s6376_s0 + $0x40] sm:$0xff] }
 0x4b9   :  { %v3101_v36 = vadd.f32 %v3969_v57, %v3028_v33  ;;  %3066 = vmatmul.bf16.gmra.mxu1 %v2622_v0  ;;  %v2951_v57 = vadd.f32 %v6201_v28, %v6198_v62  ;;  %v2954_v62 = vadd.f32 %v6215_v26, %v6210_v60  ;;  %v2309_v60 = vadd.f32 %v6076_v52, %v5752_v38 }
 0x4ba   :  { %v2469_v47 = vpop.f32.mrf.mxu2  ;;  %v2956_v26 = vadd.f32 %v6229_v12, %v6226_v49  ;;  %v2959_v49 = vadd.f32 %v6240_v25, %v6236_v44 }
 0x4bb   :  { %v3137_v41 = vadd.f32 %v6172_v3, %v3101_v36  ;;  %v2470_v55 = vadd.f32 %v2469_v47, %v6648_v45 }
 0x4bd   :  { %3169 = vst [vmem:[#allocation2 + $0x20] sm:$0xff] %v3137_v41  ;;  %v2562_v56 = vmax.f32 %v2470_v55, 0.0 }
 0x4be   :  { %v3029_v31 = vpop.f32.mrf.mxu1 }
 0x4bf   :  { %v3030_v46 = vadd.f32 %v3029_v31, %v6123_v29  ;;  %v2393_v31 = vadd.f32 %v6652_v30, %v2304_v54  ;;  %v2963_v55 = vpop.f32.mrf.mxu0 }
 0x4c1   :  { %v3102_v5 = vadd.f32 %v3970_v35, %v3030_v46  ;;  %v6653_v46 = vld [vmem:[#allocation33_spill] sm:$0xff] }
 0x4c2   :  { %v2471_v17 = vpop.f32.mrf.mxu2 }
 0x4c3   :  { %v3138_v13 = vadd.f32 %v6172_v3, %v3102_v5  ;;  %v2472_v32 = vadd.f32 %v2471_v17, %v2383_v10  ;;  %v3974_v10 = vld [vmem:[%s6376_s0 + $0x48] sm:$0xff] }
 0x4c5   :  { %3170 = vst [vmem:[#allocation2 + $0x28] sm:$0xff] %v3138_v13  ;;  %v2565_v29 = vmax.f32 %v2472_v32, 0.0 }
 0x4c6   :  { %v3032_v7 = vpop.f32.mrf.mxu1 }
 0x4c7   :  { %v2625_v1 = vpack.c.bf16 %v2565_v29, %v2562_v56  ;;  %v3033_v14 = vadd.f32 %v3032_v7, %v6128_v63  ;;  %v3975_v7 = vld [vmem:[%s6376_s0 + $0x50] sm:$0xff] }
 0x4c9   :  { %v3103_v23 = vadd.f32 %v3971_v6, %v3033_v14  ;;  %3071 = vmatmul.bf16.gmra.mxu1 %v2625_v1 }
 0x4ca   :  { %v2474_v2 = vpop.f32.mrf.mxu2 }
 0x4cb   :  { %v3139_v53 = vadd.f32 %v6172_v3, %v3103_v23  ;;  %v2475_v42 = vadd.f32 %v2474_v2, %v6650_v51  ;;  %v2965_v2 = vpop.f32.mrf.mxu0  ;;  %v3976_v51 = vld [vmem:[%s6376_s0 + $0x58] sm:$0xff] }
 0x4cd   :  { %3171 = vst [vmem:[#allocation2 + $0x30] sm:$0xff] %v3139_v53  ;;  %v2568_v19 = vmax.f32 %v2475_v42, 0.0 }
 0x4ce   :  { %v3034_v8 = vpop.f32.mrf.mxu1 }
 0x4cf   :  { %v3035_v63 = vadd.f32 %v3034_v8, %v6132_v43  ;;  %v6251_v43 = vpop.f32.mrf.mxu3  ;;  %v6654_v8 = vld [vmem:[#allocation36_spill] sm:$0xff] }
 0x4d0   :  { %v2961_v44 = vadd.f32 %v2960_v39, %v6251_v43 }
 0x4d1   :  { %v3104_v61 = vadd.f32 %v3972_v27, %v3035_v63  ;;  %v2398_v63 = vadd.f32 %v6654_v8, %v2309_v60 }
 0x4d2   :  { %v2476_v58 = vpop.f32.mrf.mxu2 }
 0x4d3   :  { %v3140_v11 = vadd.f32 %v6172_v3, %v3104_v61  ;;  %v2477_v48 = vadd.f32 %v2476_v58, %v2388_v15 }
 0x4d5   :  { %3172 = vst [vmem:[#allocation2 + $0x38] sm:$0xff] %v3140_v11  ;;  %v2571_v24 = vmax.f32 %v2477_v48, 0.0  ;;  %v2968_v48 = vpop.f32.mrf.mxu0 }
 0x4d6   :  { %v3037_v40 = vpop.f32.mrf.mxu1 }
 0x4d7   :  { %v2628_v34 = vpack.c.bf16 %v2571_v24, %v2568_v19  ;;  %v3038_v59 = vadd.f32 %v3037_v40, %v2949_v16  ;;  %v6261_v41 = vpop.f32.mrf.mxu3  ;;  %v3977_v40 = vld [vmem:[%s6376_s0 + $0x60] sm:$0xff] }
 0x4d9   :  { %v3105_v9 = vadd.f32 %v3973_v37, %v3038_v59  ;;  %3076 = vmatmul.bf16.gmra.mxu1 %v2628_v34 }
 0x4da   :  { %v2479_v0 = vpop.f32.mrf.mxu2 }
 0x4db   :  { %v3141_v33 = vadd.f32 %v6172_v3, %v3105_v9  ;;  %v2480_v50 = vadd.f32 %v2479_v0, %v6653_v46  ;;  %v2314_v9 = vadd.f32 %v6092_v22, %v5752_v38  ;;  %v2964_v22 = vadd.f32 %v2963_v55, %v6261_v41  ;;  %v3980_v55 = vld [vmem:[%s6376_s0 + $0x78] sm:$0xff] }
 0x4dd   :  { %3173 = vst [vmem:[#allocation2 + $0x40] sm:$0xff] %v3141_v33  ;;  %v2574_v28 = vmax.f32 %v2480_v50, 0.0  ;;  %v2970_v20 = vpop.f32.mrf.mxu0  ;;  %v2403_v54 = vadd.f32 %v6164_v4, %v2314_v9 }
 0x4de   :  { %v3039_v36 = vpop.f32.mrf.mxu1 }
 0x4df   :  { %v3040_v47 = vadd.f32 %v3039_v36, %v2951_v57  ;;  %v2876_v14 = vpop.f32.mrf.mxu3  ;;  %v6656_v57 = vld [vmem:[#allocation41_spill] sm:$0xff] }
 0x4e1   :  { %v3106_v45 = vadd.f32 %v3974_v10, %v3040_v47  ;;  %v3978_v47 = vld [vmem:[%s6376_s0 + $0x68] sm:$0xff] }
 0x4e2   :  { %v2481_v35 = vpop.f32.mrf.mxu2 }
 0x4e3   :  { %v3142_v5 = vadd.f32 %v6172_v3, %v3106_v45  ;;  %v2482_v17 = vadd.f32 %v2481_v35, %v2393_v31  ;;  %v3979_v35 = vld [vmem:[%s6376_s0 + $0x70] sm:$0xff] }
 0x4e5   :  { %3174 = vst [vmem:[#allocation2 + $0x48] sm:$0xff] %v3142_v5  ;;  %v2577_v13 = vmax.f32 %v2482_v17, 0.0  ;;  %v2973_v17 = vpop.f32.mrf.mxu0 }
 0x4e6   :  { %v3042_v32 = vpop.f32.mrf.mxu1 }
 0x4e7   :  { %v2631_v56 = vpack.c.bf16 %v2577_v13, %v2574_v28  ;;  %v3043_v29 = vadd.f32 %v3042_v32, %v2954_v62  ;;  %v2879_v52 = vpop.f32.mrf.mxu3  ;;  %v2966_v28 = vadd.f32 %v2965_v2, %v2876_v14  ;;  %v3981_v14 = vld [vmem:[%s6376_s0 + $0x80] sm:$0xff] }
 0x4e9   :  { %v3107_v1 = vadd.f32 %v3975_v7, %v3043_v29  ;;  %3081 = vmatmul.bf16.gmra.mxu1 %v2631_v56 }
 0x4ea   :  { %v2484_v6 = vpop.f32.mrf.mxu2 }
 0x4eb   :  { %v3143_v23 = vadd.f32 %v6172_v3, %v3107_v1  ;;  %v2485_v15 = vadd.f32 %v2484_v6, %v6655_v18  ;;  %v2969_v1 = vadd.f32 %v2968_v48, %v2879_v52  ;;  %v3982_v18 = vld [vmem:[%s6376_s0 + $0x88] sm:$0xff] }
 0x4ed   :  { %3175 = vst [vmem:[#allocation2 + $0x50] sm:$0xff] %v3143_v23  ;;  %v2580_v12 = vmax.f32 %v2485_v15, 0.0  ;;  %v2975_v7 = vpop.f32.mrf.mxu0 }
 0x4ee   :  { %v3044_v53 = vpop.f32.mrf.mxu1 }
 0x4ef   :  { %v3045_v21 = vadd.f32 %v3044_v53, %v2956_v26  ;;  %v2881_v25 = vpop.f32.mrf.mxu3 }
 0x4f0   :  { %v2971_v53 = vadd.f32 %v2970_v20, %v2881_v25 }
 0x4f1   :  { %v3108_v42 = vadd.f32 %v3976_v51, %v3045_v21 }
 0x4f2   :  { %v2486_v27 = vpop.f32.mrf.mxu2 }
 0x4f3   :  { %v3144_v61 = vadd.f32 %v6172_v3, %v3108_v42  ;;  %v2487_v58 = vadd.f32 %v2486_v27, %v2398_v63 }
 0x4f5   :  { %3176 = vst [vmem:[#allocation2 + $0x58] sm:$0xff] %v3144_v61  ;;  %v2583_v11 = vmax.f32 %v2487_v58, 0.0  ;;  %v2978_v21 = vpop.f32.mrf.mxu0 }
 0x4f6   :  { %v3047_v16 = vpop.f32.mrf.mxu1 }
 0x4f7   :  { %v2634_v19 = vpack.c.bf16 %v2583_v11, %v2580_v12  ;;  %v3048_v24 = vadd.f32 %v3047_v16, %v2959_v49  ;;  %v2884_v4 = vpop.f32.mrf.mxu3  ;;  %v3983_v49 = vld [vmem:[%s6376_s0 + $0x90] sm:$0xff] }
 0x4f8   :  { %v2974_v42 = vadd.f32 %v2973_v17, %v2884_v4 }
 0x4f9   :  { %v3109_v34 = vadd.f32 %v3977_v40, %v3048_v24  ;;  %3086 = vmatmul.bf16.gmra.mxu1 %v2634_v19  ;;  %v3984_v40 = vld [vmem:[%s6376_s0 + $0x98] sm:$0xff] }
 0x4fa   :  { %v2489_v59 = vpop.f32.mrf.mxu2 }
 0x4fb   :  { %v3145_v37 = vadd.f32 %v6172_v3, %v3109_v34  ;;  %v2490_v36 = vadd.f32 %v2489_v59, %v6656_v57 }
 0x4fd   :  { %3177 = vst [vmem:[#allocation2 + $0x60] sm:$0xff] %v3145_v37  ;;  %v2586_v43 = vmax.f32 %v2490_v36, 0.0  ;;  %v2980_v52 = vpop.f32.mrf.mxu0 }
 0x4fe   :  { %v3049_v0 = vpop.f32.mrf.mxu1 }
 0x4ff   :  { %v3050_v33 = vadd.f32 %v3049_v0, %v2961_v44  ;;  %v2886_v56 = vpop.f32.mrf.mxu3  ;;  %v3985_v0 = vld [vmem:[%s6376_s0 + $0xa0] sm:$0xff] }
 0x500   :  { %v2976_v48 = vadd.f32 %v2975_v7, %v2886_v56 }
 0x501   :  { %v3110_v30 = vadd.f32 %v3978_v47, %v3050_v33 }
 0x502   :  { %v2491_v31 = vpop.f32.mrf.mxu2 }
 0x503   :  { %v3146_v46 = vadd.f32 %v6172_v3, %v3110_v30  ;;  %v2492_v38 = vadd.f32 %v2491_v31, %v2403_v54  ;;  %v3986_v31 = vld [vmem:[%s6376_s0 + $0xa8] sm:$0xff] }
 0x505   :  { %3178 = vst [vmem:[#allocation2 + $0x68] sm:$0xff] %v3146_v46  ;;  %v2589_v39 = vmax.f32 %v2492_v38, 0.0  ;;  %v2983_v59 = vpop.f32.mrf.mxu0 }
 0x506   :  { %v3052_v50 = vpop.f32.mrf.mxu1 }
 0x507   :  { %v2637_v10 = vpack.c.bf16 %v2589_v39, %v2586_v43  ;;  %v3053_v45 = vadd.f32 %v3052_v50, %v2964_v22  ;;  %v2889_v26 = vpop.f32.mrf.mxu3 }
 0x508   :  { %v2979_v9 = vadd.f32 %v2978_v21, %v2889_v26  ;;  %v3990_v21 = vld [vmem:[%s6376_s0 + $0xc8] sm:$0xff] }
 0x509   :  { %v3111_v5 = vadd.f32 %v3979_v35, %v3053_v45  ;;  %3091 = vmatmul.bf16.gmra.mxu1 %v2637_v10  ;;  %v3987_v45 = vld [vmem:[%s6376_s0 + $0xb0] sm:$0xff] }
 0x50b   :  { %v3147_v62 = vadd.f32 %v6172_v3, %v3111_v5 }
 0x50d   :  { %3179 = vst [vmem:[#allocation2 + $0x70] sm:$0xff] %v3147_v62  ;;  %v2985_v57 = vpop.f32.mrf.mxu0 }
 0x50e   :  { %v3054_v13 = vpop.f32.mrf.mxu1 }
 0x50f   :  { %v3055_v41 = vadd.f32 %v3054_v13, %v2966_v28  ;;  %v2891_v27 = vpop.f32.mrf.mxu3 }
 0x510   :  { %v2981_v36 = vadd.f32 %v2980_v52, %v2891_v27 }
 0x511   :  { %v3112_v32 = vadd.f32 %v3980_v55, %v3055_v41  ;;  %v3988_v41 = vld [vmem:[%s6376_s0 + $0xb8] sm:$0xff] }
 0x513   :  { %v3148_v29 = vadd.f32 %v6172_v3, %v3112_v32 }
 0x515   :  { %3180 = vst [vmem:[#allocation2 + $0x78] sm:$0xff] %v3148_v29  ;;  %v2988_v39 = vpop.f32.mrf.mxu0 }
 0x516   :  { %v3057_v6 = vpop.f32.mrf.mxu1 }
 0x517   :  { %v3058_v23 = vadd.f32 %v3057_v6, %v2969_v1  ;;  %v2894_v24 = vpop.f32.mrf.mxu3  ;;  %v3989_v6 = vld [vmem:[%s6376_s0 + $0xc0] sm:$0xff] }
 0x518   :  { %v2984_v43 = vadd.f32 %v2983_v59, %v2894_v24 }
 0x519   :  { %v3113_v2 = vadd.f32 %v3981_v14, %v3058_v23 }
 0x51b   :  { %v3149_v60 = vadd.f32 %v6172_v3, %v3113_v2 }
 0x51d   :  { %3181 = vst [vmem:[#allocation2 + $0x80] sm:$0xff] %v3149_v60  ;;  %v2990_v13 = vpop.f32.mrf.mxu0 }
 0x51e   :  { %v3059_v8 = vpop.f32.mrf.mxu1 }
 0x51f   :  { %v3060_v63 = vadd.f32 %v3059_v8, %v2971_v53  ;;  %v2896_v20 = vpop.f32.mrf.mxu3 }
 0x520   :  { %v2986_v5 = vadd.f32 %v2985_v57, %v2896_v20 }
 0x521   :  { %v3114_v15 = vadd.f32 %v3982_v18, %v3060_v63 }
 0x523   :  { %v3150_v51 = vadd.f32 %v6172_v3, %v3114_v15 }
 0x525   :  { %3182 = vst [vmem:[#allocation2 + $0x88] sm:$0xff] %v3150_v51  ;;  %v2993_v14 = vpop.f32.mrf.mxu0 }
 0x526   :  { %v3062_v61 = vpop.f32.mrf.mxu1 }
 0x527   :  { %v3063_v58 = vadd.f32 %v3062_v61, %v2974_v42  ;;  %v2899_v22 = vpop.f32.mrf.mxu3  ;;  %v3991_v61 = vld [vmem:[%s6376_s0 + $0xd0] sm:$0xff] }
 0x528   :  { %v2989_v56 = vadd.f32 %v2988_v39, %v2899_v22  ;;  %v3995_v39 = vld [vmem:[%s6376_s0 + $0xf0] sm:$0xff] }
 0x529   :  { %v3115_v12 = vadd.f32 %v3983_v49, %v3063_v58 }
 0x52b   :  { %v3151_v11 = vadd.f32 %v6172_v3, %v3115_v12 }
 0x52d   :  { %3183 = vst [vmem:[#allocation2 + $0x90] sm:$0xff] %v3151_v11  ;;  %v2995_v15 = vpop.f32.mrf.mxu0 }
 0x52e   :  { %v3064_v16 = vpop.f32.mrf.mxu1 }
 0x52f   :  { %v3065_v19 = vadd.f32 %v3064_v16, %v2976_v48  ;;  %v2901_v17 = vpop.f32.mrf.mxu3 }
 0x530   :  { %v2991_v60 = vadd.f32 %v2990_v13, %v2901_v17 }
 0x531   :  { %v3116_v34 = vadd.f32 %v3984_v40, %v3065_v19  ;;  %v3992_v19 = vld [vmem:[%s6376_s0 + $0xd8] sm:$0xff] }
 0x533   :  { %v3152_v37 = vadd.f32 %v6172_v3, %v3116_v34 }
 0x535   :  { %3184 = vst [vmem:[#allocation2 + $0x98] sm:$0xff] %v3152_v37  ;;  %v2998_v11 = vpop.f32.mrf.mxu0 }
 0x536   :  { %v3067_v44 = vpop.f32.mrf.mxu1 }
 0x537   :  { %v3068_v25 = vadd.f32 %v3067_v44, %v2979_v9  ;;  %v2904_v1 = vpop.f32.mrf.mxu3 }
 0x538   :  { %v2994_v51 = vadd.f32 %v2993_v14, %v2904_v1 }
 0x539   :  { %v3117_v33 = vadd.f32 %v3985_v0, %v3068_v25  ;;  %v3993_v25 = vld [vmem:[%s6376_s0 + $0xe0] sm:$0xff] }
 0x53b   :  { %v3153_v54 = vadd.f32 %v6172_v3, %v3117_v33 }
 0x53d   :  { %3185 = vst [vmem:[#allocation2 + $0xa0] sm:$0xff] %v3153_v54  ;;  %v3000_v44 = vpop.f32.mrf.mxu0 }
 0x53e   :  { %v3069_v47 = vpop.f32.mrf.mxu1 }
 0x53f   :  { %v3070_v30 = vadd.f32 %v3069_v47, %v2981_v36  ;;  %v2906_v63 = vpop.f32.mrf.mxu3  ;;  %v3994_v47 = vld [vmem:[%s6376_s0 + $0xe8] sm:$0xff] }
 0x540   :  { %v2996_v12 = vadd.f32 %v2995_v15, %v2906_v63 }
 0x541   :  { %v3118_v46 = vadd.f32 %v3986_v31, %v3070_v30 }
 0x543   :  { %v3154_v38 = vadd.f32 %v6172_v3, %v3118_v46 }
 0x545   :  { %3186 = vst [vmem:[#allocation2 + $0xa8] sm:$0xff] %v3154_v38  ;;  %v3003_v31 = vpop.f32.mrf.mxu0 }
 0x546   :  { %v3072_v50 = vpop.f32.mrf.mxu1 }
 0x547   :  { %v3073_v10 = vadd.f32 %v3072_v50, %v2984_v43  ;;  %v2909_v49 = vpop.f32.mrf.mxu3 }
 0x548   :  { %v2999_v34 = vadd.f32 %v2998_v11, %v2909_v49 }
 0x549   :  { %v3119_v4 = vadd.f32 %v3987_v45, %v3073_v10 }
 0x54b   :  { %v3155_v35 = vadd.f32 %v6172_v3, %v3119_v4 }
 0x54d   :  { %3187 = vst [vmem:[#allocation2 + $0xb0] sm:$0xff] %v3155_v35  ;;  %v3005_v4 = vpop.f32.mrf.mxu0 }
 0x54e   :  { %v3074_v62 = vpop.f32.mrf.mxu1 }
 0x54f   :  { %v3075_v28 = vadd.f32 %v3074_v62, %v2986_v5  ;;  %v2911_v59 = vpop.f32.mrf.mxu3  ;;  %v3996_v62 = vld [vmem:[%s6376_s0 + $0xf8] sm:$0xff] }
 0x550   :  { %v3001_v20 = vadd.f32 %v3000_v44, %v2911_v59 }
 0x551   :  { %v3120_v55 = vadd.f32 %v3988_v41, %v3075_v28 }
 0x553   :  { %v3156_v32 = vadd.f32 %v6172_v3, %v3120_v55 }
 0x555   :  { %3188 = vst [vmem:[#allocation2 + $0xb8] sm:$0xff] %v3156_v32 }
 0x556   :  { %v3077_v29 = vpop.f32.mrf.mxu1 }
 0x557   :  { %v3078_v7 = vadd.f32 %v3077_v29, %v2989_v56  ;;  %v2914_v36 = vpop.f32.mrf.mxu3 }
 0x558   :  { %v3004_v38 = vadd.f32 %v3003_v31, %v2914_v36 }
 0x559   :  { %v3121_v23 = vadd.f32 %v3989_v6, %v3078_v7 }
 0x55b   :  { %v3157_v2 = vadd.f32 %v6172_v3, %v3121_v23 }
 0x55d   :  { %3189 = vst [vmem:[#allocation2 + $0xc0] sm:$0xff] %v3157_v2 }
 0x55e   :  { %v3079_v26 = vpop.f32.mrf.mxu1 }
 0x55f   :  { %v3080_v53 = vadd.f32 %v3079_v26, %v2991_v60  ;;  %v2916_v10 = vpop.f32.mrf.mxu3 }
 0x560   :  { %v3006_v35 = vadd.f32 %v3005_v4, %v2916_v10 }
 0x561   :  { %v3122_v8 = vadd.f32 %v3990_v21, %v3080_v53 }
 0x563   :  { %v3158_v18 = vadd.f32 %v6172_v3, %v3122_v8 }
 0x565   :  { %3190 = vst [vmem:[#allocation2 + $0xc8] sm:$0xff] %v3158_v18 }
 0x566   :  { %v3082_v42 = vpop.f32.mrf.mxu1 }
 0x567   :  { %v3083_v27 = vadd.f32 %v3082_v42, %v2994_v51 }
 0x569   :  { %v3123_v58 = vadd.f32 %v3991_v61, %v3083_v27 }
 0x56b   :  { %v3159_v52 = vadd.f32 %v6172_v3, %v3123_v58 }
 0x56d   :  { %3191 = vst [vmem:[#allocation2 + $0xd0] sm:$0xff] %v3159_v52 }
 0x56e   :  { %v3084_v48 = vpop.f32.mrf.mxu1 }
 0x56f   :  { %v3085_v16 = vadd.f32 %v3084_v48, %v2996_v12 }
 0x571   :  { %v3124_v24 = vadd.f32 %v3992_v19, %v3085_v16 }
 0x573   :  { %v3160_v40 = vadd.f32 %v6172_v3, %v3124_v24 }
 0x575   :  { %3192 = vst [vmem:[#allocation2 + $0xd8] sm:$0xff] %v3160_v40 }
 0x576   :  { %v3087_v37 = vpop.f32.mrf.mxu1 }
 0x577   :  { %v3088_v9 = vadd.f32 %v3087_v37, %v2999_v34 }
 0x579   :  { %v3125_v0 = vadd.f32 %v3993_v25, %v3088_v9 }
 0x57b   :  { %v3161_v33 = vadd.f32 %v6172_v3, %v3125_v0 }
 0x57d   :  { %3193 = vst [vmem:[#allocation2 + $0xe0] sm:$0xff] %v3161_v33 }
 0x57e   :  { %v3089_v54 = vpop.f32.mrf.mxu1 }
 0x57f   :  { %v3090_v57 = vadd.f32 %v3089_v54, %v3001_v20 }
 0x581   :  { %v3126_v30 = vadd.f32 %v3994_v47, %v3090_v57 }
 0x583   :  { %v3162_v46 = vadd.f32 %v6172_v3, %v3126_v30 }
 0x585   :  { %3194 = vst [vmem:[#allocation2 + $0xe8] sm:$0xff] %v3162_v46 }
 0x586   :  { %v3092_v22 = vpop.f32.mrf.mxu1 }
 0x587   :  { %v3093_v43 = vadd.f32 %v3092_v22, %v3004_v38 }
 0x589   :  { %v3127_v50 = vadd.f32 %v3995_v39, %v3093_v43 }
 0x58b   :  { %v3163_v45 = vadd.f32 %v6172_v3, %v3127_v50 }
 0x58d   :  { %3195 = vst [vmem:[#allocation2 + $0xf0] sm:$0xff] %v3163_v45 }
 0x58e   :  { %v3094_v5 = vpop.f32.mrf.mxu1 }
 0x58f   :  { %v3095_v17 = vadd.f32 %v3094_v5, %v3006_v35 }
 0x591   :  { %v3128_v28 = vadd.f32 %v3996_v62, %v3095_v17 }
 0x593   :  { %v3164_v13 = vadd.f32 %v6172_v3, %v3128_v28 }
 0x595   :  { %3196 = vst [vmem:[#allocation2 + $0xf8] sm:$0xff] %v3164_v13 }
 0x596   :  { %3209 = dma.vmem_to_hbm [thread:$0]  %s3202_s1, 4096, %s3204_s25, [#allocation3], %s4024_s28, %s4024_s28, %s4025_s29  }
 0x597   :  { %4021 = dma.done.wait [#allocation3], 4096  }
 0x598   :  { %4022 = vsyncadd [#allocation3], 4294963200 }
 0x599   :  { %3214 = vsyncpa [#allocation3], 1 }

</bundles_post_ra>
